<compile_context>
chip_gen: v7x
topology: tpu7x:2x2x1
jax: 0.10.0
libtpu: 0.0.40
codegen_flags: <defaults>
</compile_context>

<pallas_src>
import functools
import math

import jax
import jax.numpy as jnp
from jax.experimental import pallas as pl
from jax.experimental.pallas import tpu as pltpu


def _round_up(x, m):
    return ((x + m - 1) // m) * m


# Static layer configuration (python ints only; arrays live in the params dict).
_LAYERS = (
    dict(kh=11, kw=11, stride=4, pad=0, groups=1, cin=3,   cout=96),
    dict(kh=5,  kw=5,  stride=1, pad=2, groups=2, cin=96,  cout=256),
    dict(kh=3,  kw=3,  stride=1, pad=1, groups=1, cin=256, cout=384),
    dict(kh=1,  kw=1,  stride=1, pad=0, groups=1, cin=384, cout=64),
)


# ---------------------------------------------------------------------------
# Pallas kernels
# ---------------------------------------------------------------------------

def _matmul_bias_relu_kernel(p_ref, w_ref, b_ref, o_ref):
    """relu(patches @ weights + bias) for one (group, M-tile, N-tile) block."""
    acc = jnp.dot(p_ref[...], w_ref[...], preferred_element_type=jnp.float32)
    o_ref[...] = jnp.maximum(acc + b_ref[...], 0.0)


def _fused_conv_conv_kernel(p_ref, w3_ref, b3_ref, w4_ref, b4_ref, o_ref):
    """relu(relu(P @ W3 + b3) @ W4 + b4) -- conv3 + conv4(1x1) fused."""
    h = jnp.dot(p_ref[...], w3_ref[...], preferred_element_type=jnp.float32)
    h = jnp.maximum(h + b3_ref[...], 0.0).astype(jnp.bfloat16)
    acc = jnp.dot(h, w4_ref[...], preferred_element_type=jnp.float32)
    o_ref[...] = jnp.maximum(acc + b4_ref[...], 0.0)


def _maxpool_lrn_kernel(win_ref, o_ref, *, size, alpha, beta, k):
    """Fused MaxPool2d(3, stride=2) + CrossMapLRN2d on a [tm, C] row slab.

    win_ref: [9, tm, C] -- the 9 pooling-window views (precomputed in wrapper).
    o_ref:   [tm, C]    -- bf16 (consumed only by the next bf16 conv matmul).
    """
    m = win_ref[0]
    for i in range(1, 9):                      # pure-VPU shift-and-max
        m = jnp.maximum(m, win_ref[i])

    c = m.shape[-1]
    half = size // 2
    row = jax.lax.broadcasted_iota(jnp.int32, (c, c), 0)
    col = jax.lax.broadcasted_iota(jnp.int32, (c, c), 1)
    band = (jnp.abs(row - col) <= half).astype(jnp.float32)   # in-register band
    s = jnp.dot(m * m, band, preferred_element_type=jnp.float32)
    base = k + (alpha / size) * s              # >= k = 1 > 0
    if beta == 0.75:
        r = jax.lax.rsqrt(base)                # base^-1/2
        inv = r * jax.lax.rsqrt(base * r)      # base^-1/2 * base^-1/4 = base^-3/4
    else:
        inv = jnp.exp(-beta * jnp.log(base))
    o_ref[...] = (m * inv).astype(o_ref.dtype)


# ---------------------------------------------------------------------------
# Wrappers
# ---------------------------------------------------------------------------

def _im2col(x_nhwc, kh, kw, stride, pad):
    """Patch extraction (pure indexing glue). Returns [N*OH*OW, KH*KW*Cin], OH, OW."""
    x = jnp.pad(x_nhwc, ((0, 0), (pad, pad), (pad, pad), (0, 0)))
    n, h, w, c = x.shape
    oh = (h - kh) // stride + 1
    ow = (w - kw) // stride + 1
    cols = []
    for i in range(kh):
        for j in range(kw):
            cols.append(
                x[:, i:i + stride * (oh - 1) + 1:stride,
                     j:j + stride * (ow - 1) + 1:stride, :])
    patches = jnp.stack(cols, axis=3)                    # [N, OH, OW, KH*KW, C]
    return patches.reshape(n * oh * ow, kh * kw * c), oh, ow


def _grouped_matmul_bias_relu(patches, wmat, bias, tm, tn=128):
    """patches [G, Mp, Kp] bf16, wmat [G, Kp, Np] bf16, bias [G, 1, Np] f32."""
    g_dim, mp, kp = patches.shape
    np_dim = wmat.shape[-1]
    tn = min(tn, np_dim)
    grid = (g_dim, mp // tm, np_dim // tn)
    return pl.pallas_call(
        _matmul_bias_relu_kernel,
        out_shape=jax.ShapeDtypeStruct((g_dim, mp, np_dim), jnp.float32),
        grid=grid,
        in_specs=[
            pl.BlockSpec((None, tm, kp), lambda g, i, j: (g, i, 0)),
            pl.BlockSpec((None, kp, tn), lambda g, i, j: (g, 0, j)),
            pl.BlockSpec((None, 1, tn), lambda g, i, j: (g, 0, j)),
        ],
        out_specs=pl.BlockSpec((None, tm, tn), lambda g, i, j: (g, i, j)),
        compiler_params=pltpu.CompilerParams(
            dimension_semantics=("parallel", "parallel", "parallel")),
    )(patches, wmat, bias)


def conv_relu_pallas(x_nhwc, wmat, bias, cfg):
    """Conv2d + ReLU via im2col + grouped Pallas matmul.  Output channels may be
    zero-padded up to a multiple of 128 (harmless: zero weights, zero bias)."""
    n = x_nhwc.shape[0]
    groups = cfg["groups"]
    cin_g = cfg["cin"] // groups
    kp = wmat.shape[1]

    patch_groups = []
    oh = ow = None
    for g in range(groups):
        xg = x_nhwc[..., g * cin_g:(g + 1) * cin_g]
        p, oh, ow = _im2col(xg, cfg["kh"], cfg["kw"], cfg["stride"], cfg["pad"])
        patch_groups.append(p)
    patches = jnp.stack(patch_groups, axis=0)            # [G, M, K]
    m = patches.shape[1]

    tm = min(128, _round_up(m, 8))
    mp = _round_up(m, tm)
    patches = jnp.pad(patches, ((0, 0), (0, mp - m), (0, kp - patches.shape[2])))
    patches = patches.astype(jnp.bfloat16)

    out = _grouped_matmul_bias_relu(patches, wmat, bias, tm)   # [G, Mp, Np]
    out = out[:, :m]                                           # [G, M, Np]
    np_dim = out.shape[-1]
    out = jnp.transpose(out, (1, 0, 2)).reshape(m, groups * np_dim)
    return out.reshape(n, oh, ow, groups * np_dim)


def conv34_relu_pallas(x_nhwc, prep):
    """Fused conv3(3x3, 256->384) + ReLU + conv4(1x1, 384->64) + ReLU.

    conv4's im2col is the identity, so the pair runs as ONE Pallas kernel with
    the 384-channel intermediate kept on-chip (no HBM roundtrip)."""
    cfg3 = _LAYERS[2]
    w3, b3 = prep["w3"][0], prep["b3"][0]      # [Kp3, 384], [1, 384]
    w4, b4 = prep["w4"][0], prep["b4"][0]      # [384, 128], [1, 128]
    kp3, np3 = w3.shape
    np4 = w4.shape[1]
    assert w4.shape[0] == np3, "conv3 cout padding must match conv4 K"

    n = x_nhwc.shape[0]
    p, oh, ow = _im2col(x_nhwc, cfg3["kh"], cfg3["kw"], cfg3["stride"], cfg3["pad"])
    m, kdim = p.shape
    tm = min(128, _round_up(m, 8))
    mp = _round_up(m, tm)
    p = jnp.pad(p, ((0, mp - m), (0, kp3 - kdim))).astype(jnp.bfloat16)

    out = pl.pallas_call(
        _fused_conv_conv_kernel,
        out_shape=jax.ShapeDtypeStruct((mp, np4), jnp.float32),
        grid=(mp // tm,),
        in_specs=[
            pl.BlockSpec((tm, kp3), lambda i: (i, 0)),
            pl.BlockSpec((kp3, np3), lambda i: (0, 0)),
            pl.BlockSpec((1, np3), lambda i: (0, 0)),
            pl.BlockSpec((np3, np4), lambda i: (0, 0)),
            pl.BlockSpec((1, np4), lambda i: (0, 0)),
        ],
        out_specs=pl.BlockSpec((tm, np4), lambda i: (i, 0)),
        compiler_params=pltpu.CompilerParams(dimension_semantics=("parallel",)),
    )(p, w3, b3, w4, b4)
    cout = _LAYERS[3]["cout"]
    return out[:m, :cout].reshape(n, oh, ow, cout)


def maxpool_lrn_pallas(x_nhwc, *, size=5, alpha=1e-4, beta=0.75, k=1.0,
                       out_dtype=jnp.bfloat16):
    """Fused MaxPool2d(kernel=3, stride=2) + CrossMapLRN2d.  Output is bf16
    (numerically identical to casting at the next conv's matmul input)."""
    n, h, w, c = x_nhwc.shape
    oh = (h - 3) // 2 + 1
    ow = (w - 3) // 2 + 1
    m = n * oh * ow

    # Precompute the 9 strided pooling views as a lane-dense [9, M, C] slab.
    views = []
    for di in range(3):
        for dj in range(3):
            v = jax.lax.slice(
                x_nhwc,
                (0, di, dj, 0),
                (n, di + 2 * (oh - 1) + 1, dj + 2 * (ow - 1) + 1, c),
                (1, 2, 2, 1))
            views.append(v.reshape(m, c))
    win = jnp.stack(views, axis=0)                        # [9, M, C]

    tm = min(128, _round_up(m, 8))
    mp = _round_up(m, tm)
    win = jnp.pad(win, ((0, 0), (0, mp - m), (0, 0)))

    out = pl.pallas_call(
        functools.partial(_maxpool_lrn_kernel, size=size, alpha=alpha,
                          beta=beta, k=k),
        out_shape=jax.ShapeDtypeStruct((mp, c), out_dtype),
        grid=(mp // tm,),
        in_specs=[pl.BlockSpec((9, tm, c), lambda i: (0, i, 0))],
        out_specs=pl.BlockSpec((tm, c), lambda i: (i, 0)),
        compiler_params=pltpu.CompilerParams(dimension_semantics=("parallel",)),
    )(win)
    return out[:m].reshape(n, oh, ow, c)


# ---------------------------------------------------------------------------
# Parameter handling
# ---------------------------------------------------------------------------

def init_params(key):
    """Torch-style parameters (OIHW weights + bias), uniform init."""
    def conv_init(kk, cout, cin, kh, kw):
        kw_, kb_ = jax.random.split(kk)
        bound = 1.0 / math.sqrt(cin * kh * kw)
        wgt = jax.random.uniform(kw_, (cout, cin, kh, kw), jnp.float32, -bound, bound)
        bias = jax.random.uniform(kb_, (cout,), jnp.float32, -bound, bound)
        return wgt, bias

    keys = jax.random.split(key, 4)
    params = {}
    for idx, (cfg, kk) in enumerate(zip(_LAYERS, keys), start=1):
        w, b = conv_init(kk, cfg["cout"], cfg["cin"] // cfg["groups"],
                         cfg["kh"], cfg["kw"])
        params[f"w{idx}"] = w
        params[f"b{idx}"] = b
    return params


def prepare_params(params):
    """One-time transform: OIHW weights -> padded [G, Kp, Np] bf16 matmul weights
    and [G, 1, Np] f32 biases (hoisted out of the forward graph)."""
    prep = {}
    for idx, cfg in enumerate(_LAYERS, start=1):
        w = params[f"w{idx}"]
        b = params[f"b{idx}"]
        groups = cfg["groups"]
        cout_g = cfg["cout"] // groups
        cin_g = cfg["cin"] // groups
        kdim = cfg["kh"] * cfg["kw"] * cin_g
        kp = _round_up(kdim, 128)
        np_dim = _round_up(cout_g, 128)
        wmats, biases = [], []
        for g in range(groups):
            wg = w[g * cout_g:(g + 1) * cout_g]              # [cout_g, cin_g, kh, kw]
            wm = jnp.transpose(wg, (2, 3, 1, 0)).reshape(kdim, cout_g)
            wm = jnp.pad(wm, ((0, kp - kdim), (0, np_dim - cout_g)))
            bg = jnp.pad(b[g * cout_g:(g + 1) * cout_g], (0, np_dim - cout_g))
            wmats.append(wm)
            biases.append(bg)
        prep[f"w{idx}"] = jnp.stack(wmats, 0).astype(jnp.bfloat16)
        prep[f"b{idx}"] = jnp.stack(biases, 0).reshape(groups, 1, np_dim)
        prep[f"b{idx}"] = prep[f"b{idx}"].astype(jnp.float32)
    return prep


# ---------------------------------------------------------------------------
# Model: ItrackerImageModel.forward
# ---------------------------------------------------------------------------

def itracker_image_model(x_nchw, prep):
    # NCHW -> NHWC; bf16 here is equivalent to casting the im2col patches later.
    x = jnp.transpose(x_nchw, (0, 2, 3, 1)).astype(jnp.bfloat16)
    x = conv_relu_pallas(x, prep["w1"], prep["b1"], _LAYERS[0])   # f32, C=128 (96 real)
    x = maxpool_lrn_pallas(x)                                     # bf16
    x = conv_relu_pallas(x, prep["w2"], prep["b2"], _LAYERS[1])   # f32, C=256
    x = maxpool_lrn_pallas(x)                                     # bf16
    x = conv34_relu_pallas(x, prep)                               # f32, C=64 (fused)
    n = x.shape[0]
    return jnp.transpose(x, (0, 3, 1, 2)).reshape(n, -1)          # NCHW flatten order


# ---------------------------------------------------------------------------
# Pure-JAX reference (correctness check only)
# ---------------------------------------------------------------------------

def reference_forward(x_nchw, params):
    def conv(x, w, b, stride, pad, groups=1):
        y = jax.lax.conv_general_dilated(
            x, w, window_strides=(stride, stride),
            padding=((pad, pad), (pad, pad)),
            dimension_numbers=("NCHW", "OIHW", "NCHW"),
            feature_group_count=groups,
            precision=jax.lax.Precision.HIGHEST)
        return y + b[None, :, None, None]

    def relu(x):
        return jnp.maximum(x, 0.0)

    def maxpool(x):
        return jax.lax.reduce_window(x, -jnp.inf, jax.lax.max,
                                     (1, 1, 3, 3), (1, 1, 2, 2), "VALID")

    def lrn(x, size=5, alpha=1e-4, beta=0.75, k=1.0):
        c = x.shape[1]
        half = size // 2
        x2p = jnp.pad(x * x, ((0, 0), (half, half), (0, 0), (0, 0)))
        s = sum(x2p[:, d:d + c] for d in range(size))
        return x / (k + (alpha / size) * s) ** beta

    x = relu(conv(x_nchw, params["w1"], params["b1"], 4, 0))
    x = lrn(maxpool(x))
    x = relu(conv(x, params["w2"], params["b2"], 1, 2, groups=2))
    x = lrn(maxpool(x))
    x = relu(conv(x, params["w3"], params["b3"], 1, 1))
    x = relu(conv(x, params["w4"], params["b4"], 1, 0))
    return x.reshape(x.shape[0], -1)


# ---------------------------------------------------------------------------

if __name__ == "__main__":
    key = jax.random.PRNGKey(0)
    kp, kx = jax.random.split(key)
    params = init_params(kp)
    prep = prepare_params(params)
    # Spatial size consistent with the conv stack: 63 -> 14 -> 6 -> 6 -> 2 -> 2
    x = jax.random.normal(kx, (2, 3, 63, 63), jnp.float32)

    fwd = jax.jit(itracker_image_model)
    out = jax.block_until_ready(fwd(x, prep))
    assert out.shape == (2, 64 * 2 * 2), out.shape

    ref = jax.block_until_ready(reference_forward(x, params))
    rel_err = float(jnp.max(jnp.abs(out - ref)) / (jnp.max(jnp.abs(ref)) + 1e-6))
    assert rel_err < 5e-2, f"mismatch vs reference: rel_err={rel_err}"

    print("KERNEL_OK")
</pallas_src>

<mosaic_0001>
module attributes {stable_mosaic.version = 11 : i64} {
  func.func @_matmul_bias_relu_kernel(%arg0: i32, %arg1: i32, %arg2: i32, %arg3: memref<1x128x384xbf16, #tpu.memory_space<vmem>>, %arg4: memref<1x384x128xbf16, #tpu.memory_space<vmem>>, %arg5: memref<1x1x128xf32, #tpu.memory_space<vmem>>, %arg6: memref<1x128x128xf32, #tpu.memory_space<vmem>>) attributes {dimension_semantics = [#tpu.dimension_semantics<parallel>, #tpu.dimension_semantics<parallel>, #tpu.dimension_semantics<parallel>], iteration_bounds = array<i64: 1, 4, 1>, scalar_prefetch = 0 : i64, scratch_operands = 0 : i64, tpu.core_type = #tpu.core_type<tc>, window_params = [{transform_indices = @transform_0, window_bounds = array<i64: 1, 128, 384>}, {transform_indices = @transform_1, window_bounds = array<i64: 1, 384, 128>}, {transform_indices = @transform_2, window_bounds = array<i64: 1, 1, 128>}, {transform_indices = @transform_3, window_bounds = array<i64: 1, 128, 128>}]} {
    %c0 = arith.constant 0 : index
    %c0_0 = arith.constant 0 : index
    %c0_1 = arith.constant 0 : index
    %0 = vector.load %arg3[%c0, %c0_0, %c0_1] : memref<1x128x384xbf16, #tpu.memory_space<vmem>>, vector<1x128x384xbf16>
    %1 = vector.shape_cast %0 : vector<1x128x384xbf16> to vector<128x384xbf16>
    %c0_2 = arith.constant 0 : index
    %c0_3 = arith.constant 0 : index
    %c0_4 = arith.constant 0 : index
    %2 = vector.load %arg4[%c0_2, %c0_3, %c0_4] : memref<1x384x128xbf16, #tpu.memory_space<vmem>>, vector<1x384x128xbf16>
    %3 = vector.shape_cast %2 : vector<1x384x128xbf16> to vector<384x128xbf16>
    %cst = arith.constant dense<0.000000e+00> : vector<128x128xf32>
    %4 = tpu.matmul %1, %3, %cst {dimension_numbers = #tpu.dot_dimension_numbers<[1], [0], [0], [1], [0, 0, 1, 1], [], []>} : vector<128x384xbf16>, vector<384x128xbf16>, vector<128x128xf32> -> vector<128x128xf32>
    %c0_5 = arith.constant 0 : index
    %c0_6 = arith.constant 0 : index
    %c0_7 = arith.constant 0 : index
    %5 = vector.load %arg5[%c0_5, %c0_6, %c0_7] : memref<1x1x128xf32, #tpu.memory_space<vmem>>, vector<1x1x128xf32>
    %6 = vector.shape_cast %5 : vector<1x1x128xf32> to vector<1x128xf32>
    %7 = vector.broadcast %6 : vector<1x128xf32> to vector<128x128xf32>
    %8 = arith.addf %4, %7 : vector<128x128xf32>
    %cst_8 = arith.constant 0.000000e+00 : f32
    %9 = vector.broadcast %cst_8 : f32 to vector<128x128xf32>
    %10 = arith.maximumf %8, %9 : vector<128x128xf32>
    %c0_9 = arith.constant 0 : index
    %c0_10 = arith.constant 0 : index
    %c0_11 = arith.constant 0 : index
    %11 = vector.load %arg6[%c0_9, %c0_10, %c0_11] : memref<1x128x128xf32, #tpu.memory_space<vmem>>, vector<1x128x128xf32>
    %12 = vector.shape_cast %11 : vector<1x128x128xf32> to vector<128x128xf32>
    %13 = vector.shape_cast %10 : vector<128x128xf32> to vector<1x128x128xf32>
    tpu.vector_store %arg6[%c0_9, %c0_10, %c0_11], %13 {strides = array<i32>} : memref<1x128x128xf32, #tpu.memory_space<vmem>>, vector<1x128x128xf32>,
    return
  }
  func.func @transform_0(%arg0: i32, %arg1: i32, %arg2: i32) -> (i32, i32, i32) {
    %c0_i32 = arith.constant 0 : i32
    %c0_i32_0 = arith.constant 0 : i32
    return %arg0, %arg1, %c0_i32 : i32, i32, i32
  }
  func.func @transform_1(%arg0: i32, %arg1: i32, %arg2: i32) -> (i32, i32, i32) {
    %c0_i32 = arith.constant 0 : i32
    %c0_i32_0 = arith.constant 0 : i32
    return %arg0, %c0_i32, %arg2 : i32, i32, i32
  }
  func.func @transform_2(%arg0: i32, %arg1: i32, %arg2: i32) -> (i32, i32, i32) {
    %c0_i32 = arith.constant 0 : i32
    %c0_i32_0 = arith.constant 0 : i32
    return %arg0, %c0_i32, %arg2 : i32, i32, i32
  }
  func.func @transform_3(%arg0: i32, %arg1: i32, %arg2: i32) -> (i32, i32, i32) {
    %c0_i32 = arith.constant 0 : i32
    return %arg0, %arg1, %arg2 : i32, i32, i32
  }
}

module attributes {stable_mosaic.version = 11 : i64} {
  func.func @_maxpool_lrn_kernel(%arg0: i32, %arg1: memref<9x72x128xf32, #tpu.memory_space<vmem>>, %arg2: memref<72x128xbf16, #tpu.memory_space<vmem>>) attributes {dimension_semantics = [#tpu.dimension_semantics<parallel>], iteration_bounds = array<i64: 1>, scalar_prefetch = 0 : i64, scratch_operands = 0 : i64, tpu.core_type = #tpu.core_type<tc>, window_params = [{transform_indices = @transform_0, window_bounds = array<i64: 9, 72, 128>}, {transform_indices = @transform_1, window_bounds = array<i64: 72, 128>}]} {
    %c0 = arith.constant 0 : index
    %c0_0 = arith.constant 0 : index
    %c0_1 = arith.constant 0 : index
    %0 = vector.load %arg1[%c0, %c0_0, %c0_1] : memref<9x72x128xf32, #tpu.memory_space<vmem>>, vector<1x72x128xf32>
    %1 = vector.shape_cast %0 : vector<1x72x128xf32> to vector<72x128xf32>
    %c1 = arith.constant 1 : index
    %c0_2 = arith.constant 0 : index
    %c0_3 = arith.constant 0 : index
    %2 = vector.load %arg1[%c1, %c0_2, %c0_3] : memref<9x72x128xf32, #tpu.memory_space<vmem>>, vector<1x72x128xf32>
    %3 = vector.shape_cast %2 : vector<1x72x128xf32> to vector<72x128xf32>
    %4 = arith.maximumf %1, %3 : vector<72x128xf32>
    %c2 = arith.constant 2 : index
    %c0_4 = arith.constant 0 : index
    %c0_5 = arith.constant 0 : index
    %5 = vector.load %arg1[%c2, %c0_4, %c0_5] : memref<9x72x128xf32, #tpu.memory_space<vmem>>, vector<1x72x128xf32>
    %6 = vector.shape_cast %5 : vector<1x72x128xf32> to vector<72x128xf32>
    %7 = arith.maximumf %4, %6 : vector<72x128xf32>
    %c3 = arith.constant 3 : index
    %c0_6 = arith.constant 0 : index
    %c0_7 = arith.constant 0 : index
    %8 = vector.load %arg1[%c3, %c0_6, %c0_7] : memref<9x72x128xf32, #tpu.memory_space<vmem>>, vector<1x72x128xf32>
    %9 = vector.shape_cast %8 : vector<1x72x128xf32> to vector<72x128xf32>
    %10 = arith.maximumf %7, %9 : vector<72x128xf32>
    %c4 = arith.constant 4 : index
    %c0_8 = arith.constant 0 : index
    %c0_9 = arith.constant 0 : index
    %11 = vector.load %arg1[%c4, %c0_8, %c0_9] : memref<9x72x128xf32, #tpu.memory_space<vmem>>, vector<1x72x128xf32>
    %12 = vector.shape_cast %11 : vector<1x72x128xf32> to vector<72x128xf32>
    %13 = arith.maximumf %10, %12 : vector<72x128xf32>
    %c5 = arith.constant 5 : index
    %c0_10 = arith.constant 0 : index
    %c0_11 = arith.constant 0 : index
    %14 = vector.load %arg1[%c5, %c0_10, %c0_11] : memref<9x72x128xf32, #tpu.memory_space<vmem>>, vector<1x72x128xf32>
    %15 = vector.shape_cast %14 : vector<1x72x128xf32> to vector<72x128xf32>
    %16 = arith.maximumf %13, %15 : vector<72x128xf32>
    %c6 = arith.constant 6 : index
    %c0_12 = arith.constant 0 : index
    %c0_13 = arith.constant 0 : index
    %17 = vector.load %arg1[%c6, %c0_12, %c0_13] : memref<9x72x128xf32, #tpu.memory_space<vmem>>, vector<1x72x128xf32>
    %18 = vector.shape_cast %17 : vector<1x72x128xf32> to vector<72x128xf32>
    %19 = arith.maximumf %16, %18 : vector<72x128xf32>
    %c7 = arith.constant 7 : index
    %c0_14 = arith.constant 0 : index
    %c0_15 = arith.constant 0 : index
    %20 = vector.load %arg1[%c7, %c0_14, %c0_15] : memref<9x72x128xf32, #tpu.memory_space<vmem>>, vector<1x72x128xf32>
    %21 = vector.shape_cast %20 : vector<1x72x128xf32> to vector<72x128xf32>
    %22 = arith.maximumf %19, %21 : vector<72x128xf32>
    %c8 = arith.constant 8 : index
    %c0_16 = arith.constant 0 : index
    %c0_17 = arith.constant 0 : index
    %23 = vector.load %arg1[%c8, %c0_16, %c0_17] : memref<9x72x128xf32, #tpu.memory_space<vmem>>, vector<1x72x128xf32>
    %24 = vector.shape_cast %23 : vector<1x72x128xf32> to vector<72x128xf32>
    %25 = arith.maximumf %22, %24 : vector<72x128xf32>
    %26 = tpu.iota {dimensions = array<i32: 0>} : vector<128x128xi32>
    %27 = tpu.iota {dimensions = array<i32: 1>} : vector<128x128xi32>
    %28 = arith.subi %26, %27 : vector<128x128xi32>
    %29 = math.absi %28 : vector<128x128xi32>
    %c2_i32 = arith.constant 2 : i32
    %30 = vector.broadcast %c2_i32 : i32 to vector<128x128xi32>
    %31 = arith.cmpi sle, %29, %30 : vector<128x128xi32>
    %32 = arith.extui %31 : vector<128x128xi1> to vector<128x128xi32>
    %33 = arith.sitofp %32 : vector<128x128xi32> to vector<128x128xf32>
    %34 = arith.mulf %25, %25 : vector<72x128xf32>
    %cst = arith.constant dense<0.000000e+00> : vector<72x128xf32>
    %35 = tpu.matmul %34, %33, %cst {dimension_numbers = #tpu.dot_dimension_numbers<[1], [0], [0], [1], [0, 0, 1, 1], [], []>} : vector<72x128xf32>, vector<128x128xf32>, vector<72x128xf32> -> vector<72x128xf32>
    %cst_18 = arith.constant 2.000000e-05 : f32
    %36 = vector.broadcast %cst_18 : f32 to vector<72x128xf32>
    %37 = arith.mulf %36, %35 : vector<72x128xf32>
    %cst_19 = arith.constant 1.000000e+00 : f32
    %38 = vector.broadcast %cst_19 : f32 to vector<72x128xf32>
    %39 = arith.addf %38, %37 : vector<72x128xf32>
    %40 = math.rsqrt %39 : vector<72x128xf32>
    %41 = arith.mulf %39, %40 : vector<72x128xf32>
    %42 = math.rsqrt %41 : vector<72x128xf32>
    %43 = arith.mulf %40, %42 : vector<72x128xf32>
    %44 = arith.mulf %25, %43 : vector<72x128xf32>
    %45 = arith.truncf %44 : vector<72x128xf32> to vector<72x128xbf16>
    %c0_20 = arith.constant 0 : index
    %c0_21 = arith.constant 0 : index
    %46 = vector.load %arg2[%c0_20, %c0_21] : memref<72x128xbf16, #tpu.memory_space<vmem>>, vector<72x128xbf16>
    tpu.vector_store %arg2[%c0_20, %c0_21], %45 {strides = array<i32>} : memref<72x128xbf16, #tpu.memory_space<vmem>>, vector<72x128xbf16>,
    return
  }
  func.func @transform_0(%arg0: i32) -> (i32, i32, i32) {
    %c0_i32 = arith.constant 0 : i32
    %c0_i32_0 = arith.constant 0 : i32
    %c0_i32_1 = arith.constant 0 : i32
    return %c0_i32, %arg0, %c0_i32_0 : i32, i32, i32
  }
  func.func @transform_1(%arg0: i32) -> (i32, i32) {
    %c0_i32 = arith.constant 0 : i32
    %c0_i32_0 = arith.constant 0 : i32
    return %arg0, %c0_i32 : i32, i32
  }
}

module attributes {stable_mosaic.version = 11 : i64} {
  func.func @_matmul_bias_relu_kernel(%arg0: i32, %arg1: i32, %arg2: i32, %arg3: memref<1x72x1280xbf16, #tpu.memory_space<vmem>>, %arg4: memref<1x1280x128xbf16, #tpu.memory_space<vmem>>, %arg5: memref<1x1x128xf32, #tpu.memory_space<vmem>>, %arg6: memref<1x72x128xf32, #tpu.memory_space<vmem>>) attributes {dimension_semantics = [#tpu.dimension_semantics<parallel>, #tpu.dimension_semantics<parallel>, #tpu.dimension_semantics<parallel>], iteration_bounds = array<i64: 2, 1, 1>, scalar_prefetch = 0 : i64, scratch_operands = 0 : i64, tpu.core_type = #tpu.core_type<tc>, window_params = [{transform_indices = @transform_0, window_bounds = array<i64: 1, 72, 1280>}, {transform_indices = @transform_1, window_bounds = array<i64: 1, 1280, 128>}, {transform_indices = @transform_2, window_bounds = array<i64: 1, 1, 128>}, {transform_indices = @transform_3, window_bounds = array<i64: 1, 72, 128>}]} {
    %c0 = arith.constant 0 : index
    %c0_0 = arith.constant 0 : index
    %c0_1 = arith.constant 0 : index
    %0 = vector.load %arg3[%c0, %c0_0, %c0_1] : memref<1x72x1280xbf16, #tpu.memory_space<vmem>>, vector<1x72x1280xbf16>
    %1 = vector.shape_cast %0 : vector<1x72x1280xbf16> to vector<72x1280xbf16>
    %c0_2 = arith.constant 0 : index
    %c0_3 = arith.constant 0 : index
    %c0_4 = arith.constant 0 : index
    %2 = vector.load %arg4[%c0_2, %c0_3, %c0_4] : memref<1x1280x128xbf16, #tpu.memory_space<vmem>>, vector<1x1280x128xbf16>
    %3 = vector.shape_cast %2 : vector<1x1280x128xbf16> to vector<1280x128xbf16>
    %cst = arith.constant dense<0.000000e+00> : vector<72x128xf32>
    %4 = tpu.matmul %1, %3, %cst {dimension_numbers = #tpu.dot_dimension_numbers<[1], [0], [0], [1], [0, 0, 1, 1], [], []>} : vector<72x1280xbf16>, vector<1280x128xbf16>, vector<72x128xf32> -> vector<72x128xf32>
    %c0_5 = arith.constant 0 : index
    %c0_6 = arith.constant 0 : index
    %c0_7 = arith.constant 0 : index
    %5 = vector.load %arg5[%c0_5, %c0_6, %c0_7] : memref<1x1x128xf32, #tpu.memory_space<vmem>>, vector<1x1x128xf32>
    %6 = vector.shape_cast %5 : vector<1x1x128xf32> to vector<1x128xf32>
    %7 = vector.broadcast %6 : vector<1x128xf32> to vector<72x128xf32>
    %8 = arith.addf %4, %7 : vector<72x128xf32>
    %cst_8 = arith.constant 0.000000e+00 : f32
    %9 = vector.broadcast %cst_8 : f32 to vector<72x128xf32>
    %10 = arith.maximumf %8, %9 : vector<72x128xf32>
    %c0_9 = arith.constant 0 : index
    %c0_10 = arith.constant 0 : index
    %c0_11 = arith.constant 0 : index
    %11 = vector.load %arg6[%c0_9, %c0_10, %c0_11] : memref<1x72x128xf32, #tpu.memory_space<vmem>>, vector<1x72x128xf32>
    %12 = vector.shape_cast %11 : vector<1x72x128xf32> to vector<72x128xf32>
    %13 = vector.shape_cast %10 : vector<72x128xf32> to vector<1x72x128xf32>
    tpu.vector_store %arg6[%c0_9, %c0_10, %c0_11], %13 {strides = array<i32>} : memref<1x72x128xf32, #tpu.memory_space<vmem>>, vector<1x72x128xf32>,
    return
  }
  func.func @transform_0(%arg0: i32, %arg1: i32, %arg2: i32) -> (i32, i32, i32) {
    %c0_i32 = arith.constant 0 : i32
    %c0_i32_0 = arith.constant 0 : i32
    return %arg0, %arg1, %c0_i32 : i32, i32, i32
  }
  func.func @transform_1(%arg0: i32, %arg1: i32, %arg2: i32) -> (i32, i32, i32) {
    %c0_i32 = arith.constant 0 : i32
    %c0_i32_0 = arith.constant 0 : i32
    return %arg0, %c0_i32, %arg2 : i32, i32, i32
  }
  func.func @transform_2(%arg0: i32, %arg1: i32, %arg2: i32) -> (i32, i32, i32) {
    %c0_i32 = arith.constant 0 : i32
    %c0_i32_0 = arith.constant 0 : i32
    return %arg0, %c0_i32, %arg2 : i32, i32, i32
  }
  func.func @transform_3(%arg0: i32, %arg1: i32, %arg2: i32) -> (i32, i32, i32) {
    %c0_i32 = arith.constant 0 : i32
    return %arg0, %arg1, %arg2 : i32, i32, i32
  }
}

module attributes {stable_mosaic.version = 11 : i64} {
  func.func @_maxpool_lrn_kernel(%arg0: i32, %arg1: memref<9x8x256xf32, #tpu.memory_space<vmem>>, %arg2: memref<8x256xbf16, #tpu.memory_space<vmem>>) attributes {dimension_semantics = [#tpu.dimension_semantics<parallel>], iteration_bounds = array<i64: 1>, scalar_prefetch = 0 : i64, scratch_operands = 0 : i64, tpu.core_type = #tpu.core_type<tc>, window_params = [{transform_indices = @transform_0, window_bounds = array<i64: 9, 8, 256>}, {transform_indices = @transform_1, window_bounds = array<i64: 8, 256>}]} {
    %c0 = arith.constant 0 : index
    %c0_0 = arith.constant 0 : index
    %c0_1 = arith.constant 0 : index
    %0 = vector.load %arg1[%c0, %c0_0, %c0_1] : memref<9x8x256xf32, #tpu.memory_space<vmem>>, vector<1x8x256xf32>
    %1 = vector.shape_cast %0 : vector<1x8x256xf32> to vector<8x256xf32>
    %c1 = arith.constant 1 : index
    %c0_2 = arith.constant 0 : index
    %c0_3 = arith.constant 0 : index
    %2 = vector.load %arg1[%c1, %c0_2, %c0_3] : memref<9x8x256xf32, #tpu.memory_space<vmem>>, vector<1x8x256xf32>
    %3 = vector.shape_cast %2 : vector<1x8x256xf32> to vector<8x256xf32>
    %4 = arith.maximumf %1, %3 : vector<8x256xf32>
    %c2 = arith.constant 2 : index
    %c0_4 = arith.constant 0 : index
    %c0_5 = arith.constant 0 : index
    %5 = vector.load %arg1[%c2, %c0_4, %c0_5] : memref<9x8x256xf32, #tpu.memory_space<vmem>>, vector<1x8x256xf32>
    %6 = vector.shape_cast %5 : vector<1x8x256xf32> to vector<8x256xf32>
    %7 = arith.maximumf %4, %6 : vector<8x256xf32>
    %c3 = arith.constant 3 : index
    %c0_6 = arith.constant 0 : index
    %c0_7 = arith.constant 0 : index
    %8 = vector.load %arg1[%c3, %c0_6, %c0_7] : memref<9x8x256xf32, #tpu.memory_space<vmem>>, vector<1x8x256xf32>
    %9 = vector.shape_cast %8 : vector<1x8x256xf32> to vector<8x256xf32>
    %10 = arith.maximumf %7, %9 : vector<8x256xf32>
    %c4 = arith.constant 4 : index
    %c0_8 = arith.constant 0 : index
    %c0_9 = arith.constant 0 : index
    %11 = vector.load %arg1[%c4, %c0_8, %c0_9] : memref<9x8x256xf32, #tpu.memory_space<vmem>>, vector<1x8x256xf32>
    %12 = vector.shape_cast %11 : vector<1x8x256xf32> to vector<8x256xf32>
    %13 = arith.maximumf %10, %12 : vector<8x256xf32>
    %c5 = arith.constant 5 : index
    %c0_10 = arith.constant 0 : index
    %c0_11 = arith.constant 0 : index
    %14 = vector.load %arg1[%c5, %c0_10, %c0_11] : memref<9x8x256xf32, #tpu.memory_space<vmem>>, vector<1x8x256xf32>
    %15 = vector.shape_cast %14 : vector<1x8x256xf32> to vector<8x256xf32>
    %16 = arith.maximumf %13, %15 : vector<8x256xf32>
    %c6 = arith.constant 6 : index
    %c0_12 = arith.constant 0 : index
    %c0_13 = arith.constant 0 : index
    %17 = vector.load %arg1[%c6, %c0_12, %c0_13] : memref<9x8x256xf32, #tpu.memory_space<vmem>>, vector<1x8x256xf32>
    %18 = vector.shape_cast %17 : vector<1x8x256xf32> to vector<8x256xf32>
    %19 = arith.maximumf %16, %18 : vector<8x256xf32>
    %c7 = arith.constant 7 : index
    %c0_14 = arith.constant 0 : index
    %c0_15 = arith.constant 0 : index
    %20 = vector.load %arg1[%c7, %c0_14, %c0_15] : memref<9x8x256xf32, #tpu.memory_space<vmem>>, vector<1x8x256xf32>
    %21 = vector.shape_cast %20 : vector<1x8x256xf32> to vector<8x256xf32>
    %22 = arith.maximumf %19, %21 : vector<8x256xf32>
    %c8 = arith.constant 8 : index
    %c0_16 = arith.constant 0 : index
    %c0_17 = arith.constant 0 : index
    %23 = vector.load %arg1[%c8, %c0_16, %c0_17] : memref<9x8x256xf32, #tpu.memory_space<vmem>>, vector<1x8x256xf32>
    %24 = vector.shape_cast %23 : vector<1x8x256xf32> to vector<8x256xf32>
    %25 = arith.maximumf %22, %24 : vector<8x256xf32>
    %26 = tpu.iota {dimensions = array<i32: 0>} : vector<256x256xi32>
    %27 = tpu.iota {dimensions = array<i32: 1>} : vector<256x256xi32>
    %28 = arith.subi %26, %27 : vector<256x256xi32>
    %29 = math.absi %28 : vector<256x256xi32>
    %c2_i32 = arith.constant 2 : i32
    %30 = vector.broadcast %c2_i32 : i32 to vector<256x256xi32>
    %31 = arith.cmpi sle, %29, %30 : vector<256x256xi32>
    %32 = arith.extui %31 : vector<256x256xi1> to vector<256x256xi32>
    %33 = arith.sitofp %32 : vector<256x256xi32> to vector<256x256xf32>
    %34 = arith.mulf %25, %25 : vector<8x256xf32>
    %cst = arith.constant dense<0.000000e+00> : vector<8x256xf32>
    %35 = tpu.matmul %34, %33, %cst {dimension_numbers = #tpu.dot_dimension_numbers<[1], [0], [0], [1], [0, 0, 1, 1], [], []>} : vector<8x256xf32>, vector<256x256xf32>, vector<8x256xf32> -> vector<8x256xf32>
    %cst_18 = arith.constant 2.000000e-05 : f32
    %36 = vector.broadcast %cst_18 : f32 to vector<8x256xf32>
    %37 = arith.mulf %36, %35 : vector<8x256xf32>
    %cst_19 = arith.constant 1.000000e+00 : f32
    %38 = vector.broadcast %cst_19 : f32 to vector<8x256xf32>
    %39 = arith.addf %38, %37 : vector<8x256xf32>
    %40 = math.rsqrt %39 : vector<8x256xf32>
    %41 = arith.mulf %39, %40 : vector<8x256xf32>
    %42 = math.rsqrt %41 : vector<8x256xf32>
    %43 = arith.mulf %40, %42 : vector<8x256xf32>
    %44 = arith.mulf %25, %43 : vector<8x256xf32>
    %45 = arith.truncf %44 : vector<8x256xf32> to vector<8x256xbf16>
    %c0_20 = arith.constant 0 : index
    %c0_21 = arith.constant 0 : index
    %46 = vector.load %arg2[%c0_20, %c0_21] : memref<8x256xbf16, #tpu.memory_space<vmem>>, vector<8x256xbf16>
    tpu.vector_store %arg2[%c0_20, %c0_21], %45 {strides = array<i32>} : memref<8x256xbf16, #tpu.memory_space<vmem>>, vector<8x256xbf16>,
    return
  }
  func.func @transform_0(%arg0: i32) -> (i32, i32, i32) {
    %c0_i32 = arith.constant 0 : i32
    %c0_i32_0 = arith.constant 0 : i32
    %c0_i32_1 = arith.constant 0 : i32
    return %c0_i32, %arg0, %c0_i32_0 : i32, i32, i32
  }
  func.func @transform_1(%arg0: i32) -> (i32, i32) {
    %c0_i32 = arith.constant 0 : i32
    %c0_i32_0 = arith.constant 0 : i32
    return %arg0, %c0_i32 : i32, i32
  }
}

module attributes {stable_mosaic.version = 11 : i64} {
  func.func @_fused_conv_conv_kernel(%arg0: i32, %arg1: memref<8x2304xbf16, #tpu.memory_space<vmem>>, %arg2: memref<2304x384xbf16, #tpu.memory_space<vmem>>, %arg3: memref<1x384xf32, #tpu.memory_space<vmem>>, %arg4: memref<384x128xbf16, #tpu.memory_space<vmem>>, %arg5: memref<1x128xf32, #tpu.memory_space<vmem>>, %arg6: memref<8x128xf32, #tpu.memory_space<vmem>>) attributes {dimension_semantics = [#tpu.dimension_semantics<parallel>], iteration_bounds = array<i64: 1>, scalar_prefetch = 0 : i64, scratch_operands = 0 : i64, tpu.core_type = #tpu.core_type<tc>, window_params = [{transform_indices = @transform_0, window_bounds = array<i64: 8, 2304>}, {pipeline_mode = #tpu.pipeline_mode<synchronous>, transform_indices = @transform_1, window_bounds = array<i64: 2304, 384>}, {pipeline_mode = #tpu.pipeline_mode<synchronous>, transform_indices = @transform_2, window_bounds = array<i64: 1, 384>}, {pipeline_mode = #tpu.pipeline_mode<synchronous>, transform_indices = @transform_3, window_bounds = array<i64: 384, 128>}, {pipeline_mode = #tpu.pipeline_mode<synchronous>, transform_indices = @transform_4, window_bounds = array<i64: 1, 128>}, {transform_indices = @transform_5, window_bounds = array<i64: 8, 128>}]} {
    %c0 = arith.constant 0 : index
    %c0_0 = arith.constant 0 : index
    %0 = vector.load %arg1[%c0, %c0_0] : memref<8x2304xbf16, #tpu.memory_space<vmem>>, vector<8x2304xbf16>
    %c0_1 = arith.constant 0 : index
    %c0_2 = arith.constant 0 : index
    %1 = vector.load %arg2[%c0_1, %c0_2] : memref<2304x384xbf16, #tpu.memory_space<vmem>>, vector<2304x384xbf16>
    %cst = arith.constant dense<0.000000e+00> : vector<8x384xf32>
    %2 = tpu.matmul %0, %1, %cst {dimension_numbers = #tpu.dot_dimension_numbers<[1], [0], [0], [1], [0, 0, 1, 1], [], []>} : vector<8x2304xbf16>, vector<2304x384xbf16>, vector<8x384xf32> -> vector<8x384xf32>
    %c0_3 = arith.constant 0 : index
    %c0_4 = arith.constant 0 : index
    %3 = vector.load %arg3[%c0_3, %c0_4] : memref<1x384xf32, #tpu.memory_space<vmem>>, vector<1x384xf32>
    %4 = vector.broadcast %3 : vector<1x384xf32> to vector<8x384xf32>
    %5 = arith.addf %2, %4 : vector<8x384xf32>
    %cst_5 = arith.constant 0.000000e+00 : f32
    %6 = vector.broadcast %cst_5 : f32 to vector<8x384xf32>
    %7 = arith.maximumf %5, %6 : vector<8x384xf32>
    %8 = arith.truncf %7 : vector<8x384xf32> to vector<8x384xbf16>
    %c0_6 = arith.constant 0 : index
    %c0_7 = arith.constant 0 : index
    %9 = vector.load %arg4[%c0_6, %c0_7] : memref<384x128xbf16, #tpu.memory_space<vmem>>, vector<384x128xbf16>
    %cst_8 = arith.constant dense<0.000000e+00> : vector<8x128xf32>
    %10 = tpu.matmul %8, %9, %cst_8 {dimension_numbers = #tpu.dot_dimension_numbers<[1], [0], [0], [1], [0, 0, 1, 1], [], []>} : vector<8x384xbf16>, vector<384x128xbf16>, vector<8x128xf32> -> vector<8x128xf32>
    %c0_9 = arith.constant 0 : index
    %c0_10 = arith.constant 0 : index
    %11 = vector.load %arg5[%c0_9, %c0_10] : memref<1x128xf32, #tpu.memory_space<vmem>>, vector<1x128xf32>
    %12 = vector.broadcast %11 : vector<1x128xf32> to vector<8x128xf32>
    %13 = arith.addf %10, %12 : vector<8x128xf32>
    %cst_11 = arith.constant 0.000000e+00 : f32
    %14 = vector.broadcast %cst_11 : f32 to vector<8x128xf32>
    %15 = arith.maximumf %13, %14 : vector<8x128xf32>
    %c0_12 = arith.constant 0 : index
    %c0_13 = arith.constant 0 : index
    %16 = vector.load %arg6[%c0_12, %c0_13] : memref<8x128xf32, #tpu.memory_space<vmem>>, vector<8x128xf32>
    tpu.vector_store %arg6[%c0_12, %c0_13], %15 {strides = array<i32>} : memref<8x128xf32, #tpu.memory_space<vmem>>, vector<8x128xf32>,
    return
  }
  func.func @transform_0(%arg0: i32) -> (i32, i32) {
    %c0_i32 = arith.constant 0 : i32
    %c0_i32_0 = arith.constant 0 : i32
    return %arg0, %c0_i32 : i32, i32
  }
  func.func @transform_1(%arg0: i32) -> (i32, i32) {
    %c0_i32 = arith.constant 0 : i32
    %c0_i32_0 = arith.constant 0 : i32
    %c0_i32_1 = arith.constant 0 : i32
    return %c0_i32, %c0_i32_0 : i32, i32
  }
  func.func @transform_2(%arg0: i32) -> (i32, i32) {
    %c0_i32 = arith.constant 0 : i32
    %c0_i32_0 = arith.constant 0 : i32
    %c0_i32_1 = arith.constant 0 : i32
    return %c0_i32, %c0_i32_0 : i32, i32
  }
  func.func @transform_3(%arg0: i32) -> (i32, i32) {
    %c0_i32 = arith.constant 0 : i32
    %c0_i32_0 = arith.constant 0 : i32
    %c0_i32_1 = arith.constant 0 : i32
    return %c0_i32, %c0_i32_0 : i32, i32
  }
  func.func @transform_4(%arg0: i32) -> (i32, i32) {
    %c0_i32 = arith.constant 0 : i32
    %c0_i32_0 = arith.constant 0 : i32
    %c0_i32_1 = arith.constant 0 : i32
    return %c0_i32, %c0_i32_0 : i32, i32
  }
  func.func @transform_5(%arg0: i32) -> (i32, i32) {
    %c0_i32 = arith.constant 0 : i32
    %c0_i32_0 = arith.constant 0 : i32
    return %arg0, %c0_i32 : i32, i32
  }
}

</mosaic_0001>

<bundles_post_ra>
// kernel: itracker_image_model.5
= control target key start
LH: loop header
LB: loop body
LE: loop exit
PB: predicated region body
PF: predicated region fallthrough
CT: control target
= control target key end

     0   :  { %s1308_s12 = smov 0   ;;  %s1310_s13 = smov 0   ;;  %s1488_s0 = inlined_call_operand.vmem [shape: bf16[1,512,384], index: 0, kind: input, shape index: {}]   ;;  %s1489_s1 = inlined_call_operand.vmem [shape: bf16[1,384,128], index: 1, kind: input, shape index: {}]   ;;  %s1490_s2 = inlined_call_operand.vmem [shape: f32[1,1,128], index: 2, kind: input, shape index: {}]   ;;  %s1491_s3 = inlined_call_operand.vmem [shape: f32[1,512,128], index: 3, kind: output, shape index: {}]  }
   0x1   :  { %s1312_s14 = smov 0  }
   0x2 LB: > { %s28_s15 = sadd.s32 1, %s1282_s13  ;;  %p1015_p0 = scmp.ge.s32.totalorder %s1286_s14, 1  ;;  %s1286_s14 = sphi %s1312_s14, %s13_s14   ;;  %s1282_s13 = sphi %s1310_s13, %s1493_s13   ;;  %s1278_s12 = sphi %s1308_s12, %s1492_s12  }
   0x3   : > { %p30_p1 = scmp.ge.s32.totalorder %s28_s15, 4  ;;  %p196_p2 = scmp.lt.s32.totalorder %s1286_s14, 5 }
   0x5   : > { %s1495_s15 = smov (%p30_p1, %s28_s15), 0  ;;  %p197_p3 = pnand %p1015_p0, %p196_p2 }
   0x6   : > { %v1208_v0 = vld [vmem:[%s1489_s1 + $0x40] sm:$0xff] (!%p197_p3)   ;;  %v1210_v2 = vld [vmem:[%s1489_s1 + $0x48] sm:$0xff] (!%p197_p3)   ;;  %v1213_v5 = vld [vmem:[%s1489_s1 + $0x50] sm:$0xff] (!%p197_p3)   ;;  %s1016_s30 = sshll.u32 (!%p197_p3), %s1278_s12, 4 }
   0x7   : > { %200 = sbr.rel (%p197_p3) target bundleno = 319 (0x13f), region = 32  ;;  %v1209_v1 = vld [vmem:[%s1489_s1] sm:$0xff] (!%p197_p3)   ;;  %1071 = vmatprep.subr.bf16.mxu0 (!%p197_p3), %v1208_v0  ;;  %v1212_v4 = vld [vmem:[%s1489_s1 + $0x8] sm:$0xff] (!%p197_p3)   ;;  %v1215_v7 = vld [vmem:[%s1489_s1 + $0x10] sm:$0xff] (!%p197_p3)   ;;  %p249_p4 = scmp.lt.s32.totalorder (!%p197_p3), %s1016_s30, 63 }
   0x8   : > { %1072 = vmatpush3.bf16.msra.mxu0 (!%p197_p3), %v1209_v1  ;;  %v1211_v3 = vld [vmem:[%s1489_s1 + $0x80] sm:$0xff] (!%p197_p3)   ;;  %v1214_v6 = vld [vmem:[%s1489_s1 + $0x88] sm:$0xff] (!%p197_p3)   ;;  %v1216_v8 = vld [vmem:[%s1489_s1 + $0x58] sm:$0xff] (!%p197_p3)  }
   0x9   : > { %1073 = vmatprep.subr.bf16.mxu0 (!%p197_p3), %v1210_v2  ;;  %1151 = vmatprep.subr.bf16.mxu1 (!%p197_p3), %v1211_v3  ;;  %v1217_v9 = vld [vmem:[%s1489_s1 + $0x90] sm:$0xff] (!%p197_p3)   ;;  %v1218_v10 = vld [vmem:[%s1489_s1 + $0x18] sm:$0xff] (!%p197_p3)   ;;  %v1219_v11 = vld [vmem:[%s1489_s1 + $0x60] sm:$0xff] (!%p197_p3)  }
   0xa   : > { %1152 = vmatpush3.bf16.msra.mxu1 (!%p197_p3), %v1211_v3  ;;  %v1220_v12 = vld [vmem:[%s1489_s1 + $0x98] sm:$0xff] (!%p197_p3)   ;;  %v1221_v13 = vld [vmem:[%s1489_s1 + $0x20] sm:$0xff] (!%p197_p3)   ;;  %v1222_v15 = vld [vmem:[%s1489_s1 + $0x68] sm:$0xff] (!%p197_p3)  }
   0xb   : > { %1153 = vmatprep.subr.bf16.mxu1 (!%p197_p3), %v1214_v6  ;;  %v1223_v14 = vld [vmem:[%s1489_s1 + $0xa0] sm:$0xff] (!%p197_p3)   ;;  %v1224_v16 = vld [vmem:[%s1489_s1 + $0x28] sm:$0xff] (!%p197_p3)   ;;  %v1225_v18 = vld [vmem:[%s1489_s1 + $0x70] sm:$0xff] (!%p197_p3)  }
   0xc   : > { %1074 = vmatpush3.bf16.msra.mxu0 (!%p197_p3), %v1212_v4  ;;  %v1226_v17 = vld [vmem:[%s1489_s1 + $0xa8] sm:$0xff] (!%p197_p3)   ;;  %v1227_v19 = vld [vmem:[%s1489_s1 + $0x30] sm:$0xff] (!%p197_p3)   ;;  %v1228_v20 = vld [vmem:[%s1489_s1 + $0x78] sm:$0xff] (!%p197_p3)  }
   0xd   : > { %1075 = vmatprep.subr.bf16.mxu0 (!%p197_p3), %v1213_v5  ;;  %v1229_v21 = vld [vmem:[%s1489_s1 + $0xb0] sm:$0xff] (!%p197_p3)   ;;  %v1230_v23 = vld [vmem:[%s1489_s1 + $0x38] sm:$0xff] (!%p197_p3)   ;;  %v1436_v50 = vld [vmem:[%s1490_s2] ss:$0 sm:$0xff] (!%p197_p3) }
   0xe   : > { %1154 = vmatpush3.bf16.msra.mxu1 %v1214_v6  ;;  %s1497_s30 = smov (!%p249_p4, %s1016_s30), 63  ;;  %v1234_v25 = vld [vmem:[%s1489_s1 + $0xb8] sm:$0xff]  }
   0xf   : > { %1155 = vmatprep.subr.bf16.mxu1 %v1217_v9  ;;  %s1183_s25 = smul.u32 12, %s1497_s30  ;;  %s1019_s24 = sshll.u32 %s1497_s30, 3 }
  0x10   : > { %1076 = vmatpush3.bf16.msra.mxu0 %v1215_v7  ;;  %s1444_s27 = scalar_lea.vmem %s1491_s3, %s1019_s24 }
  0x11   : > { %1077 = vmatprep.subr.bf16.mxu0 %v1216_v8  ;;  %s1395_s10 = scalar_lea.vmem %s1488_s0, %s1183_s25 }
  0x12   : > { %1156 = vmatpush3.bf16.msra.mxu1 %v1217_v9  ;;  %v1233_v22 = vld [vmem:[%s1395_s10 + $0x4] ss:$12 sps:$4 sm:$0xff]   ;;  %v1235_v24 = vld [vmem:[%s1395_s10 + $0x8] ss:$12 sps:$4 sm:$0xff]   ;;  %v1231_v26 = vld [vmem:[%s1395_s10] ss:$12 sps:$4 sm:$0xff]  }
  0x13   : > { %1157 = vmatprep.subr.bf16.mxu1 %v1220_v12  ;;  %676 = vmatprep.mubr.bf16.mxu0 %v1233_v22  ;;  %v1237_v27 = vld [vmem:[%s1395_s10 + $0x1c] ss:$12 sps:$4 sm:$0xff]   ;;  %v1236_v28 = vld [vmem:[%s1395_s10 + $0x20] ss:$12 sps:$4 sm:$0xff]   ;;  %v1243_v29 = vld [vmem:[%s1395_s10 + $0x38] ss:$12 sps:$4 sm:$0xff]  }
  0x14   : > { %1078 = vmatpush3.bf16.msra.mxu0 %v1218_v10  ;;  %1167 = vmatprep.mubr.bf16.mxu1 %v1235_v24  ;;  %v1239_v30 = vld [vmem:[%s1395_s10 + $0x18] ss:$12 sps:$4 sm:$0xff]   ;;  %v1240_v31 = vld [vmem:[%s1395_s10 + $0x34] ss:$12 sps:$4 sm:$0xff]   ;;  %v1244_v32 = vld [vmem:[%s1395_s10 + $0x50] ss:$12 sps:$4 sm:$0xff]  }
  0x15   : > { %1079 = vmatprep.subr.bf16.mxu0 %v1219_v11  ;;  %v1251_v33 = vld [vmem:[%s1395_s10 + $0x68] ss:$12 sps:$4 sm:$0xff]   ;;  %v1242_v34 = vld [vmem:[%s1395_s10 + $0x30] ss:$12 sps:$4 sm:$0xff]   ;;  %v1245_v35 = vld [vmem:[%s1395_s10 + $0x4c] ss:$12 sps:$4 sm:$0xff]  }
  0x16   : > { %1158 = vmatpush3.bf16.msra.mxu1 %v1220_v12  ;;  %v1252_v36 = vld [vmem:[%s1395_s10 + $0x80] ss:$12 sps:$4 sm:$0xff]   ;;  %v1259_v37 = vld [vmem:[%s1395_s10 + $0x98] ss:$12 sps:$4 sm:$0xff]   ;;  %v1247_v38 = vld [vmem:[%s1395_s10 + $0x48] ss:$12 sps:$4 sm:$0xff]  }
  0x17   : > { %1159 = vmatprep.subr.bf16.mxu1 %v1223_v14  ;;  %v1248_v39 = vld [vmem:[%s1395_s10 + $0x64] ss:$12 sps:$4 sm:$0xff]   ;;  %v1250_v41 = vld [vmem:[%s1395_s10 + $0x60] ss:$12 sps:$4 sm:$0xff]   ;;  %v1253_v42 = vld [vmem:[%s1395_s10 + $0x7c] ss:$12 sps:$4 sm:$0xff]  }
  0x18   : > { %1080 = vmatpush3.bf16.msra.mxu0 %v1221_v13  ;;  %v1260_v40 = vld [vmem:[%s1395_s10 + $0xb0] ss:$12 sps:$4 sm:$0xff]   ;;  %v1255_v43 = vld [vmem:[%s1395_s10 + $0x78] ss:$12 sps:$4 sm:$0xff]   ;;  %v1256_v44 = vld [vmem:[%s1395_s10 + $0x94] ss:$12 sps:$4 sm:$0xff]  }
  0x19   : > { %1081 = vmatprep.subr.bf16.mxu0 %v1222_v15  ;;  %v1258_v45 = vld [vmem:[%s1395_s10 + $0x90] ss:$12 sps:$4 sm:$0xff]   ;;  %v1261_v46 = vld [vmem:[%s1395_s10 + $0xac] ss:$12 sps:$4 sm:$0xff]   ;;  %v1263_v47 = vld [vmem:[%s1395_s10 + $0xa8] ss:$12 sps:$4 sm:$0xff]  }
  0x1a   : > { %1160 = vmatpush3.bf16.msra.mxu1 %v1223_v14 }
  0x1b   : > { %1161 = vmatprep.subr.bf16.mxu1 %v1226_v17 }
  0x1c   : > { %1082 = vmatpush3.bf16.msra.mxu0 %v1224_v16 }
  0x1d   : > { %1083 = vmatprep.subr.bf16.mxu0 %v1225_v18 }
  0x1e   : > { %1162 = vmatpush3.bf16.msra.mxu1 %v1226_v17 }
  0x1f   : > { %1163 = vmatprep.subr.bf16.mxu1 %v1229_v21 }
  0x20   : > { %1084 = vmatpush3.bf16.msra.mxu0 %v1227_v19 }
  0x21   : > { %1085 = vmatprep.subr.bf16.mxu0 %v1228_v20 }
  0x22   : > { %1164 = vmatpush3.bf16.msra.mxu1 %v1229_v21 }
  0x23   : > { %1165 = vmatprep.subr.bf16.mxu1 %v1234_v25 }
  0x24   : > { %1086 = vmatpush3.bf16.msra.mxu0 %v1230_v23 }
  0x26   : > { %1166 = vmatpush3.bf16.msra.mxu1 %v1234_v25 }
  0x27   : > { %677 = vmatmul.mubr.bf16.vlgmr.msra.gmra.mrb[0].mxu0 %v1231_v26 }
  0x28   : > { %684 = vmatprep.mubr.bf16.mxu0 %v1237_v27 }
  0x29   : > { %1168 = vmatmul.mubr.bf16.vlgmr.msra.gmra.mrb[0].mxu1 %v1236_v28 }
  0x2a   : > { %1171 = vmatprep.mubr.bf16.mxu1 %v1243_v29 }
  0x2f   : > { %685 = vmatmul.mubr.bf16.gmra.mrb[4].mxu0 %v1239_v30 }
  0x30   : > { %692 = vmatprep.mubr.bf16.mxu0 %v1240_v31 }
  0x31   : > { %1172 = vmatmul.mubr.bf16.gmra.mrb[4].mxu1 %v1244_v32 }
  0x32   : > { %1175 = vmatprep.mubr.bf16.mxu1 %v1251_v33 }
  0x37   : > { %693 = vmatmul.mubr.bf16.gmra.mrb[8].mxu0 %v1242_v34 }
  0x38   : > { %700 = vmatprep.mubr.bf16.mxu0 %v1245_v35 }
  0x39   : > { %1176 = vmatmul.mubr.bf16.gmra.mrb[8].mxu1 %v1252_v36 }
  0x3a   : > { %1179 = vmatprep.mubr.bf16.mxu1 %v1259_v37 }
  0x3f   : > { %701 = vmatmul.mubr.bf16.gmra.mrb[12].mxu0 %v1247_v38 }
  0x40   : > { %708 = vmatprep.mubr.bf16.mxu0 %v1248_v39 }
  0x41   : > { %1180 = vmatmul.mubr.bf16.gmra.mrb[12].mxu1 %v1260_v40 }
  0x47   : > { %709 = vmatmul.mubr.bf16.gmra.mrb[16].mxu0 %v1250_v41 }
  0x48   : > { %716 = vmatprep.mubr.bf16.mxu0 %v1253_v42 }
  0x4f   : > { %717 = vmatmul.mubr.bf16.gmra.mrb[20].mxu0 %v1255_v43 }
  0x50   : > { %724 = vmatprep.mubr.bf16.mxu0 %v1256_v44 }
  0x57   : > { %725 = vmatmul.mubr.bf16.gmra.mrb[24].mxu0 %v1258_v45 }
  0x58   : > { %732 = vmatprep.mubr.bf16.mxu0 %v1261_v46 }
  0x5f   : > { %733 = vmatmul.mubr.bf16.gmra.mrb[28].mxu0 %v1263_v47 }
  0xfa   : > { %v1087_v48 = vpop.f32.mrb[0].mxu0 }
  0xfb   : > { %v1088_v49 = vpop.f32.mrb[1].mxu0 }
  0xfc   : > { %v1089_v51 = vadd.f32 %v1088_v49, %v1087_v48  ;;  %v1090_v52 = vpop.f32.mrb[2].mxu0  ;;  %v1169_v54 = vpop.f32.mrb[0].mxu1 }
  0xfd   : > { %v1091_v53 = vpop.f32.mrb[3].mxu0  ;;  %v775_v57 = vpop.f32.mrb[1].mxu1 }
  0xfe   : > { %v1092_v55 = vadd.f32 %v1091_v53, %v1090_v52  ;;  %v679_v56 = vadd.f32 %v1089_v51, %v1436_v50  ;;  %v1170_v58 = vpop.f32.mrb[2].mxu1 }
  0xff   : > { %v778_v61 = vpop.f32.mrb[3].mxu1 }
 0x100   : > { %v776_v59 = vadd.f32 %v775_v57, %v679_v56  ;;  %v682_v60 = vadd.f32 %v1092_v55, %v1436_v50 }
 0x102   : > { %v838_v62 = vmax.f32 %v776_v59, 0.0  ;;  %v779_v63 = vadd.f32 %v778_v61, %v682_v60  ;;  %v1093_v0 = vpop.f32.mrb[4].mxu0 }
 0x103   : > { %v1094_v1 = vpop.f32.mrb[5].mxu0 }
 0x104   : > { %854 = vst [vmem:[%s1444_s27] sm:$0xff] %v838_v62  ;;  %v839_v2 = vmax.f32 %v779_v63, 0.0  ;;  %v1095_v3 = vadd.f32 %v1094_v1, %v1093_v0  ;;  %v1096_v4 = vpop.f32.mrb[6].mxu0  ;;  %v1173_v6 = vpop.f32.mrb[4].mxu1 }
 0x105   : > { %v1097_v5 = vpop.f32.mrb[7].mxu0  ;;  %v791_v9 = vpop.f32.mrb[5].mxu1 }
 0x106   : > { %855 = vst [vmem:[%s1444_s27 + $0x8] sm:$0xff] %v839_v2  ;;  %v687_v7 = vadd.f32 %v1095_v3, %v1436_v50  ;;  %v1098_v8 = vadd.f32 %v1097_v5, %v1096_v4  ;;  %v1174_v10 = vpop.f32.mrb[6].mxu1 }
 0x107   : > { %v794_v13 = vpop.f32.mrb[7].mxu1 }
 0x108   : > { %v784_v11 = vadd.f32 %v1169_v54, %v687_v7  ;;  %v690_v12 = vadd.f32 %v1098_v8, %v1436_v50 }
 0x10a   : > { %v840_v14 = vmax.f32 %v784_v11, 0.0  ;;  %v787_v15 = vadd.f32 %v1170_v58, %v690_v12  ;;  %v1099_v16 = vpop.f32.mrb[8].mxu0 }
 0x10b   : > { %v1100_v17 = vpop.f32.mrb[9].mxu0 }
 0x10c   : > { %856 = vst [vmem:[%s1444_s27 + $0x10] sm:$0xff] %v840_v14  ;;  %v841_v18 = vmax.f32 %v787_v15, 0.0  ;;  %v1101_v19 = vadd.f32 %v1100_v17, %v1099_v16  ;;  %v1102_v20 = vpop.f32.mrb[10].mxu0  ;;  %v1177_v22 = vpop.f32.mrb[8].mxu1 }
 0x10d   : > { %v1103_v21 = vpop.f32.mrb[11].mxu0  ;;  %v807_v25 = vpop.f32.mrb[9].mxu1 }
 0x10e   : > { %857 = vst [vmem:[%s1444_s27 + $0x18] sm:$0xff] %v841_v18  ;;  %v1104_v23 = vadd.f32 %v1103_v21, %v1102_v20  ;;  %v695_v24 = vadd.f32 %v1101_v19, %v1436_v50  ;;  %v1178_v26 = vpop.f32.mrb[10].mxu1 }
 0x10f   : > { %v810_v29 = vpop.f32.mrb[11].mxu1 }
 0x110   : > { %v792_v27 = vadd.f32 %v791_v9, %v695_v24  ;;  %v698_v28 = vadd.f32 %v1104_v23, %v1436_v50 }
 0x112   : > { %v842_v30 = vmax.f32 %v792_v27, 0.0  ;;  %v795_v31 = vadd.f32 %v794_v13, %v698_v28  ;;  %v1105_v32 = vpop.f32.mrb[12].mxu0 }
 0x113   : > { %v1106_v33 = vpop.f32.mrb[13].mxu0 }
 0x114   : > { %858 = vst [vmem:[%s1444_s27 + $0x20] sm:$0xff] %v842_v30  ;;  %v843_v34 = vmax.f32 %v795_v31, 0.0  ;;  %v1107_v35 = vadd.f32 %v1106_v33, %v1105_v32  ;;  %v1108_v36 = vpop.f32.mrb[14].mxu0  ;;  %v1455_v38 = vpop.f32.mrb[12].mxu1 }
 0x115   : > { %v1109_v37 = vpop.f32.mrb[15].mxu0  ;;  %v823_v41 = vpop.f32.mrb[13].mxu1 }
 0x116   : > { %859 = vst [vmem:[%s1444_s27 + $0x28] sm:$0xff] %v843_v34  ;;  %v703_v39 = vadd.f32 %v1107_v35, %v1436_v50  ;;  %v1110_v40 = vadd.f32 %v1109_v37, %v1108_v36  ;;  %v1182_v42 = vpop.f32.mrb[14].mxu1 }
 0x117   : > { %v826_v45 = vpop.f32.mrb[15].mxu1 }
 0x118   : > { %v800_v43 = vadd.f32 %v1173_v6, %v703_v39  ;;  %v706_v44 = vadd.f32 %v1110_v40, %v1436_v50 }
 0x11a   : > { %v844_v46 = vmax.f32 %v800_v43, 0.0  ;;  %v803_v47 = vadd.f32 %v1174_v10, %v706_v44  ;;  %v1111_v48 = vpop.f32.mrb[16].mxu0 }
 0x11b   : > { %v1112_v49 = vpop.f32.mrb[17].mxu0 }
 0x11c   : > { %860 = vst [vmem:[%s1444_s27 + $0x30] sm:$0xff] %v844_v46  ;;  %v845_v51 = vmax.f32 %v803_v47, 0.0  ;;  %v1113_v52 = vadd.f32 %v1112_v49, %v1111_v48  ;;  %v1114_v53 = vpop.f32.mrb[18].mxu0 }
 0x11d   : > { %v1115_v54 = vpop.f32.mrb[19].mxu0 }
 0x11e   : > { %861 = vst [vmem:[%s1444_s27 + $0x38] sm:$0xff] %v845_v51  ;;  %v1116_v55 = vadd.f32 %v1115_v54, %v1114_v53  ;;  %v711_v56 = vadd.f32 %v1113_v52, %v1436_v50 }
 0x120   : > { %v808_v57 = vadd.f32 %v807_v25, %v711_v56  ;;  %v714_v58 = vadd.f32 %v1116_v55, %v1436_v50 }
 0x122   : > { %v846_v59 = vmax.f32 %v808_v57, 0.0  ;;  %v811_v60 = vadd.f32 %v810_v29, %v714_v58  ;;  %v1117_v61 = vpop.f32.mrb[20].mxu0 }
 0x123   : > { %v1118_v62 = vpop.f32.mrb[21].mxu0 }
 0x124   : > { %862 = vst [vmem:[%s1444_s27 + $0x40] sm:$0xff] %v846_v59  ;;  %v847_v63 = vmax.f32 %v811_v60, 0.0  ;;  %v1119_v0 = vadd.f32 %v1118_v62, %v1117_v61  ;;  %v1120_v1 = vpop.f32.mrb[22].mxu0 }
 0x125   : > { %v1121_v2 = vpop.f32.mrb[23].mxu0 }
 0x126   : > { %863 = vst [vmem:[%s1444_s27 + $0x48] sm:$0xff] %v847_v63  ;;  %v719_v3 = vadd.f32 %v1119_v0, %v1436_v50  ;;  %v1122_v4 = vadd.f32 %v1121_v2, %v1120_v1 }
 0x128   : > { %v816_v5 = vadd.f32 %v1177_v22, %v719_v3  ;;  %v722_v6 = vadd.f32 %v1122_v4, %v1436_v50 }
 0x12a   : > { %v848_v7 = vmax.f32 %v816_v5, 0.0  ;;  %v819_v8 = vadd.f32 %v1178_v26, %v722_v6  ;;  %v1123_v9 = vpop.f32.mrb[24].mxu0 }
 0x12b   : > { %v1124_v10 = vpop.f32.mrb[25].mxu0 }
 0x12c   : > { %864 = vst [vmem:[%s1444_s27 + $0x50] sm:$0xff] %v848_v7  ;;  %v849_v11 = vmax.f32 %v819_v8, 0.0  ;;  %v1125_v12 = vadd.f32 %v1124_v10, %v1123_v9  ;;  %v1126_v13 = vpop.f32.mrb[26].mxu0 }
 0x12d   : > { %v1127_v14 = vpop.f32.mrb[27].mxu0 }
 0x12e   : > { %865 = vst [vmem:[%s1444_s27 + $0x58] sm:$0xff] %v849_v11  ;;  %v1128_v15 = vadd.f32 %v1127_v14, %v1126_v13  ;;  %v727_v16 = vadd.f32 %v1125_v12, %v1436_v50 }
 0x130   : > { %v824_v17 = vadd.f32 %v823_v41, %v727_v16  ;;  %v730_v18 = vadd.f32 %v1128_v15, %v1436_v50 }
 0x132   : > { %v850_v19 = vmax.f32 %v824_v17, 0.0  ;;  %v827_v20 = vadd.f32 %v826_v45, %v730_v18  ;;  %v1129_v21 = vpop.f32.mrb[28].mxu0 }
 0x133   : > { %v1130_v22 = vpop.f32.mrb[29].mxu0 }
 0x134   : > { %866 = vst [vmem:[%s1444_s27 + $0x60] sm:$0xff] %v850_v19  ;;  %v851_v23 = vmax.f32 %v827_v20, 0.0  ;;  %v1131_v24 = vadd.f32 %v1130_v22, %v1129_v21  ;;  %v1132_v25 = vpop.f32.mrb[30].mxu0 }
 0x135   : > { %v1133_v26 = vpop.f32.mrb[31].mxu0 }
 0x136   : > { %867 = vst [vmem:[%s1444_s27 + $0x68] sm:$0xff] %v851_v23  ;;  %v735_v27 = vadd.f32 %v1131_v24, %v1436_v50  ;;  %v1134_v28 = vadd.f32 %v1133_v26, %v1132_v25 }
 0x138   : > { %v832_v29 = vadd.f32 %v1455_v38, %v735_v27  ;;  %v738_v30 = vadd.f32 %v1134_v28, %v1436_v50 }
 0x13a   : > { %v852_v31 = vmax.f32 %v832_v29, 0.0  ;;  %v835_v32 = vadd.f32 %v1182_v42, %v738_v30 }
 0x13c   : > { %868 = vst [vmem:[%s1444_s27 + $0x70] sm:$0xff] %v852_v31  ;;  %v853_v33 = vmax.f32 %v835_v32, 0.0 }
 0x13e   : > { %869 = vst [vmem:[%s1444_s27 + $0x78] sm:$0xff] %v853_v33 }
 0x13f PF: > { %s13_s14 = sadd.s32 1, %s1286_s14   ;;  %s1492_s12 = smov %s1282_s13 }
 0x140   : > { %p10_p5 = scmp.ge.s32.totalorder %s13_s14, 6   ;;  %s1493_s13 = smov %s1495_s15 }
 0x142   :  { %12 = sbr.rel (!%p10_p5) target bundleno = 2 (0x2), region = 68 }

// kernel: itracker_image_model.6
= control target key start
LH: loop header
LB: loop body
LE: loop exit
PB: predicated region body
PF: predicated region fallthrough
CT: control target
= control target key end

     0   :  { %v169_v0 = vlaneseq  ;;  %v857_v1 = vmov 0.0|0.0   ;;  %vm858_vm0 = vmmov 0   ;;  %v859_v4 = vmov 0.0   ;;  %s1355_s0 = inlined_call_operand.vmem [shape: f32[9,72,128], index: 0, kind: input, shape index: {}]   ;;  %s1356_s1 = inlined_call_operand.vmem [shape: bf16[72,128], index: 1, kind: output, shape index: {}]  }
   0x1   :  { %777 = vmatprep.subr.bf16.mxu0 %v857_v1  ;;  %801 = vmatprep.subr.bf16.mxu1 %v857_v1  ;;  %v890_v25 = vld [vmem:[%s1355_s0] sm:$0xff]  ;;  %v895_v26 = vld [vmem:[%s1355_s0 + $0x48] sm:$0xff]  ;;  %v860_v40 = vmov 1.0|1.0   ;;  %v541_v61 = vld [vmem:[%s1355_s0 + $0x90] sm:$0xff] }
   0x2   :  { %v170_v2 = vshrl.u32 %v169_v0, 7  ;;  %v873_v3 = vand.u32 127, %v169_v0  ;;  %750 = vmatprep.mubr.msk.f32.mxu0 %vm858_vm0, %v859_v4  ;;  %765 = vmatprep.mubr.msk.f32.mxu1 %vm858_vm0, %v859_v4  ;;  %v27_v36 = vmax.f32 %v890_v25, %v895_v26 }
   0x4   :  { %v171_v5 = vadd.s32 8, %v170_v2  ;;  %v188_v6 = vsub.s32 %v170_v2, %v873_v3  ;;  %v172_v7 = vadd.s32 16, %v170_v2  ;;  %v173_v8 = vadd.s32 24, %v170_v2 }
   0x5   :  { %v174_v9 = vadd.s32 32, %v170_v2  ;;  %v175_v10 = vadd.s32 40, %v170_v2  ;;  %v176_v11 = vadd.s32 48, %v170_v2  ;;  %v177_v12 = vadd.s32 56, %v170_v2 }
   0x6   :  { %v189_v13 = vsub.s32 %v171_v5, %v873_v3  ;;  %v205_v14 = vsub.s32 0, %v188_v6  ;;  %v190_v15 = vsub.s32 %v172_v7, %v873_v3  ;;  %v191_v16 = vsub.s32 %v173_v8, %v873_v3  ;;  %v13_v5 = vld [vmem:[%s1355_s0 + $0x28] sm:$0xff] }
   0x7   :  { %v192_v17 = vsub.s32 %v174_v9, %v873_v3  ;;  %v193_v18 = vsub.s32 %v175_v10, %v873_v3  ;;  %v194_v19 = vsub.s32 %v176_v11, %v873_v3  ;;  %v195_v20 = vsub.s32 %v177_v12, %v873_v3  ;;  %v9_v7 = vld [vmem:[%s1355_s0 + $0x8] sm:$0xff]  ;;  %v533_v9 = vld [vmem:[%s1355_s0 + $0x50] sm:$0xff]  ;;  %v538_v11 = vld [vmem:[%s1355_s0 + $0x78] sm:$0xff] }
   0x8   :  { %v604_v21 = vmin.u32 %v205_v14, %v188_v6  ;;  %v208_v22 = vsub.s32 0, %v189_v13  ;;  %v211_v23 = vsub.s32 0, %v190_v15  ;;  %v214_v24 = vsub.s32 0, %v191_v16  ;;  %v537_v6 = vld [vmem:[%s1355_s0 + $0x70] sm:$0xff]  ;;  %v546_v14 = vld [vmem:[%s1355_s0 + $0xb8] sm:$0xff] }
   0x9   :  { %v217_v27 = vsub.s32 0, %v192_v17  ;;  %v220_v28 = vsub.s32 0, %v193_v18  ;;  %v223_v29 = vsub.s32 0, %v194_v19  ;;  %v226_v30 = vsub.s32 0, %v195_v20  ;;  %v14_v10 = vld [vmem:[%s1355_s0 + $0x30] sm:$0xff] }
   0xa   :  { %v605_v31 = vmin.u32 %v208_v22, %v189_v13  ;;  %vm252_vm1 = vcmp.le.s32.totalorder %v604_v21, 2  ;;  %v606_v32 = vmin.u32 %v211_v23, %v190_v15  ;;  %v607_v33 = vmin.u32 %v214_v24, %v191_v16  ;;  %v559_v13 = vld [vmem:[%s1355_s0 + $0x120] sm:$0xff]  ;;  %v10_v15 = vld [vmem:[%s1355_s0 + $0x10] sm:$0xff]  ;;  %v534_v16 = vld [vmem:[%s1355_s0 + $0x58] sm:$0xff] }
   0xb   :  { %v608_v34 = vmin.u32 %v217_v27, %v192_v17  ;;  %v609_v35 = vmin.u32 %v220_v28, %v193_v18  ;;  %v178_v37 = vadd.s32 64, %v170_v2  ;;  %v899_v38 = vmin.u32 %v223_v29, %v194_v19  ;;  %v15_v17 = vld [vmem:[%s1355_s0 + $0x38] sm:$0xff]  ;;  %v539_v21 = vld [vmem:[%s1355_s0 + $0x80] sm:$0xff]  ;;  %v568_v28 = vld [vmem:[%s1355_s0 + $0x168] sm:$0xff] }
   0xc   :  { %vm253_vm2 = vcmp.le.s32.totalorder %v605_v31, 2  ;;  %vm254_vm3 = vcmp.le.s32.totalorder %v606_v32, 2  ;;  %vm255_vm4 = vcmp.le.s32.totalorder %v607_v33, 2  ;;  %v901_v39 = vmin.u32 %v226_v30, %v195_v20  ;;  %v11_v22 = vld [vmem:[%s1355_s0 + $0x18] sm:$0xff]  ;;  %v535_v23 = vld [vmem:[%s1355_s0 + $0x60] sm:$0xff] }
   0xd   :  { %vm778_vm5 = vmpackc.low %vm253_vm2, %vm252_vm1  ;;  %vm256_vm6 = vcmp.le.s32.totalorder %v608_v34, 2  ;;  %vm257_vm7 = vcmp.le.s32.totalorder %v609_v35, 2  ;;  %v179_v41 = vadd.s32 72, %v170_v2  ;;  %v196_v42 = vsub.s32 %v178_v37, %v873_v3  ;;  %v555_v29 = vld [vmem:[%s1355_s0 + $0x100] sm:$0xff]  ;;  %v542_v30 = vld [vmem:[%s1355_s0 + $0x98] sm:$0xff] }
   0xe   :  { %779 = vmatpush3.bf16.msk.msra.mxu0 %vm778_vm5, %v860_v40  ;;  %809 = vmatpush3.bf16.msk.msra.mxu1 %vm778_vm5, %v860_v40  ;;  %v180_v43 = vadd.s32 80, %v170_v2  ;;  %v181_v44 = vadd.s32 88, %v170_v2  ;;  %vm781_vm8 = vmpackc.low %vm255_vm4, %vm254_vm3  ;;  %v182_v45 = vadd.s32 96, %v170_v2  ;;  %v183_v46 = vadd.s32 104, %v170_v2  ;;  %v551_v31 = vld [vmem:[%s1355_s0 + $0xe0] sm:$0xff]  ;;  %v582_v24 = vld [vmem:[%s1355_s0 + $0x1d8] sm:$0xff] }
   0xf   :  { %780 = vmatprep.subr.bf16.mxu0 %v857_v1  ;;  %802 = vmatprep.subr.bf16.mxu1 %v857_v1  ;;  %v184_v47 = vadd.s32 112, %v170_v2  ;;  %v185_v48 = vadd.s32 120, %v170_v2  ;;  %v197_v49 = vsub.s32 %v179_v41, %v873_v3  ;;  %v229_v50 = vsub.s32 0, %v196_v42  ;;  %vm928_vm9 = vmpackc.low %vm257_vm7, %vm256_vm6  ;;  %v543_v37 = vld [vmem:[%s1355_s0 + $0xa0] sm:$0xff]  ;;  %v577_v41 = vld [vmem:[%s1355_s0 + $0x1b0] sm:$0xff] }
  0x10   :  { %v198_v51 = vsub.s32 %v180_v43, %v873_v3  ;;  %v199_v52 = vsub.s32 %v181_v44, %v873_v3  ;;  %v200_v53 = vsub.s32 %v182_v45, %v873_v3  ;;  %v201_v54 = vsub.s32 %v183_v46, %v873_v3  ;;  %v556_v43 = vld [vmem:[%s1355_s0 + $0x108] sm:$0xff] }
  0x11   :  { %v202_v55 = vsub.s32 %v184_v47, %v873_v3  ;;  %v203_v56 = vsub.s32 %v185_v48, %v873_v3  ;;  %v919_v57 = vmin.u32 %v229_v50, %v196_v42  ;;  %v232_v58 = vsub.s32 0, %v197_v49  ;;  %v550_v3 = vld [vmem:[%s1355_s0 + $0xd8] sm:$0xff]  ;;  %v564_v42 = vld [vmem:[%s1355_s0 + $0x148] sm:$0xff] }
  0x12   :  { %782 = vmatpush3.bf16.msk.msra.mxu0 %vm781_vm8, %v860_v40  ;;  %810 = vmatpush3.bf16.msk.msra.mxu1 %vm781_vm8, %v860_v40  ;;  %v235_v59 = vsub.s32 0, %v198_v51  ;;  %v238_v60 = vsub.s32 0, %v199_v52  ;;  %v241_v63 = vsub.s32 0, %v200_v53  ;;  %v244_v0 = vsub.s32 0, %v201_v54  ;;  %v552_v45 = vld [vmem:[%s1355_s0 + $0xe8] sm:$0xff] }
  0x13   :  { %783 = vmatprep.subr.bf16.mxu0 %v857_v1  ;;  %803 = vmatprep.subr.bf16.mxu1 %v857_v1  ;;  %v247_v2 = vsub.s32 0, %v202_v55  ;;  %vm258_vm10 = vcmp.le.s32.totalorder %v899_v38, 2  ;;  %vm259_vm11 = vcmp.le.s32.totalorder %v901_v39, 2  ;;  %v613_v8 = vmin.u32 %v232_v58, %v197_v49  ;;  %v548_v38 = vld [vmem:[%s1355_s0 + $0xc8] sm:$0xff]  ;;  %v573_v58 = vld [vmem:[%s1355_s0 + $0x190] sm:$0xff] }
  0x14   :  { %v250_v12 = vsub.s32 0, %v203_v56  ;;  %vm260_vm12 = vcmp.le.s32.totalorder %v919_v57, 2  ;;  %v977_v18 = vmin.u32 %v235_v59, %v198_v51  ;;  %v979_v19 = vmin.u32 %v238_v60, %v199_v52  ;;  %vm999_vm13 = vmpackc.low %vm259_vm11, %vm258_vm10  ;;  %v544_v48 = vld [vmem:[%s1355_s0 + $0xa8] sm:$0xff]  ;;  %v557_v52 = vld [vmem:[%s1355_s0 + $0x110] sm:$0xff] }
  0x15   :  { %v46_v20 = vmax.f32 %v27_v36, %v541_v61  ;;  %vm261_vm14 = vcmp.le.s32.totalorder %v613_v8, 2  ;;  %v1003_v25 = vmin.u32 %v241_v63, %v200_v53  ;;  %v1005_v26 = vmin.u32 %v244_v0, %v201_v54  ;;  %v547_v36 = vld [vmem:[%s1355_s0 + $0xc0] sm:$0xff]  ;;  %v540_v54 = vld [vmem:[%s1355_s0 + $0x88] sm:$0xff] }
  0x16   :  { %785 = vmatpush3.bf16.msk.msra.mxu0 %vm928_vm9, %v860_v40  ;;  %811 = vmatpush3.bf16.msk.msra.mxu1 %vm928_vm9, %v860_v40  ;;  %v1007_v27 = vmin.u32 %v247_v2, %v202_v55  ;;  %v32_v33 = vmax.f32 %v13_v5, %v537_v6  ;;  %v28_v34 = vmax.f32 %v9_v7, %v533_v9  ;;  %vm262_vm15 = vcmp.le.s32.totalorder %v977_v18, 2  ;;  %v16_v53 = vld [vmem:[%s1355_s0 + $0x40] sm:$0xff]  ;;  %vm1068_vm1 = vmpackc.low %vm261_vm14, %vm260_vm12  ;;  %v560_v57 = vld [vmem:[%s1355_s0 + $0x128] sm:$0xff] }
  0x17   :  { %786 = vmatprep.subr.bf16.mxu0 %v857_v1  ;;  %804 = vmatprep.subr.bf16.mxu1 %v857_v1  ;;  %v65_v32 = vmax.f32 %v46_v20, %v550_v3  ;;  %v33_v35 = vmax.f32 %v14_v10, %v538_v11  ;;  %v1030_v39 = vmin.u32 %v250_v12, %v203_v56  ;;  %vm263_vm2 = vcmp.le.s32.totalorder %v979_v19, 2  ;;  %v1076_v56 = vld [vmem:[%s1355_s0 + $0x1f8] sm:$0xff]  ;;  %v565_v2 = vld [vmem:[%s1355_s0 + $0x150] sm:$0xff] }
  0x18   :  { %v29_v44 = vmax.f32 %v10_v15, %v534_v16  ;;  %v34_v46 = vmax.f32 %v15_v17, %v539_v21  ;;  %v30_v47 = vmax.f32 %v11_v22, %v535_v23  ;;  %v51_v50 = vmax.f32 %v32_v33, %v546_v14  ;;  %v561_v3 = vld [vmem:[%s1355_s0 + $0x130] sm:$0xff]  ;;  %v566_v5 = vld [vmem:[%s1355_s0 + $0x158] sm:$0xff]  ;;  %v595_v15 = vld [vmem:[%s1355_s0 + $0x240] sm:$0xff] }
  0x19   :  { %v84_v49 = vmax.f32 %v65_v32, %v559_v13  ;;  %v47_v51 = vmax.f32 %v28_v34, %v542_v30  ;;  %v52_v59 = vmax.f32 %v33_v35, %v547_v36  ;;  %v569_v7 = vld [vmem:[%s1355_s0 + $0x170] sm:$0xff]  ;;  %v574_v9 = vld [vmem:[%s1355_s0 + $0x198] sm:$0xff]  ;;  %v35_v13 = vmax.f32 %v16_v53, %v540_v54  ;;  %v575_v21 = vld [vmem:[%s1355_s0 + $0x1a0] sm:$0xff] }
  0x1a   :  { %788 = vmatpush3.bf16.msk.msra.mxu0 %vm999_vm13, %v860_v40  ;;  %812 = vmatpush3.bf16.msk.msra.mxu1 %vm999_vm13, %v860_v40  ;;  %v48_v60 = vmax.f32 %v29_v44, %v543_v37  ;;  %v53_v61 = vmax.f32 %v34_v46, %v548_v38  ;;  %v70_v63 = vmax.f32 %v51_v50, %v555_v29  ;;  %v553_v12 = vld [vmem:[%s1355_s0 + $0xf0] sm:$0xff]  ;;  %vm264_vm3 = vcmp.le.s32.totalorder %v1003_v25, 2  ;;  %v570_v20 = vld [vmem:[%s1355_s0 + $0x178] sm:$0xff]  ;;  %vm1129_vm4 = vmpackc.low %vm263_vm2, %vm262_vm15 }
  0x1b   :  { %789 = vmatprep.subr.bf16.mxu0 %v857_v1  ;;  %805 = vmatprep.subr.bf16.mxu1 %v857_v1  ;;  %v103_v62 = vmax.f32 %v84_v49, %v568_v28  ;;  %v66_v0 = vmax.f32 %v47_v51, %v551_v31  ;;  %v1093_v6 = vmax.f32 %v30_v47, %v544_v48  ;;  %v549_v22 = vld [vmem:[%s1355_s0 + $0xd0] sm:$0xff]  ;;  %vm265_vm5 = vcmp.le.s32.totalorder %v1005_v26, 2  ;;  %v578_v28 = vld [vmem:[%s1355_s0 + $0x1b8] sm:$0xff]  ;;  %v591_v32 = vld [vmem:[%s1355_s0 + $0x220] sm:$0xff] }
  0x1c   :  { %v71_v8 = vmax.f32 %v52_v59, %v556_v43  ;;  %v67_v10 = vmax.f32 %v48_v60, %v552_v45  ;;  %v72_v11 = vmax.f32 %v53_v61, %v557_v52  ;;  %v89_v16 = vmax.f32 %v70_v63, %v564_v42  ;;  %v583_v34 = vld [vmem:[%s1355_s0 + $0x1e0] sm:$0xff]  ;;  %v584_v43 = vld [vmem:[%s1355_s0 + $0x1e8] sm:$0xff]  ;;  %v562_v44 = vld [vmem:[%s1355_s0 + $0x138] sm:$0xff] }
  0x1d   :  { %v122_v14 = vmax.f32 %v103_v62, %v577_v41  ;;  %v85_v17 = vmax.f32 %v66_v0, %v560_v57  ;;  %v579_v35 = vld [vmem:[%s1355_s0 + $0x1c0] sm:$0xff]  ;;  %v68_v36 = vmax.f32 %v1093_v6, %v553_v12  ;;  %v54_v45 = vmax.f32 %v35_v13, %v549_v22  ;;  %v592_v48 = vld [vmem:[%s1355_s0 + $0x228] sm:$0xff]  ;;  %v558_v49 = vld [vmem:[%s1355_s0 + $0x118] sm:$0xff] }
  0x1e   :  { %791 = vmatpush3.bf16.msk.msra.mxu0 %vm1068_vm1, %v860_v40  ;;  %813 = vmatpush3.bf16.msk.msra.mxu1 %vm1068_vm1, %v860_v40  ;;  %v90_v29 = vmax.f32 %v71_v8, %v565_v2  ;;  %v86_v30 = vmax.f32 %v67_v10, %v561_v3  ;;  %v91_v31 = vmax.f32 %v72_v11, %v566_v5  ;;  %v587_v37 = vld [vmem:[%s1355_s0 + $0x200] sm:$0xff]  ;;  %vm266_vm6 = vcmp.le.s32.totalorder %v1007_v27, 2  ;;  %vm1179_vm7 = vmpackc.low %vm265_vm5, %vm264_vm3  ;;  %v600_v52 = vld [vmem:[%s1355_s0 + $0x268] sm:$0xff] }
  0x1f   :  { %792 = vmatprep.subr.bf16.mxu0 %v857_v1  ;;  %806 = vmatprep.subr.bf16.mxu1 %v857_v1  ;;  %v141_v18 = vmax.f32 %v122_v14, %v1076_v56  ;;  %v108_v19 = vmax.f32 %v89_v16, %v573_v58  ;;  %v104_v33 = vmax.f32 %v85_v17, %v569_v7  ;;  %vm267_vm8 = vcmp.le.s32.totalorder %v1030_v39, 2  ;;  %v571_v25 = vld [vmem:[%s1355_s0 + $0x180] sm:$0xff]  ;;  %v596_v56 = vld [vmem:[%s1355_s0 + $0x248] sm:$0xff]  ;;  %v601_v58 = vld [vmem:[%s1355_s0 + $0x270] sm:$0xff] }
  0x20   :  { %v109_v38 = vmax.f32 %v90_v29, %v574_v9  ;;  %v105_v41 = vmax.f32 %v86_v30, %v570_v20  ;;  %v110_v42 = vmax.f32 %v91_v31, %v575_v21  ;;  %v87_v59 = vmax.f32 %v68_v36, %v562_v44  ;;  %v588_v61 = vld [vmem:[%s1355_s0 + $0x208] sm:$0xff]  ;;  %v593_v62 = vld [vmem:[%s1355_s0 + $0x230] sm:$0xff]  ;;  %v567_v0 = vld [vmem:[%s1355_s0 + $0x160] sm:$0xff] }
  0x21   :  { %v127_v46 = vmax.f32 %v108_v19, %v582_v24  ;;  %v123_v47 = vmax.f32 %v104_v33, %v578_v28  ;;  %v1184_v51 = vmax.f32 %v141_v18, %v595_v15  ;;  %v73_v63 = vmax.f32 %v54_v45, %v558_v49  ;;  %v580_v5 = vld [vmem:[%s1355_s0 + $0x1c8] sm:$0xff]  ;;  %v12_v6 = vld [vmem:[%s1355_s0 + $0x20] sm:$0xff]  ;;  %vm1230_vm9 = vmpackc.low %vm267_vm8, %vm266_vm6 }
  0x22   :  { %794 = vmatpush3.bf16.msk.msra.mxu0 %vm1129_vm4, %v860_v40  ;;  %814 = vmatpush3.bf16.msk.msra.mxu1 %vm1129_vm4, %v860_v40  ;;  %v128_v53 = vmax.f32 %v109_v38, %v583_v34  ;;  %v124_v54 = vmax.f32 %v105_v41, %v579_v35  ;;  %v129_v57 = vmax.f32 %v110_v42, %v584_v43  ;;  %v536_v7 = vld [vmem:[%s1355_s0 + $0x68] sm:$0xff]  ;;  %v545_v27 = vld [vmem:[%s1355_s0 + $0xb0] sm:$0xff]  ;;  %v602_v16 = vld [vmem:[%s1355_s0 + $0x278] sm:$0xff] }
  0x23   :  { %795 = vmatprep.subr.bf16.mxu0 %v857_v1  ;;  %807 = vmatprep.subr.bf16.mxu1 %v857_v1  ;;  %v146_v55 = vmax.f32 %v127_v46, %v591_v32  ;;  %v142_v26 = vmax.f32 %v123_v47, %v587_v37  ;;  %v106_v3 = vmax.f32 %v87_v59, %v571_v25  ;;  %v576_v10 = vld [vmem:[%s1355_s0 + $0x1a8] sm:$0xff]  ;;  %v597_v15 = vld [vmem:[%s1355_s0 + $0x250] sm:$0xff]  ;;  %v554_v24 = vld [vmem:[%s1355_s0 + $0xf8] sm:$0xff] }
  0x24   :  { %v147_v60 = vmax.f32 %v128_v53, %v592_v48  ;;  %v300_v9 = vmul.f32 %v1184_v51, %v1184_v51  ;;  %v143_v12 = vmax.f32 %v124_v54, %v588_v61  ;;  %v148_v13 = vmax.f32 %v129_v57, %v593_v62  ;;  %v585_v20 = vld [vmem:[%s1355_s0 + $0x1f0] sm:$0xff]  ;;  %v594_v28 = vld [vmem:[%s1355_s0 + $0x238] sm:$0xff]  ;;  %v563_v19 = vld [vmem:[%s1355_s0 + $0x140] sm:$0xff] }
  0x25   :  { %v1213_v2 = vmax.f32 %v146_v55, %v600_v52  ;;  %v1239_v11 = vmax.f32 %v142_v26, %v596_v56  ;;  %v125_v17 = vmax.f32 %v106_v3, %v580_v5  ;;  %v31_v21 = vmax.f32 %v12_v6, %v536_v7  ;;  %v589_v22 = vld [vmem:[%s1355_s0 + $0x210] sm:$0xff]  ;;  %v598_v35 = vld [vmem:[%s1355_s0 + $0x258] sm:$0xff]  ;;  %v603_v37 = vld [vmem:[%s1355_s0 + $0x280] sm:$0xff] }
  0x26   :  { %797 = vmatpush3.bf16.msk.msra.mxu0 %vm1179_vm7, %v860_v40  ;;  %815 = vmatpush3.bf16.msk.msra.mxu1 %vm1179_vm7, %v860_v40  ;;  %v1246_v14 = vmax.f32 %v147_v60, %v601_v58  ;;  %v1274_v31 = vmax.f32 %v143_v12, %v597_v15  ;;  %v572_v38 = vld [vmem:[%s1355_s0 + $0x188] sm:$0xff]  ;;  %v581_v44 = vld [vmem:[%s1355_s0 + $0x1d0] sm:$0xff]  ;;  %v590_v48 = vld [vmem:[%s1355_s0 + $0x218] sm:$0xff] }
  0x27   :  { %798 = vmatprep.subr.bf16.mxu0 %v857_v1  ;;  %808 = vmatprep.subr.bf16.mxu1 %v857_v1  ;;  %v92_v1 = vmax.f32 %v73_v63, %v567_v0  ;;  %v305_v39 = vmul.f32 %v1213_v2, %v1213_v2  ;;  %v50_v29 = vmax.f32 %v31_v21, %v545_v27  ;;  %v599_v50 = vld [vmem:[%s1355_s0 + $0x260] sm:$0xff] }
  0x28   :  { %v301_v30 = vmul.f32 %v1239_v11, %v1239_v11  ;;  %v306_v32 = vmul.f32 %v1246_v14, %v1246_v14  ;;  %v144_v33 = vmax.f32 %v125_v17, %v589_v22  ;;  %v302_v42 = vmul.f32 %v1274_v31, %v1274_v31 }
  0x29   :  { %v111_v23 = vmax.f32 %v92_v1, %v576_v10  ;;  %v69_v34 = vmax.f32 %v50_v29, %v554_v24 }
  0x2a   :  { %800 = vmatpush3.bf16.msk.msra.mxu0 %vm1230_vm9, %v860_v40  ;;  %816 = vmatpush3.bf16.msk.msra.mxu1 %vm1230_vm9, %v860_v40  ;;  %v1276_v40 = vmax.f32 %v148_v13, %v602_v16  ;;  %v1303_v45 = vmax.f32 %v144_v33, %v598_v35 }
  0x2b   :  { %v130_v18 = vmax.f32 %v111_v23, %v585_v20  ;;  %v88_v41 = vmax.f32 %v69_v34, %v563_v19 }
  0x2c   :  { %v307_v43 = vmul.f32 %v1276_v40, %v1276_v40  ;;  %v303_v52 = vmul.f32 %v1303_v45, %v1303_v45 }
  0x2d   :  { %751 = vmatmul.mubr.f32.vlgmr.msra.gmra.mrb[0].mxu0 %v300_v9  ;;  %766 = vmatmul.mubr.f32.vlgmr.msra.gmra.mrb[0].mxu1 %v305_v39  ;;  %v149_v36 = vmax.f32 %v130_v18, %v594_v28  ;;  %v107_v47 = vmax.f32 %v88_v41, %v572_v38 }
  0x2e   :  { %753 = vmatprep.mubr.msk.f32.mxu0 %vm858_vm0, %v859_v4  ;;  %768 = vmatprep.mubr.msk.f32.mxu1 %vm858_vm0, %v859_v4 }
  0x2f   :  { %v1305_v46 = vmax.f32 %v149_v36, %v603_v37  ;;  %v126_v49 = vmax.f32 %v107_v47, %v581_v44 }
  0x31   :  { %754 = vmatmul.mubr.f32.gmra.mrb[2].mxu0 %v301_v30  ;;  %769 = vmatmul.mubr.f32.gmra.mrb[2].mxu1 %v306_v32  ;;  %v308_v53 = vmul.f32 %v1305_v46, %v1305_v46  ;;  %v145_v54 = vmax.f32 %v126_v49, %v590_v48 }
  0x32   :  { %756 = vmatprep.mubr.msk.f32.mxu0 %vm858_vm0, %v859_v4  ;;  %771 = vmatprep.mubr.msk.f32.mxu1 %vm858_vm0, %v859_v4 }
  0x33   :  { %v1325_v25 = vmax.f32 %v145_v54, %v599_v50 }
  0x35   :  { %757 = vmatmul.mubr.f32.gmra.mrb[4].mxu0 %v302_v42  ;;  %772 = vmatmul.mubr.f32.gmra.mrb[4].mxu1 %v307_v43  ;;  %v304_v55 = vmul.f32 %v1325_v25, %v1325_v25 }
  0x36   :  { %759 = vmatprep.mubr.msk.f32.mxu0 %vm858_vm0, %v859_v4  ;;  %774 = vmatprep.mubr.msk.f32.mxu1 %vm858_vm0, %v859_v4 }
  0x39   :  { %760 = vmatmul.mubr.f32.gmra.mrb[6].mxu0 %v303_v52  ;;  %775 = vmatmul.mubr.f32.gmra.mrb[6].mxu1 %v308_v53 }
  0x3a   :  { %762 = vmatprep.mubr.msk.f32.mxu0 %vm858_vm0, %v859_v4 }
  0x3d   :  { %763 = vmatmul.mubr.f32.gmra.mrb[8].mxu0 %v304_v55 }
 0x100   :  { %v375_v26 = vpop.f32.mrb[0].mxu0  ;;  %v400_v56 = vpop.f32.mrb[0].mxu1 }
 0x101   :  { %v419_v58 = vmul.f32 2e-05, %v375_v26  ;;  %v752_v57 = vpop.f32.mrb[1].mxu0  ;;  %v767_v59 = vpop.f32.mrb[1].mxu1  ;;  %v424_v61 = vmul.f32 2e-05, %v400_v56 }
 0x103   :  { %v428_v60 = vadd.f32 1.0, %v419_v58  ;;  %v433_v9 = vadd.f32 1.0, %v424_v61 }
 0x104   :  { %v380_v62 = vpop.f32.mrb[2].mxu0  ;;  %v405_v63 = vpop.f32.mrb[2].mxu1 }
 0x105   :  { %821 = vrsqrt.f32 %v428_v60  ;;  %v420_v0 = vmul.f32 2e-05, %v380_v62  ;;  %v425_v3 = vmul.f32 2e-05, %v405_v63  ;;  %v755_v5 = vpop.f32.mrb[3].mxu0  ;;  %v770_v6 = vpop.f32.mrb[3].mxu1 }
 0x107   :  { %v429_v7 = vadd.f32 1.0, %v420_v0  ;;  %v434_v8 = vadd.f32 1.0, %v425_v3 }
 0x108   :  { %v385_v10 = vpop.f32.mrb[4].mxu0  ;;  %v410_v4 = vpop.f32.mrb[4].mxu1 }
 0x109   :  { %823 = vrsqrt.f32 %v429_v7  ;;  %v421_v12 = vmul.f32 2e-05, %v385_v10  ;;  %v426_v13 = vmul.f32 2e-05, %v410_v4  ;;  %v758_v1 = vpop.f32.mrb[5].mxu0  ;;  %v773_v27 = vpop.f32.mrb[5].mxu1 }
 0x10a   :  { %825 = vrsqrt.f32 %v434_v8 }
 0x10b   :  { %v430_v39 = vadd.f32 1.0, %v421_v12  ;;  %v435_v15 = vadd.f32 1.0, %v426_v13  ;;  %827 = vrsqrt.f32 %v433_v9 }
 0x10c   :  { %v390_v16 = vpop.f32.mrb[6].mxu0  ;;  %v415_v17 = vpop.f32.mrb[6].mxu1 }
 0x10d   :  { %829 = vrsqrt.f32 %v430_v39  ;;  %v422_v20 = vmul.f32 2e-05, %v390_v16  ;;  %v427_v21 = vmul.f32 2e-05, %v415_v17  ;;  %v761_v22 = vpop.f32.mrb[7].mxu0  ;;  %v776_v23 = vpop.f32.mrb[7].mxu1 }
 0x10e   :  { %831 = vrsqrt.f32 %v435_v15 }
 0x10f   :  { %v822_v24 = vpop.eup %821  ;;  %v431_v28 = vadd.f32 1.0, %v422_v20  ;;  %v436_v30 = vadd.f32 1.0, %v427_v21 }
 0x110   :  { %v446_v29 = vmul.f32 %v822_v24, %v428_v60  ;;  %v395_v18 = vpop.f32.mrb[8].mxu0 }
 0x111   :  { %833 = vrsqrt.f32 %v431_v28  ;;  %v423_v19 = vmul.f32 2e-05, %v395_v18  ;;  %v764_v32 = vpop.f32.mrb[9].mxu0 }
 0x112   :  { %835 = vrsqrt.f32 %v446_v29 }
 0x113   :  { %v824_v33 = vpop.eup %823  ;;  %v432_v34 = vadd.f32 1.0, %v423_v19  ;;  %837 = vrsqrt.f32 %v436_v30 }
 0x114   :  { %v826_v35 = vpop.eup %825  ;;  %v447_v36 = vmul.f32 %v824_v33, %v429_v7 }
 0x115   :  { %v452_v37 = vmul.f32 %v826_v35, %v434_v8  ;;  %839 = vrsqrt.f32 %v432_v34  ;;  %v828_v38 = vpop.eup %827 }
 0x116   :  { %841 = vrsqrt.f32 %v447_v36  ;;  %v451_v44 = vmul.f32 %v828_v38, %v433_v9 }
 0x117   :  { %v830_v41 = vpop.eup %829  ;;  %843 = vrsqrt.f32 %v452_v37 }
 0x118   :  { %v832_v42 = vpop.eup %831  ;;  %v448_v43 = vmul.f32 %v830_v41, %v430_v39 }
 0x119   :  { %v453_v47 = vmul.f32 %v832_v42, %v435_v15 }
 0x11a   :  { %845 = vrsqrt.f32 %v448_v43 }
 0x11b   :  { %v834_v48 = vpop.eup %833  ;;  %847 = vrsqrt.f32 %v453_v47 }
 0x11c   :  { %v836_v49 = vpop.eup %835  ;;  %v449_v50 = vmul.f32 %v834_v48, %v431_v28  ;;  %849 = vrsqrt.f32 %v451_v44 }
 0x11d   :  { %v838_v52 = vpop.eup %837  ;;  %v464_v54 = vmul.f32 %v836_v49, %v822_v24 }
 0x11e   :  { %851 = vrsqrt.f32 %v449_v50  ;;  %v454_v55 = vmul.f32 %v838_v52, %v436_v30 }
 0x11f   :  { %v840_v53 = vpop.eup %839  ;;  %v473_v59 = vmul.f32 %v464_v54, %v1184_v51 }
 0x120   :  { %v842_v26 = vpop.eup %841  ;;  %v450_v56 = vmul.f32 %v840_v53, %v432_v34  ;;  %853 = vrsqrt.f32 %v454_v55 }
 0x121   :  { %v844_v58 = vpop.eup %843  ;;  %v465_v57 = vmul.f32 %v842_v26, %v824_v33 }
 0x122   :  { %855 = vrsqrt.f32 %v450_v56  ;;  %v470_v62 = vmul.f32 %v844_v58, %v826_v35 }
 0x123   :  { %v474_v60 = vmul.f32 %v465_v57, %v1239_v11 }
 0x124   :  { %v846_v61 = vpop.eup %845  ;;  %v479_v8 = vmul.f32 %v470_v62, %v1246_v14 }
 0x125   :  { %v848_v63 = vpop.eup %847  ;;  %v673_v0 = vpack.c.bf16 %v474_v60, %v473_v59  ;;  %v466_v6 = vmul.f32 %v846_v61, %v830_v41 }
 0x126   :  { %v471_v3 = vmul.f32 %v848_v63, %v832_v42  ;;  %v850_v5 = vpop.eup %849 }
 0x127   :  { %674 = vst [vmem:[%s1356_s1] sm:$0xff] %v673_v0   ;;  %v469_v11 = vmul.f32 %v850_v5, %v828_v38  ;;  %v475_v12 = vmul.f32 %v466_v6, %v1274_v31 }
 0x128   :  { %v852_v7 = vpop.eup %851  ;;  %v480_v9 = vmul.f32 %v471_v3, %v1276_v40 }
 0x129   :  { %v467_v10 = vmul.f32 %v852_v7, %v834_v48  ;;  %v478_v40 = vmul.f32 %v469_v11, %v1213_v2 }
 0x12a   :  { %v688_v51 = vpack.c.bf16 %v480_v9, %v479_v8  ;;  %v854_v4 = vpop.eup %853 }
 0x12b   :  { %v476_v13 = vmul.f32 %v467_v10, %v1303_v45  ;;  %v472_v27 = vmul.f32 %v854_v4, %v838_v52 }
 0x12c   :  { %v856_v1 = vpop.eup %855  ;;  %692 = vst [vmem:[%s1356_s1 + $0x18] sm:$0xff] %v688_v51  }
 0x12d   :  { %v678_v39 = vpack.c.bf16 %v476_v13, %v475_v12  ;;  %v468_v15 = vmul.f32 %v856_v1, %v840_v53  ;;  %v481_v14 = vmul.f32 %v472_v27, %v1305_v46 }
 0x12f   :  { %690 = vst [vmem:[%s1356_s1 + $0x8] sm:$0xff] %v678_v39   ;;  %v477_v31 = vmul.f32 %v468_v15, %v1325_v25  ;;  %v669_v16 = vpack.c.bf16 %v481_v14, %v481_v14 }
 0x131   :  { %v683_v45 = vpack.c.bf16 %v478_v40, %v477_v31  ;;  %527 = vst [vmem:[%s1356_s1 + $0x20] sm:$0xf] %v669_v16 }
 0x133   :  { %691 = vst [vmem:[%s1356_s1 + $0x10] sm:$0xff] %v683_v45  }

// kernel: itracker_image_model.7
= control target key start
LH: loop header
LB: loop body
LE: loop exit
PB: predicated region body
PF: predicated region fallthrough
CT: control target
= control target key end

     0   :  { %s2331_s12 = smov 0   ;;  %s2333_s13 = smov 0   ;;  %s2572_s0 = inlined_call_operand.vmem [shape: bf16[2,72,1280], index: 0, kind: input, shape index: {}]   ;;  %s2573_s1 = inlined_call_operand.vmem [shape: bf16[2,1280,128], index: 1, kind: input, shape index: {}]   ;;  %s2574_s2 = inlined_call_operand.vmem [shape: f32[2,1,128], index: 2, kind: input, shape index: {}]   ;;  %s2575_s3 = inlined_call_operand.vmem [shape: f32[2,72,128], index: 3, kind: output, shape index: {}]  }
   0x1   :  { %s2335_s14 = smov 0  }
   0x2 LB: > { %s32_s15 = sadd.s32 1, %s2305_s13  ;;  %p1727_p0 = scmp.ge.s32.totalorder %s2309_s14, 1  ;;  %s2309_s14 = sphi %s2335_s14, %s13_s14   ;;  %s2305_s13 = sphi %s2333_s13, %s2577_s13   ;;  %s2301_s12 = sphi %s2331_s12, %s2576_s12  }
   0x3   : > { %p34_p1 = scmp.ge.s32.totalorder %s32_s15, 2  ;;  %p196_p2 = scmp.lt.s32.totalorder %s2309_s14, 3 }
   0x5   : > { %s2579_s15 = smov (%p34_p1, %s32_s15), 0  ;;  %p197_p3 = pnand %p1727_p0, %p196_p2 }
   0x6   : > { %p247_p4 = scmp.lt.s32.totalorder (!%p197_p3), %s2301_s12, 1 }
   0x7   : > { %200 = sbr.rel (%p197_p3) target bundleno = 370 (0x172), region = 32 }
   0xe   : > { %s2581_s12 = smov (!%p247_p4, %s2301_s12), 1 }
   0xf   : > { %s2111_s16 = smul.u32 640, %s2581_s12  ;;  %s270_s26 = scalar_lea.vmem %s2574_s2, %s2581_s12 }
  0x10   : > { %s2110_s20 = smul.u32 360, %s2581_s12 }
  0x11   : > { %s2355_s19 = scalar_lea.vmem %s2573_s1, %s2111_s16  ;;  %s2112_s27 = smul.u32 72, %s2581_s12 }
  0x12   : > { %v2137_v0 = vld [vmem:[%s2355_s19 + $0x40] sm:$0xff]   ;;  %v2141_v4 = vld [vmem:[%s2355_s19 + $0x48] sm:$0xff]   ;;  %v2145_v8 = vld [vmem:[%s2355_s19 + $0x50] sm:$0xff]   ;;  %s2391_s23 = scalar_lea.vmem %s2572_s0, %s2110_s20 }
  0x13   : > { %v2138_v1 = vld [vmem:[%s2355_s19 + $0xc0] sm:$0xff]   ;;  %1864 = vmatprep.subr.bf16.mxu0 %v2137_v0  ;;  %v2142_v5 = vld [vmem:[%s2355_s19 + $0xc8] sm:$0xff]   ;;  %v2146_v9 = vld [vmem:[%s2355_s19 + $0xd0] sm:$0xff]   ;;  %s2547_s30 = scalar_lea.vmem %s2575_s3, %s2112_s27 }
  0x14   : > { %v2139_v2 = vld [vmem:[%s2355_s19] sm:$0xff]   ;;  %1910 = vmatprep.subr.bf16.mxu1 %v2138_v1  ;;  %v2143_v6 = vld [vmem:[%s2355_s19 + $0x8] sm:$0xff]   ;;  %v2147_v10 = vld [vmem:[%s2355_s19 + $0x10] sm:$0xff]  }
  0x15   : > { %v2140_v3 = vld [vmem:[%s2355_s19 + $0x80] sm:$0xff]   ;;  %1865 = vmatpush3.bf16.msra.mxu0 %v2139_v2  ;;  %v2144_v7 = vld [vmem:[%s2355_s19 + $0x88] sm:$0xff]   ;;  %v2148_v11 = vld [vmem:[%s2355_s19 + $0x90] sm:$0xff]  }
  0x16   : > { %1911 = vmatpush3.bf16.msra.mxu1 %v2140_v3  ;;  %1866 = vmatprep.subr.bf16.mxu0 %v2141_v4  ;;  %v2149_v12 = vld [vmem:[%s2355_s19 + $0x58] sm:$0xff]   ;;  %v2153_v16 = vld [vmem:[%s2355_s19 + $0x60] sm:$0xff]   ;;  %v2157_v20 = vld [vmem:[%s2355_s19 + $0x68] sm:$0xff]  }
  0x17   : > { %1912 = vmatprep.subr.bf16.mxu1 %v2142_v5  ;;  %v2150_v13 = vld [vmem:[%s2355_s19 + $0xd8] sm:$0xff]   ;;  %v2154_v17 = vld [vmem:[%s2355_s19 + $0xe0] sm:$0xff]   ;;  %v2158_v21 = vld [vmem:[%s2355_s19 + $0xe8] sm:$0xff]  }
  0x18   : > { %v2151_v14 = vld [vmem:[%s2355_s19 + $0x18] sm:$0xff]   ;;  %v2155_v18 = vld [vmem:[%s2355_s19 + $0x20] sm:$0xff]   ;;  %v2159_v22 = vld [vmem:[%s2355_s19 + $0x28] sm:$0xff]  }
  0x19   : > { %1867 = vmatpush3.bf16.msra.mxu0 %v2143_v6  ;;  %v2152_v15 = vld [vmem:[%s2355_s19 + $0x98] sm:$0xff]   ;;  %v2156_v19 = vld [vmem:[%s2355_s19 + $0xa0] sm:$0xff]   ;;  %v2160_v23 = vld [vmem:[%s2355_s19 + $0xa8] sm:$0xff]  }
  0x1a   : > { %1913 = vmatpush3.bf16.msra.mxu1 %v2144_v7  ;;  %1868 = vmatprep.subr.bf16.mxu0 %v2145_v8  ;;  %v2161_v24 = vld [vmem:[%s2355_s19 + $0x70] sm:$0xff]   ;;  %v2165_v28 = vld [vmem:[%s2355_s19 + $0x78] sm:$0xff]   ;;  %v2169_v32 = vld [vmem:[%s2391_s23] ss:$40 sps:$4 sm:$0xff]  }
  0x1b   : > { %1914 = vmatprep.subr.bf16.mxu1 %v2146_v9  ;;  %v2162_v25 = vld [vmem:[%s2355_s19 + $0xf0] sm:$0xff]   ;;  %v2166_v29 = vld [vmem:[%s2355_s19 + $0xf8] sm:$0xff]   ;;  %v2171_v33 = vld [vmem:[%s2391_s23 + $0x4] ss:$40 sps:$4 sm:$0xff]  }
  0x1c   : > { %v2163_v26 = vld [vmem:[%s2355_s19 + $0x30] sm:$0xff]   ;;  %v2167_v30 = vld [vmem:[%s2355_s19 + $0x38] sm:$0xff]   ;;  %1244 = vmatprep.mubr.bf16.mxu0 %v2171_v33  ;;  %v2175_v36 = vld [vmem:[%s2355_s19 + $0x140] sm:$0xff]  }
  0x1d   : > { %1869 = vmatpush3.bf16.msra.mxu0 %v2147_v10  ;;  %v2164_v27 = vld [vmem:[%s2355_s19 + $0xb0] sm:$0xff]   ;;  %v2168_v31 = vld [vmem:[%s2355_s19 + $0xb8] sm:$0xff]   ;;  %v2176_v37 = vld [vmem:[%s2355_s19 + $0x100] sm:$0xff]  }
  0x1e   : > { %1915 = vmatpush3.bf16.msra.mxu1 %v2148_v11  ;;  %1870 = vmatprep.subr.bf16.mxu0 %v2149_v12  ;;  %v2172_v34 = vld [vmem:[%s2391_s23 + $0x8] ss:$40 sps:$4 sm:$0xff]   ;;  %v2174_v35 = vld [vmem:[%s2391_s23 + $0xc] ss:$40 sps:$4 sm:$0xff]   ;;  %v2181_v41 = vld [vmem:[%s2391_s23 + $0x5c] ss:$40 sps:$4 sm:$0xff]  }
  0x1f   : > { %1916 = vmatprep.subr.bf16.mxu1 %v2150_v13  ;;  %1316 = vmatprep.mubr.bf16.mxu1 %v2174_v35  ;;  %v2177_v38 = vld [vmem:[%s2355_s19 + $0x148] sm:$0xff]   ;;  %v2179_v40 = vld [vmem:[%s2391_s23 + $0x54] ss:$40 sps:$4 sm:$0xff]   ;;  %v2183_v42 = vld [vmem:[%s2391_s23 + $0x50] ss:$40 sps:$4 sm:$0xff]  }
  0x20   : > { %v2178_v39 = vld [vmem:[%s2355_s19 + $0x108] sm:$0xff]   ;;  %v2184_v43 = vld [vmem:[%s2391_s23 + $0x58] ss:$40 sps:$4 sm:$0xff]   ;;  %v2187_v46 = vld [vmem:[%s2355_s19 + $0x150] sm:$0xff]  }
  0x21   : > { %1871 = vmatpush3.bf16.msra.mxu0 %v2151_v14  ;;  %v2185_v44 = vld [vmem:[%s2355_s19 + $0x1c0] sm:$0xff]   ;;  %v2188_v47 = vld [vmem:[%s2355_s19 + $0x110] sm:$0xff]   ;;  %v2189_v48 = vld [vmem:[%s2355_s19 + $0x1c8] sm:$0xff]  }
  0x22   : > { %1917 = vmatpush3.bf16.msra.mxu1 %v2152_v15  ;;  %1872 = vmatprep.subr.bf16.mxu0 %v2153_v16  ;;  %v2186_v45 = vld [vmem:[%s2355_s19 + $0x180] sm:$0xff]   ;;  %v2190_v49 = vld [vmem:[%s2355_s19 + $0x188] sm:$0xff]   ;;  %v2195_v52 = vld [vmem:[%s2355_s19 + $0x158] sm:$0xff]  }
  0x23   : > { %1918 = vmatprep.subr.bf16.mxu1 %v2154_v17  ;;  %v2191_v50 = vld [vmem:[%s2391_s23 + $0xa4] ss:$40 sps:$4 sm:$0xff]   ;;  %v2196_v53 = vld [vmem:[%s2391_s23 + $0xa0] ss:$40 sps:$4 sm:$0xff]   ;;  %v2198_v55 = vld [vmem:[%s2355_s19 + $0x118] sm:$0xff]  }
  0x24   : > { %v2193_v51 = vld [vmem:[%s2391_s23 + $0xac] ss:$40 sps:$4 sm:$0xff]   ;;  %v2197_v54 = vld [vmem:[%s2391_s23 + $0xa8] ss:$40 sps:$4 sm:$0xff]   ;;  %v2201_v58 = vld [vmem:[%s2355_s19 + $0x160] sm:$0xff]  }
  0x25   : > { %1873 = vmatpush3.bf16.msra.mxu0 %v2155_v18  ;;  %v2199_v56 = vld [vmem:[%s2355_s19 + $0x1d0] sm:$0xff]   ;;  %v2202_v59 = vld [vmem:[%s2355_s19 + $0x1d8] sm:$0xff]   ;;  %v2203_v60 = vld [vmem:[%s2355_s19 + $0x120] sm:$0xff]  }
  0x26   : > { %1919 = vmatpush3.bf16.msra.mxu1 %v2156_v19  ;;  %1874 = vmatprep.subr.bf16.mxu0 %v2157_v20  ;;  %v2200_v57 = vld [vmem:[%s2355_s19 + $0x190] sm:$0xff]   ;;  %v2204_v61 = vld [vmem:[%s2355_s19 + $0x198] sm:$0xff]   ;;  %v2211_v2 = vld [vmem:[%s2355_s19 + $0x1e0] sm:$0xff]  }
  0x27   : > { %1920 = vmatprep.subr.bf16.mxu1 %v2158_v21  ;;  %v2205_v62 = vld [vmem:[%s2391_s23 + $0xf4] ss:$40 sps:$4 sm:$0xff]   ;;  %v2209_v0 = vld [vmem:[%s2391_s23 + $0xf0] ss:$40 sps:$4 sm:$0xff]   ;;  %v2212_v3 = vld [vmem:[%s2355_s19 + $0x168] sm:$0xff]  }
  0x28   : > { %v2207_v63 = vld [vmem:[%s2391_s23 + $0xfc] ss:$40 sps:$4 sm:$0xff]   ;;  %v2210_v1 = vld [vmem:[%s2391_s23 + $0xf8] ss:$40 sps:$4 sm:$0xff]   ;;  %v2214_v5 = vld [vmem:[%s2355_s19 + $0x128] sm:$0xff]  }
  0x29   : > { %1875 = vmatpush3.bf16.msra.mxu0 %v2159_v22  ;;  %v2213_v4 = vld [vmem:[%s2355_s19 + $0x1a0] sm:$0xff]   ;;  %v2215_v6 = vld [vmem:[%s2355_s19 + $0x1e8] sm:$0xff]   ;;  %v2217_v8 = vld [vmem:[%s2355_s19 + $0x170] sm:$0xff]  }
  0x2a   : > { %1921 = vmatpush3.bf16.msra.mxu1 %v2160_v23  ;;  %1876 = vmatprep.subr.bf16.mxu0 %v2161_v24  ;;  %v2216_v7 = vld [vmem:[%s2355_s19 + $0x1a8] sm:$0xff]   ;;  %v325_v9 = vld [vmem:[%s2391_s23 + $0x140] sm:$0xff]  ;;  %v2220_v14 = vld [vmem:[%s2355_s19 + $0x130] sm:$0xff]  }
  0x2b   : > { %1922 = vmatprep.subr.bf16.mxu1 %v2162_v25  ;;  %v1773_v10 = vcombine.high %v325_v9, %v325_v9  ;;  %v326_v11 = vld [vmem:[%s2391_s23 + $0x148] sm:$0xff]  ;;  %v1772_v12 = vcombine.low %v325_v9, %v325_v9  ;;  %v2223_v16 = vld [vmem:[%s2355_s19 + $0x1f0] sm:$0xff]   ;;  %v2225_v18 = vld [vmem:[%s2355_s19 + $0x178] sm:$0xff]  }
  0x2c   : > { %v1775_v13 = vcombine.high %v326_v11, %v326_v11  ;;  %v1774_v15 = vcombine.low %v326_v11, %v326_v11  ;;  %v2224_v17 = vld [vmem:[%s2355_s19 + $0x1b0] sm:$0xff]   ;;  %v2226_v19 = vld [vmem:[%s2355_s19 + $0x138] sm:$0xff]  }
  0x2d   : > { %1877 = vmatpush3.bf16.msra.mxu0 %v2163_v26  ;;  %v2227_v20 = vld [vmem:[%s2355_s19 + $0x1f8] sm:$0xff]   ;;  %v2235_v26 = vld [vmem:[%s2355_s19 + $0x240] sm:$0xff]   ;;  %v2244_v33 = vld [vmem:[%s2391_s23 + $0x68] ss:$40 sps:$4 sm:$0xff]  }
  0x2e   : > { %1923 = vmatpush3.bf16.msra.mxu1 %v2164_v27  ;;  %1878 = vmatprep.subr.bf16.mxu0 %v2165_v28  ;;  %v2228_v21 = vld [vmem:[%s2355_s19 + $0x1b8] sm:$0xff]   ;;  %v2236_v27 = vld [vmem:[%s2355_s19 + $0x200] sm:$0xff]   ;;  %v2237_v28 = vld [vmem:[%s2355_s19 + $0x248] sm:$0xff]  }
  0x2f   : > { %1924 = vmatprep.subr.bf16.mxu1 %v2166_v29  ;;  %v2229_v22 = vld [vmem:[%s2391_s23 + $0x10] ss:$40 sps:$4 sm:$0xff]   ;;  %v2231_v23 = vld [vmem:[%s2391_s23 + $0x14] ss:$40 sps:$4 sm:$0xff]   ;;  %v2238_v29 = vld [vmem:[%s2355_s19 + $0x208] sm:$0xff]  }
  0x30   : > { %v2232_v24 = vld [vmem:[%s2391_s23 + $0x18] ss:$40 sps:$4 sm:$0xff]   ;;  %v2234_v25 = vld [vmem:[%s2391_s23 + $0x1c] ss:$40 sps:$4 sm:$0xff]   ;;  %v2246_v35 = vld [vmem:[%s2355_s19 + $0x210] sm:$0xff]  }
  0x31   : > { %1879 = vmatpush3.bf16.msra.mxu0 %v2167_v30  ;;  %v2239_v30 = vld [vmem:[%s2391_s23 + $0x64] ss:$40 sps:$4 sm:$0xff]  }
  0x32   : > { %1925 = vmatpush3.bf16.msra.mxu1 %v2168_v31  ;;  %1956 = vmatprep.subr.bf16.mxu0 %v2175_v36  ;;  %v2241_v31 = vld [vmem:[%s2391_s23 + $0x6c] ss:$40 sps:$4 sm:$0xff]  }
  0x33   : > { %2002 = vmatprep.subr.bf16.mxu1 %v2185_v44  ;;  %v2247_v36 = vld [vmem:[%s2391_s23 + $0xb4] ss:$40 sps:$4 sm:$0xff]   ;;  %v2257_v44 = vld [vmem:[%s2391_s23 + $0x104] ss:$40 sps:$4 sm:$0xff]  }
  0x34   : > { %1245 = vmatmul.mubr.bf16.vlgmr.msra.gmra.mrb[0].mxu0 %v2169_v32  ;;  %v2243_v32 = vld [vmem:[%s2391_s23 + $0x60] ss:$40 sps:$4 sm:$0xff]  }
  0x35   : > { %1317 = vmatmul.mubr.bf16.vlgmr.msra.gmra.mrb[0].mxu1 %v2172_v34  ;;  %1957 = vmatpush3.bf16.msra.mxu0 %v2176_v37  ;;  %v2245_v34 = vld [vmem:[%s2355_s19 + $0x250] sm:$0xff]   ;;  %v2249_v37 = vld [vmem:[%s2391_s23 + $0xbc] ss:$40 sps:$4 sm:$0xff]  }
  0x36   : > { %1958 = vmatprep.subr.bf16.mxu0 %v2177_v38  ;;  %1252 = vmatprep.mubr.bf16.mxu0 %v2179_v40  ;;  %v2251_v38 = vld [vmem:[%s2355_s19 + $0x258] sm:$0xff]  }
  0x37   : > { %1324 = vmatprep.mubr.bf16.mxu1 %v2181_v41  ;;  %2003 = vmatpush3.bf16.msra.mxu1 %v2186_v45  ;;  %v2253_v40 = vld [vmem:[%s2391_s23 + $0xb8] ss:$40 sps:$4 sm:$0xff]   ;;  %v2259_v45 = vld [vmem:[%s2391_s23 + $0x10c] ss:$40 sps:$4 sm:$0xff]  }
  0x38   : > { %2004 = vmatprep.subr.bf16.mxu1 %v2189_v48  ;;  %v2254_v41 = vld [vmem:[%s2355_s19 + $0x218] sm:$0xff]   ;;  %v2265_v48 = vld [vmem:[%s2355_s19 + $0x270] sm:$0xff]  }
  0x39   : > { %1959 = vmatpush3.bf16.msra.mxu0 %v2178_v39  ;;  %v2252_v39 = vld [vmem:[%s2391_s23 + $0xb0] ss:$40 sps:$4 sm:$0xff]  }
  0x3a   : > { %1960 = vmatprep.subr.bf16.mxu0 %v2187_v46  ;;  %v2263_v46 = vld [vmem:[%s2355_s19 + $0x268] sm:$0xff]  }
  0x3b   : > { %2005 = vmatpush3.bf16.msra.mxu1 %v2190_v49  ;;  %v327_v49 = vld [vmem:[%s2391_s23 + $0x150] sm:$0xff] }
  0x3c   : > { %1253 = vmatmul.mubr.bf16.gmra.mrb[4].mxu0 %v2183_v42  ;;  %2006 = vmatprep.subr.bf16.mxu1 %v2199_v56  ;;  %v2255_v42 = vld [vmem:[%s2355_s19 + $0x260] sm:$0xff]   ;;  %v2271_v56 = vld [vmem:[%s2355_s19 + $0x278] sm:$0xff]  }
  0x3d   : > { %1325 = vmatmul.mubr.bf16.gmra.mrb[4].mxu1 %v2184_v43  ;;  %1961 = vmatpush3.bf16.msra.mxu0 %v2188_v47  ;;  %v2256_v43 = vld [vmem:[%s2355_s19 + $0x220] sm:$0xff]   ;;  %v2264_v47 = vld [vmem:[%s2355_s19 + $0x228] sm:$0xff]  }
  0x3e   : > { %1260 = vmatprep.mubr.bf16.mxu0 %v2191_v50  ;;  %1332 = vmatprep.mubr.bf16.mxu1 %v2193_v51  ;;  %v328_v50 = vld [vmem:[%s2391_s23 + $0x158] sm:$0xff]  ;;  %v2261_v51 = vld [vmem:[%s2391_s23 + $0x100] ss:$40 sps:$4 sm:$0xff]  }
  0x3f   : > { %1962 = vmatprep.subr.bf16.mxu0 %v2195_v52  ;;  %2007 = vmatpush3.bf16.msra.mxu1 %v2200_v57  ;;  %v2262_v52 = vld [vmem:[%s2391_s23 + $0x108] ss:$40 sps:$4 sm:$0xff]   ;;  %v2272_v57 = vld [vmem:[%s2355_s19 + $0x238] sm:$0xff]  }
  0x40   : > { %2008 = vmatprep.subr.bf16.mxu1 %v2202_v59  ;;  %v1778_v59 = vcombine.low %v328_v50, %v328_v50 }
  0x41   : > { %1963 = vmatpush3.bf16.msra.mxu0 %v2198_v55  ;;  %v2268_v55 = vld [vmem:[%s2355_s19 + $0x230] sm:$0xff]  }
  0x42   : > { %1964 = vmatprep.subr.bf16.mxu0 %v2201_v58  ;;  %v1776_v58 = vcombine.low %v327_v49, %v327_v49 }
  0x43   : > { %2009 = vmatpush3.bf16.msra.mxu1 %v2204_v61  ;;  %v2278_v61 = vld [vmem:[%s2391_s23 + $0x114] ss:$40 sps:$4 sm:$0xff]  }
  0x44   : > { %1261 = vmatmul.mubr.bf16.gmra.mrb[8].mxu0 %v2196_v53  ;;  %2010 = vmatprep.subr.bf16.mxu1 %v2211_v2  ;;  %v1777_v53 = vcombine.high %v327_v49, %v327_v49 }
  0x45   : > { %1333 = vmatmul.mubr.bf16.gmra.mrb[8].mxu1 %v2197_v54  ;;  %1965 = vmatpush3.bf16.msra.mxu0 %v2203_v60  ;;  %v1779_v54 = vcombine.high %v328_v50, %v328_v50  ;;  %v2275_v60 = vld [vmem:[%s2391_s23 + $0x24] ss:$40 sps:$4 sm:$0xff]  }
  0x46   : > { %1268 = vmatprep.mubr.bf16.mxu0 %v2205_v62  ;;  %1340 = vmatprep.mubr.bf16.mxu1 %v2207_v63  ;;  %v329_v62 = vld [vmem:[%s2391_s23 + $0x160] sm:$0xff] }
  0x47   : > { %1966 = vmatprep.subr.bf16.mxu0 %v2212_v3  ;;  %2011 = vmatpush3.bf16.msra.mxu1 %v2213_v4  ;;  %v2273_v63 = vld [vmem:[%s2391_s23 + $0x20] ss:$40 sps:$4 sm:$0xff]   ;;  %v1781_v2 = vcombine.high %v329_v62, %v329_v62  ;;  %v2282_v3 = vld [vmem:[%s2391_s23 + $0x70] ss:$40 sps:$4 sm:$0xff]   ;;  %v1780_v4 = vcombine.low %v329_v62, %v329_v62 }
  0x48   : > { %2012 = vmatprep.subr.bf16.mxu1 %v2215_v6  ;;  %v2286_v6 = vld [vmem:[%s2391_s23 + $0xc0] ss:$40 sps:$4 sm:$0xff]  }
  0x49   : > { %1967 = vmatpush3.bf16.msra.mxu0 %v2214_v5  ;;  %v2284_v5 = vld [vmem:[%s2391_s23 + $0xc4] ss:$40 sps:$4 sm:$0xff]  }
  0x4a   : > { %1968 = vmatprep.subr.bf16.mxu0 %v2217_v8  ;;  %v2492_v8 = vld [vmem:[%s270_s26] ss:$0 sm:$0xff] }
  0x4b   : > { %2013 = vmatpush3.bf16.msra.mxu1 %v2216_v7 }
  0x4c   : > { %1269 = vmatmul.mubr.bf16.gmra.mrb[12].mxu0 %v2209_v0  ;;  %2014 = vmatprep.subr.bf16.mxu1 %v2223_v16  ;;  %v2276_v0 = vld [vmem:[%s2391_s23 + $0x110] ss:$40 sps:$4 sm:$0xff]  }
  0x4d   : > { %1341 = vmatmul.mubr.bf16.gmra.mrb[12].mxu1 %v2210_v1  ;;  %1276 = vmatprep.mubr.bf16.mxu0 %v1773_v10  ;;  %v2279_v1 = vld [vmem:[%s2391_s23 + $0x74] ss:$40 sps:$4 sm:$0xff]  }
  0x4e   : > { %1348 = vmatprep.mubr.bf16.mxu1 %v1775_v13  ;;  %1969 = vmatpush3.bf16.msra.mxu0 %v2220_v14 }
  0x4f   : > { %2015 = vmatpush3.bf16.msra.mxu1 %v2224_v17  ;;  %1970 = vmatprep.subr.bf16.mxu0 %v2225_v18 }
  0x50   : > { %2016 = vmatprep.subr.bf16.mxu1 %v2227_v20 }
  0x52   : > { %1971 = vmatpush3.bf16.msra.mxu0 %v2226_v19 }
  0x53   : > { %2017 = vmatpush3.bf16.msra.mxu1 %v2228_v21  ;;  %2048 = vmatprep.subr.bf16.mxu0 %v2235_v26 }
  0x54   : > { %1277 = vmatmul.mubr.bf16.gmra.mrb[16].mxu0 %v1772_v12  ;;  %2094 = vmatprep.subr.bf16.mxu1 %v2235_v26 }
  0x55   : > { %1349 = vmatmul.mubr.bf16.gmra.mrb[16].mxu1 %v1774_v15  ;;  %1388 = vmatprep.mubr.bf16.mxu0 %v2231_v23 }
  0x56   : > { %1460 = vmatprep.mubr.bf16.mxu1 %v2234_v25 }
  0x5c   : > { %1389 = vmatmul.mubr.bf16.vlgmr.msra.gmra.mrb[20].mxu0 %v2229_v22 }
  0x5d   : > { %1461 = vmatmul.mubr.bf16.vlgmr.msra.gmra.mrb[20].mxu1 %v2232_v24  ;;  %2049 = vmatpush3.bf16.msra.mxu0 %v2236_v27 }
  0x5e   : > { %2050 = vmatprep.subr.bf16.mxu0 %v2237_v28  ;;  %2102 = vmatpush3.bf16.msra.mxu1 %v2236_v27 }
  0x5f   : > { %1396 = vmatprep.mubr.bf16.mxu0 %v2239_v30  ;;  %2095 = vmatprep.subr.bf16.mxu1 %v2237_v28 }
  0x60   : > { %1468 = vmatprep.mubr.bf16.mxu1 %v2241_v31 }
  0x61   : > { %2051 = vmatpush3.bf16.msra.mxu0 %v2238_v29 }
  0x62   : > { %2052 = vmatprep.subr.bf16.mxu0 %v2245_v34  ;;  %2103 = vmatpush3.bf16.msra.mxu1 %v2238_v29 }
  0x63   : > { %2096 = vmatprep.subr.bf16.mxu1 %v2245_v34 }
  0x64   : > { %1397 = vmatmul.mubr.bf16.gmra.mrb[24].mxu0 %v2243_v32 }
  0x65   : > { %1469 = vmatmul.mubr.bf16.gmra.mrb[24].mxu1 %v2244_v33  ;;  %2053 = vmatpush3.bf16.msra.mxu0 %v2246_v35 }
  0x66   : > { %1404 = vmatprep.mubr.bf16.mxu0 %v2247_v36  ;;  %1476 = vmatprep.mubr.bf16.mxu1 %v2249_v37 }
  0x67   : > { %2054 = vmatprep.subr.bf16.mxu0 %v2251_v38  ;;  %2104 = vmatpush3.bf16.msra.mxu1 %v2246_v35 }
  0x68   : > { %2097 = vmatprep.subr.bf16.mxu1 %v2251_v38 }
  0x69   : > { %2055 = vmatpush3.bf16.msra.mxu0 %v2254_v41 }
  0x6a   : > { %2056 = vmatprep.subr.bf16.mxu0 %v2255_v42 }
  0x6b   : > { %2105 = vmatpush3.bf16.msra.mxu1 %v2254_v41 }
  0x6c   : > { %1405 = vmatmul.mubr.bf16.gmra.mrb[28].mxu0 %v2252_v39  ;;  %2098 = vmatprep.subr.bf16.mxu1 %v2255_v42 }
  0x6d   : > { %1477 = vmatmul.mubr.bf16.gmra.mrb[28].mxu1 %v2253_v40  ;;  %2057 = vmatpush3.bf16.msra.mxu0 %v2256_v43 }
  0x6e   : > { %1412 = vmatprep.mubr.bf16.mxu0 %v2257_v44  ;;  %1484 = vmatprep.mubr.bf16.mxu1 %v2259_v45 }
  0x6f   : > { %2106 = vmatpush3.bf16.msra.mxu1 %v2256_v43  ;;  %2058 = vmatprep.subr.bf16.mxu0 %v2263_v46 }
  0x70   : > { %2099 = vmatprep.subr.bf16.mxu1 %v2263_v46 }
  0x71   : > { %2059 = vmatpush3.bf16.msra.mxu0 %v2264_v47 }
  0x72   : > { %2060 = vmatprep.subr.bf16.mxu0 %v2265_v48 }
  0x73   : > { %2107 = vmatpush3.bf16.msra.mxu1 %v2264_v47 }
  0x74   : > { %1413 = vmatmul.mubr.bf16.gmra.mrb[32].mxu0 %v2261_v51  ;;  %2100 = vmatprep.subr.bf16.mxu1 %v2265_v48 }
  0x75   : > { %1485 = vmatmul.mubr.bf16.gmra.mrb[32].mxu1 %v2262_v52  ;;  %1420 = vmatprep.mubr.bf16.mxu0 %v1777_v53 }
  0x76   : > { %1492 = vmatprep.mubr.bf16.mxu1 %v1779_v54  ;;  %2061 = vmatpush3.bf16.msra.mxu0 %v2268_v55 }
  0x77   : > { %2108 = vmatpush3.bf16.msra.mxu1 %v2268_v55  ;;  %2062 = vmatprep.subr.bf16.mxu0 %v2271_v56 }
  0x78   : > { %2101 = vmatprep.subr.bf16.mxu1 %v2271_v56 }
  0x7a   : > { %2063 = vmatpush3.bf16.msra.mxu0 %v2272_v57 }
  0x7b   : > { %2109 = vmatpush3.bf16.msra.mxu1 %v2272_v57 }
  0x7c   : > { %1421 = vmatmul.mubr.bf16.gmra.mrb[36].mxu0 %v1776_v58 }
  0x7d   : > { %1493 = vmatmul.mubr.bf16.gmra.mrb[36].mxu1 %v1778_v59  ;;  %1532 = vmatprep.mubr.bf16.mxu0 %v2275_v60 }
  0x7e   : > { %1556 = vmatprep.mubr.bf16.mxu1 %v2278_v61 }
  0x84   : > { %1533 = vmatmul.mubr.bf16.vlgmr.msra.gmra.mrb[40].mxu0 %v2273_v63 }
  0x85   : > { %1557 = vmatmul.mubr.bf16.vlgmr.msra.gmra.mrb[40].mxu1 %v2276_v0  ;;  %1540 = vmatprep.mubr.bf16.mxu0 %v2279_v1 }
  0x86   : > { %1564 = vmatprep.mubr.bf16.mxu1 %v1781_v2 }
  0x8c   : > { %1541 = vmatmul.mubr.bf16.gmra.mrb[44].mxu0 %v2282_v3 }
  0x8d   : > { %1565 = vmatmul.mubr.bf16.gmra.mrb[44].mxu1 %v1780_v4  ;;  %1548 = vmatprep.mubr.bf16.mxu0 %v2284_v5 }
  0x94   : > { %1549 = vmatmul.mubr.bf16.gmra.mrb[48].mxu0 %v2286_v6 }
 0x107   : > { %v1880_v7 = vpop.f32.mrb[0].mxu0 }
 0x108   : > { %v1881_v9 = vpop.f32.mrb[1].mxu0  ;;  %v1926_v10 = vpop.f32.mrb[0].mxu1 }
 0x109   : > { %v1882_v11 = vadd.f32 %v1881_v9, %v1880_v7  ;;  %v1883_v12 = vpop.f32.mrb[2].mxu0  ;;  %v1927_v13 = vpop.f32.mrb[1].mxu1 }
 0x10a   : > { %v1884_v14 = vpop.f32.mrb[3].mxu0  ;;  %v1928_v15 = vadd.f32 %v1927_v13, %v1926_v10  ;;  %v1929_v16 = vpop.f32.mrb[2].mxu1 }
 0x10b   : > { %v1247_v17 = vadd.f32 %v1882_v11, %v2492_v8  ;;  %v1885_v18 = vadd.f32 %v1884_v14, %v1883_v12  ;;  %v1930_v19 = vpop.f32.mrb[3].mxu1 }
 0x10c   : > { %v1931_v20 = vadd.f32 %v1930_v19, %v1929_v16 }
 0x10d   : > { %v1250_v21 = vadd.f32 %v1885_v18, %v2492_v8  ;;  %v2496_v22 = vadd.f32 %v1928_v15, %v1247_v17 }
 0x10f   : > { %v2498_v23 = vadd.f32 %v1931_v20, %v1250_v21  ;;  %v1886_v24 = vpop.f32.mrb[4].mxu0 }
 0x110   : > { %v1887_v25 = vpop.f32.mrb[5].mxu0  ;;  %v1932_v26 = vpop.f32.mrb[4].mxu1 }
 0x111   : > { %v1888_v27 = vadd.f32 %v1887_v25, %v1886_v24  ;;  %v1889_v28 = vpop.f32.mrb[6].mxu0  ;;  %v1933_v29 = vpop.f32.mrb[5].mxu1 }
 0x112   : > { %v1890_v30 = vpop.f32.mrb[7].mxu0  ;;  %v1934_v31 = vadd.f32 %v1933_v29, %v1932_v26  ;;  %v1935_v32 = vpop.f32.mrb[6].mxu1 }
 0x113   : > { %v1255_v33 = vadd.f32 %v1888_v27, %v2492_v8  ;;  %v1891_v34 = vadd.f32 %v1890_v30, %v1889_v28  ;;  %v1936_v35 = vpop.f32.mrb[7].mxu1 }
 0x114   : > { %v1937_v36 = vadd.f32 %v1936_v35, %v1935_v32 }
 0x115   : > { %v1258_v37 = vadd.f32 %v1891_v34, %v2492_v8  ;;  %v2502_v38 = vadd.f32 %v1934_v31, %v1255_v33 }
 0x117   : > { %v2504_v39 = vadd.f32 %v1937_v36, %v1258_v37  ;;  %v1892_v40 = vpop.f32.mrb[8].mxu0 }
 0x118   : > { %v1893_v41 = vpop.f32.mrb[9].mxu0  ;;  %v1938_v42 = vpop.f32.mrb[8].mxu1 }
 0x119   : > { %v1894_v43 = vadd.f32 %v1893_v41, %v1892_v40  ;;  %v1895_v44 = vpop.f32.mrb[10].mxu0  ;;  %v1939_v45 = vpop.f32.mrb[9].mxu1 }
 0x11a   : > { %v1896_v46 = vpop.f32.mrb[11].mxu0  ;;  %v1940_v47 = vadd.f32 %v1939_v45, %v1938_v42  ;;  %v1941_v48 = vpop.f32.mrb[10].mxu1 }
 0x11b   : > { %v1263_v49 = vadd.f32 %v1894_v43, %v2492_v8  ;;  %v1897_v50 = vadd.f32 %v1896_v46, %v1895_v44  ;;  %v1942_v51 = vpop.f32.mrb[11].mxu1 }
 0x11c   : > { %v1943_v52 = vadd.f32 %v1942_v51, %v1941_v48 }
 0x11d   : > { %v1266_v53 = vadd.f32 %v1897_v50, %v2492_v8  ;;  %v2508_v54 = vadd.f32 %v1940_v47, %v1263_v49 }
 0x11f   : > { %v2510_v55 = vadd.f32 %v1943_v52, %v1266_v53  ;;  %v1898_v56 = vpop.f32.mrb[12].mxu0 }
 0x120   : > { %v1944_v57 = vpop.f32.mrb[12].mxu1  ;;  %v1899_v58 = vpop.f32.mrb[13].mxu0 }
 0x121   : > { %v1945_v59 = vpop.f32.mrb[13].mxu1  ;;  %v1900_v60 = vadd.f32 %v1899_v58, %v1898_v56  ;;  %v1901_v61 = vpop.f32.mrb[14].mxu0 }
 0x122   : > { %v1946_v62 = vadd.f32 %v1945_v59, %v1944_v57  ;;  %v1947_v63 = vpop.f32.mrb[14].mxu1  ;;  %v1902_v0 = vpop.f32.mrb[15].mxu0 }
 0x123   : > { %v1948_v1 = vpop.f32.mrb[15].mxu1  ;;  %v1271_v2 = vadd.f32 %v1900_v60, %v2492_v8  ;;  %v1903_v3 = vadd.f32 %v1902_v0, %v1901_v61 }
 0x124   : > { %v1949_v4 = vadd.f32 %v1948_v1, %v1947_v63 }
 0x125   : > { %v1274_v5 = vadd.f32 %v1903_v3, %v2492_v8  ;;  %v2514_v6 = vadd.f32 %v1946_v62, %v1271_v2 }
 0x127   : > { %v2516_v7 = vadd.f32 %v1949_v4, %v1274_v5  ;;  %v1904_v9 = vpop.f32.mrb[16].mxu0 }
 0x128   : > { %v1950_v10 = vpop.f32.mrb[16].mxu1  ;;  %v1905_v11 = vpop.f32.mrb[17].mxu0 }
 0x129   : > { %v1951_v12 = vpop.f32.mrb[17].mxu1  ;;  %v1906_v13 = vadd.f32 %v1905_v11, %v1904_v9  ;;  %v1907_v14 = vpop.f32.mrb[18].mxu0 }
 0x12a   : > { %v1952_v15 = vadd.f32 %v1951_v12, %v1950_v10  ;;  %v1953_v16 = vpop.f32.mrb[18].mxu1  ;;  %v1908_v17 = vpop.f32.mrb[19].mxu0 }
 0x12b   : > { %v1954_v18 = vpop.f32.mrb[19].mxu1  ;;  %v1279_v19 = vadd.f32 %v1906_v13, %v2492_v8 }
 0x12d   : > { %v2519_v20 = vadd.f32 %v1952_v15, %v1279_v19 }
 0x12f   : > { %v1972_v21 = vpop.f32.mrb[20].mxu0 }
 0x130   : > { %v1973_v24 = vpop.f32.mrb[21].mxu0  ;;  %v2018_v25 = vpop.f32.mrb[20].mxu1 }
 0x131   : > { %v1974_v26 = vadd.f32 %v1973_v24, %v1972_v21  ;;  %v1975_v27 = vpop.f32.mrb[22].mxu0  ;;  %v2019_v28 = vpop.f32.mrb[21].mxu1 }
 0x132   : > { %v1976_v29 = vpop.f32.mrb[23].mxu0  ;;  %v2020_v30 = vadd.f32 %v2019_v28, %v2018_v25  ;;  %v2021_v31 = vpop.f32.mrb[22].mxu1 }
 0x133   : > { %v1391_v32 = vadd.f32 %v1974_v26, %v2496_v22  ;;  %v1977_v33 = vadd.f32 %v1976_v29, %v1975_v27  ;;  %v2022_v34 = vpop.f32.mrb[23].mxu1 }
 0x134   : > { %v2023_v35 = vadd.f32 %v2022_v34, %v2021_v31 }
 0x135   : > { %v1394_v36 = vadd.f32 %v1977_v33, %v2498_v23  ;;  %v2523_v37 = vadd.f32 %v2020_v30, %v1391_v32 }
 0x137   : > { %v2525_v8 = vadd.f32 %v2023_v35, %v1394_v36  ;;  %v1978_v40 = vpop.f32.mrb[24].mxu0 }
 0x138   : > { %v1979_v41 = vpop.f32.mrb[25].mxu0  ;;  %v2024_v42 = vpop.f32.mrb[24].mxu1 }
 0x139   : > { %v1980_v43 = vadd.f32 %v1979_v41, %v1978_v40  ;;  %v1981_v44 = vpop.f32.mrb[26].mxu0  ;;  %v2025_v45 = vpop.f32.mrb[25].mxu1 }
 0x13a   : > { %v1982_v46 = vpop.f32.mrb[27].mxu0  ;;  %v2026_v47 = vadd.f32 %v2025_v45, %v2024_v42  ;;  %v2027_v48 = vpop.f32.mrb[26].mxu1 }
 0x13b   : > { %v1399_v22 = vadd.f32 %v1980_v43, %v2502_v38  ;;  %v1983_v49 = vadd.f32 %v1982_v46, %v1981_v44  ;;  %v2028_v50 = vpop.f32.mrb[27].mxu1 }
 0x13c   : > { %v2029_v51 = vadd.f32 %v2028_v50, %v2027_v48 }
 0x13d   : > { %v1402_v23 = vadd.f32 %v1983_v49, %v2504_v39  ;;  %v2529_v52 = vadd.f32 %v2026_v47, %v1399_v22 }
 0x13f   : > { %v2531_v53 = vadd.f32 %v2029_v51, %v1402_v23  ;;  %v1984_v56 = vpop.f32.mrb[28].mxu0 }
 0x140   : > { %v1985_v57 = vpop.f32.mrb[29].mxu0  ;;  %v2030_v58 = vpop.f32.mrb[28].mxu1 }
 0x141   : > { %v1986_v59 = vadd.f32 %v1985_v57, %v1984_v56  ;;  %v1987_v60 = vpop.f32.mrb[30].mxu0  ;;  %v2031_v61 = vpop.f32.mrb[29].mxu1 }
 0x142   : > { %v1988_v62 = vpop.f32.mrb[31].mxu0  ;;  %v2032_v63 = vadd.f32 %v2031_v61, %v2030_v58  ;;  %v2033_v0 = vpop.f32.mrb[30].mxu1 }
 0x143   : > { %v1407_v38 = vadd.f32 %v1986_v59, %v2508_v54  ;;  %v1989_v1 = vadd.f32 %v1988_v62, %v1987_v60  ;;  %v2034_v2 = vpop.f32.mrb[31].mxu1 }
 0x144   : > { %v2035_v3 = vadd.f32 %v2034_v2, %v2033_v0 }
 0x145   : > { %v1410_v39 = vadd.f32 %v1989_v1, %v2510_v55  ;;  %v2535_v4 = vadd.f32 %v2032_v63, %v1407_v38 }
 0x147   : > { %v2537_v5 = vadd.f32 %v2035_v3, %v1410_v39  ;;  %v1990_v9 = vpop.f32.mrb[32].mxu0 }
 0x148   : > { %v1991_v10 = vpop.f32.mrb[33].mxu0  ;;  %v2036_v11 = vpop.f32.mrb[32].mxu1 }
 0x149   : > { %v1992_v12 = vadd.f32 %v1991_v10, %v1990_v9  ;;  %v1993_v13 = vpop.f32.mrb[34].mxu0  ;;  %v2037_v14 = vpop.f32.mrb[33].mxu1 }
 0x14a   : > { %v1994_v15 = vpop.f32.mrb[35].mxu0  ;;  %v2038_v16 = vadd.f32 %v2037_v14, %v2036_v11  ;;  %v2039_v17 = vpop.f32.mrb[34].mxu1 }
 0x14b   : > { %v1415_v54 = vadd.f32 %v1992_v12, %v2514_v6  ;;  %v1995_v18 = vadd.f32 %v1994_v15, %v1993_v13  ;;  %v2040_v19 = vpop.f32.mrb[35].mxu1 }
 0x14c   : > { %v2041_v21 = vadd.f32 %v2040_v19, %v2039_v17 }
 0x14d   : > { %v1418_v55 = vadd.f32 %v1995_v18, %v2516_v7  ;;  %v1487_v24 = vadd.f32 %v2038_v16, %v1415_v54 }
 0x14f   : > { %v1490_v25 = vadd.f32 %v2041_v21, %v1418_v55  ;;  %v1996_v26 = vpop.f32.mrb[36].mxu0 }
 0x150   : > { %v1997_v27 = vpop.f32.mrb[37].mxu0  ;;  %v2042_v28 = vpop.f32.mrb[36].mxu1 }
 0x151   : > { %v1998_v29 = vadd.f32 %v1997_v27, %v1996_v26  ;;  %v1999_v30 = vpop.f32.mrb[38].mxu0  ;;  %v2043_v31 = vpop.f32.mrb[37].mxu1 }
 0x152   : > { %v2000_v32 = vpop.f32.mrb[39].mxu0  ;;  %v2044_v33 = vadd.f32 %v2043_v31, %v2042_v28  ;;  %v2045_v34 = vpop.f32.mrb[38].mxu1 }
 0x153   : > { %v1423_v35 = vadd.f32 %v1998_v29, %v2519_v20  ;;  %v2046_v6 = vpop.f32.mrb[39].mxu1 }
 0x155   : > { %v1495_v36 = vadd.f32 %v2044_v33, %v1423_v35 }
 0x157   : > { %v2064_v40 = vpop.f32.mrb[40].mxu0 }
 0x158   : > { %v2082_v41 = vpop.f32.mrb[40].mxu1  ;;  %v2065_v7 = vpop.f32.mrb[41].mxu0 }
 0x159   : > { %v2066_v42 = vadd.f32 %v2065_v7, %v2064_v40  ;;  %v2083_v43 = vpop.f32.mrb[41].mxu1  ;;  %v2067_v44 = vpop.f32.mrb[42].mxu0 }
 0x15a   : > { %v2084_v45 = vadd.f32 %v2083_v43, %v2082_v41  ;;  %v2085_v46 = vpop.f32.mrb[42].mxu1  ;;  %v2068_v47 = vpop.f32.mrb[43].mxu0 }
 0x15b   : > { %v1535_v48 = vadd.f32 %v2066_v42, %v2523_v37  ;;  %v2069_v22 = vadd.f32 %v2068_v47, %v2067_v44  ;;  %v2086_v49 = vpop.f32.mrb[43].mxu1 }
 0x15c   : > { %v1559_v20 = vadd.f32 %v2084_v45, %v1487_v24  ;;  %v2087_v50 = vadd.f32 %v2086_v49, %v2085_v46 }
 0x15d   : > { %v1572_v51 = vmax.f32 %v1535_v48, 0.0  ;;  %v1538_v23 = vadd.f32 %v2069_v22, %v2525_v8 }
 0x15e   : > { %v1578_v56 = vmax.f32 %v1559_v20, 0.0  ;;  %v1562_v57 = vadd.f32 %v2087_v50, %v1490_v25 }
 0x15f   : > { %1581 = vst [vmem:[%s2547_s30] sm:$0xff] %v1572_v51  ;;  %v1573_v37 = vmax.f32 %v1538_v23, 0.0  ;;  %v2070_v58 = vpop.f32.mrb[44].mxu0 }
 0x160   : > { %1587 = vst [vmem:[%s2547_s30 + $0x30] sm:$0xff] %v1578_v56  ;;  %v1579_v59 = vmax.f32 %v1562_v57, 0.0  ;;  %v2088_v60 = vpop.f32.mrb[44].mxu1  ;;  %v2071_v61 = vpop.f32.mrb[45].mxu0 }
 0x161   : > { %1582 = vst [vmem:[%s2547_s30 + $0x8] sm:$0xff] %v1573_v37  ;;  %v2072_v62 = vadd.f32 %v2071_v61, %v2070_v58  ;;  %v2089_v63 = vpop.f32.mrb[45].mxu1  ;;  %v2073_v0 = vpop.f32.mrb[46].mxu0 }
 0x162   : > { %1588 = vst [vmem:[%s2547_s30 + $0x38] sm:$0xff] %v1579_v59  ;;  %v2090_v38 = vadd.f32 %v2089_v63, %v2088_v60  ;;  %v2074_v1 = vpop.f32.mrb[47].mxu0  ;;  %v2091_v8 = vpop.f32.mrb[46].mxu1 }
 0x163   : > { %v1543_v2 = vadd.f32 %v2072_v62, %v2529_v52  ;;  %v2075_v3 = vadd.f32 %v2074_v1, %v2073_v0  ;;  %v2092_v39 = vpop.f32.mrb[47].mxu1 }
 0x164   : > { %v1567_v9 = vadd.f32 %v2090_v38, %v1495_v36 }
 0x165   : > { %v1574_v10 = vmax.f32 %v1543_v2, 0.0  ;;  %v1546_v11 = vadd.f32 %v2075_v3, %v2531_v53 }
 0x166   : > { %v1580_v12 = vmax.f32 %v1567_v9, 0.0 }
 0x167   : > { %1583 = vst [vmem:[%s2547_s30 + $0x10] sm:$0xff] %v1574_v10  ;;  %v1575_v13 = vmax.f32 %v1546_v11, 0.0  ;;  %v2076_v14 = vpop.f32.mrb[48].mxu0 }
 0x168   : > { %1589 = vst [vmem:[%s2547_s30 + $0x40] sm:$0xff] %v1580_v12  ;;  %v2077_v15 = vpop.f32.mrb[49].mxu0 }
 0x169   : > { %1584 = vst [vmem:[%s2547_s30 + $0x18] sm:$0xff] %v1575_v13  ;;  %v2078_v16 = vadd.f32 %v2077_v15, %v2076_v14  ;;  %v2079_v17 = vpop.f32.mrb[50].mxu0 }
 0x16a   : > { %v2080_v54 = vpop.f32.mrb[51].mxu0 }
 0x16b   : > { %v1551_v52 = vadd.f32 %v2078_v16, %v2535_v4  ;;  %v2081_v18 = vadd.f32 %v2080_v54, %v2079_v17 }
 0x16d   : > { %v1576_v19 = vmax.f32 %v1551_v52, 0.0  ;;  %v1554_v21 = vadd.f32 %v2081_v18, %v2537_v5 }
 0x16f   : > { %1585 = vst [vmem:[%s2547_s30 + $0x20] sm:$0xff] %v1576_v19  ;;  %v1577_v55 = vmax.f32 %v1554_v21, 0.0 }
 0x171   : > { %1586 = vst [vmem:[%s2547_s30 + $0x28] sm:$0xff] %v1577_v55 }
 0x172 PF: > { %s13_s14 = sadd.s32 1, %s2309_s14   ;;  %s2576_s12 = smov %s2305_s13 }
 0x173   : > { %p10_p5 = scmp.ge.s32.totalorder %s13_s14, 4   ;;  %s2577_s13 = smov %s2579_s15 }
 0x175   :  { %12 = sbr.rel (!%p10_p5) target bundleno = 2 (0x2), region = 68 }

// kernel: itracker_image_model.8
= control target key start
LH: loop header
LB: loop body
LE: loop exit
PB: predicated region body
PF: predicated region fallthrough
CT: control target
= control target key end

     0   :  { %v50_v0 = vlaneseq  ;;  %v817_v1 = vmov 0.0|0.0   ;;  %v818_v36 = vmov 1.0|1.0   ;;  %s1034_s0 = inlined_call_operand.vmem [shape: f32[9,8,256], index: 0, kind: input, shape index: {}]   ;;  %s1035_s1 = inlined_call_operand.vmem [shape: bf16[8,256], index: 1, kind: output, shape index: {}]  }
   0x1   :  { %752 = vmatprep.subr.bf16.mxu0 %v817_v1 }
   0x2   :  { %v833_v2 = vshrl.u32 %v50_v0, 7  ;;  %v835_v3 = vand.u32 127, %v50_v0 }
   0x4   :  { %v52_v4 = vadd.s32 8, %v833_v2  ;;  %v86_v5 = vsub.s32 %v833_v2, %v835_v3  ;;  %v53_v6 = vadd.s32 16, %v833_v2  ;;  %v54_v7 = vadd.s32 24, %v833_v2 }
   0x5   :  { %v55_v8 = vadd.s32 32, %v833_v2  ;;  %v56_v9 = vadd.s32 40, %v833_v2  ;;  %v57_v10 = vadd.s32 48, %v833_v2  ;;  %v58_v11 = vadd.s32 56, %v833_v2 }
   0x6   :  { %v88_v12 = vsub.s32 %v52_v4, %v835_v3  ;;  %v151_v13 = vsub.s32 0, %v86_v5  ;;  %v90_v14 = vsub.s32 %v53_v6, %v835_v3  ;;  %v92_v15 = vsub.s32 %v54_v7, %v835_v3 }
   0x7   :  { %v94_v16 = vsub.s32 %v55_v8, %v835_v3  ;;  %v96_v17 = vsub.s32 %v56_v9, %v835_v3  ;;  %v98_v18 = vsub.s32 %v57_v10, %v835_v3  ;;  %v100_v19 = vsub.s32 %v58_v11, %v835_v3 }
   0x8   :  { %v650_v20 = vmin.u32 %v151_v13, %v86_v5  ;;  %v157_v21 = vsub.s32 0, %v88_v12  ;;  %v163_v22 = vsub.s32 0, %v90_v14  ;;  %v169_v23 = vsub.s32 0, %v92_v15 }
   0x9   :  { %v175_v24 = vsub.s32 0, %v94_v16  ;;  %v181_v25 = vsub.s32 0, %v96_v17  ;;  %v187_v26 = vsub.s32 0, %v98_v18  ;;  %v193_v27 = vsub.s32 0, %v100_v19 }
   0xa   :  { %v651_v28 = vmin.u32 %v157_v21, %v88_v12  ;;  %vm342_vm0 = vcmp.le.s32.totalorder %v650_v20, 2  ;;  %v652_v29 = vmin.u32 %v163_v22, %v90_v14  ;;  %v653_v30 = vmin.u32 %v169_v23, %v92_v15 }
   0xb   :  { %v654_v31 = vmin.u32 %v175_v24, %v94_v16  ;;  %v655_v32 = vmin.u32 %v181_v25, %v96_v17  ;;  %v59_v33 = vadd.s32 64, %v833_v2  ;;  %v656_v34 = vmin.u32 %v187_v26, %v98_v18 }
   0xc   :  { %vm344_vm1 = vcmp.le.s32.totalorder %v651_v28, 2  ;;  %vm346_vm2 = vcmp.le.s32.totalorder %v652_v29, 2  ;;  %vm348_vm3 = vcmp.le.s32.totalorder %v653_v30, 2  ;;  %v657_v35 = vmin.u32 %v193_v27, %v100_v19 }
   0xd   :  { %vm753_vm4 = vmpackc.low %vm344_vm1, %vm342_vm0  ;;  %v60_v37 = vadd.s32 72, %v833_v2  ;;  %v102_v38 = vsub.s32 %v59_v33, %v835_v3  ;;  %v61_v39 = vadd.s32 80, %v833_v2  ;;  %v62_v40 = vadd.s32 88, %v833_v2 }
   0xe   :  { %754 = vmatpush1.bf16.msk.msra.mxu0 %vm753_vm4, %v818_v36  ;;  %vm756_vm5 = vmpackc.low %vm348_vm3, %vm346_vm2  ;;  %vm350_vm6 = vcmp.le.s32.totalorder %v654_v31, 2  ;;  %vm352_vm7 = vcmp.le.s32.totalorder %v655_v32, 2  ;;  %v63_v41 = vadd.s32 96, %v833_v2  ;;  %v64_v42 = vadd.s32 104, %v833_v2 }
   0xf   :  { %755 = vmatprep.subr.bf16.mxu0 %v817_v1  ;;  %v104_v43 = vsub.s32 %v60_v37, %v835_v3  ;;  %v199_v44 = vsub.s32 0, %v102_v38  ;;  %v106_v45 = vsub.s32 %v61_v39, %v835_v3  ;;  %v108_v46 = vsub.s32 %v62_v40, %v835_v3  ;;  %vm759_vm8 = vmpackc.low %vm352_vm7, %vm350_vm6 }
  0x10   :  { %v110_v47 = vsub.s32 %v63_v41, %v835_v3  ;;  %v112_v50 = vsub.s32 %v64_v42, %v835_v3  ;;  %v65_v51 = vadd.s32 112, %v833_v2  ;;  %v66_v54 = vadd.s32 120, %v833_v2  ;;  %v9_v42 = vld [vmem:[%s1034_s0 + $0x8] sm:$0xff] }
  0x11   :  { %v658_v48 = vmin.u32 %v199_v44, %v102_v38  ;;  %v205_v49 = vsub.s32 0, %v104_v43  ;;  %v211_v52 = vsub.s32 0, %v106_v45  ;;  %v217_v53 = vsub.s32 0, %v108_v46 }
  0x12   :  { %757 = vmatpush1.bf16.msk.msra.mxu0 %vm756_vm5, %v818_v36  ;;  %vm354_vm9 = vcmp.le.s32.totalorder %v656_v34, 2  ;;  %vm356_vm10 = vcmp.le.s32.totalorder %v657_v35, 2  ;;  %v873_v56 = vadd.s32 128, %v835_v3  ;;  %v223_v57 = vsub.s32 0, %v110_v47 }
  0x13   :  { %758 = vmatprep.subr.bf16.mxu0 %v817_v1  ;;  %v659_v55 = vmin.u32 %v205_v49, %v104_v43  ;;  %vm358_vm11 = vcmp.le.s32.totalorder %v658_v48, 2  ;;  %v229_v58 = vsub.s32 0, %v112_v50  ;;  %v114_v59 = vsub.s32 %v65_v51, %v835_v3  ;;  %vm762_vm12 = vmpackc.low %vm356_vm10, %vm354_vm9  ;;  %v635_v43 = vld [vmem:[%s1034_s0 + $0x18] sm:$0xff] }
  0x14   :  { %v660_v60 = vmin.u32 %v211_v52, %v106_v45  ;;  %v661_v61 = vmin.u32 %v217_v53, %v108_v46  ;;  %v116_v62 = vsub.s32 %v66_v54, %v835_v3  ;;  %v880_v63 = vadd.s32 128, %v833_v2  ;;  %v637_v53 = vld [vmem:[%s1034_s0 + $0x28] sm:$0xff] }
  0x15   :  { %vm360_vm13 = vcmp.le.s32.totalorder %v659_v55, 2  ;;  %v68_v0 = vadd.s32 136, %v833_v2  ;;  %v69_v4 = vadd.s32 144, %v833_v2  ;;  %v70_v5 = vadd.s32 152, %v833_v2 }
  0x16   :  { %760 = vmatpush1.bf16.msk.msra.mxu0 %vm759_vm8, %v818_v36  ;;  %v117_v6 = vsub.s32 %v66_v54, %v873_v56  ;;  %v119_v7 = vsub.s32 %v880_v63, %v873_v56  ;;  %v662_v8 = vmin.u32 %v223_v57, %v110_v47  ;;  %vm765_vm14 = vmpackc.low %vm360_vm13, %vm358_vm11  ;;  %vm362_vm15 = vcmp.le.s32.totalorder %v660_v60, 2 }
  0x17   :  { %761 = vmatprep.subr.bf16.mxu0 %v817_v1  ;;  %v121_v9 = vsub.s32 %v68_v0, %v873_v56  ;;  %v663_v10 = vmin.u32 %v229_v58, %v112_v50  ;;  %v235_v11 = vsub.s32 0, %v114_v59  ;;  %v241_v12 = vsub.s32 0, %v116_v62  ;;  %v8_v58 = vld [vmem:[%s1034_s0] sm:$0xff] }
  0x18   :  { %vm364_vm0 = vcmp.le.s32.totalorder %v661_v61, 2  ;;  %v123_v13 = vsub.s32 %v69_v4, %v873_v56  ;;  %v125_v14 = vsub.s32 %v70_v5, %v873_v56  ;;  %v71_v15 = vadd.s32 160, %v833_v2 }
  0x19   :  { %v244_v16 = vsub.s32 0, %v117_v6  ;;  %v250_v17 = vsub.s32 0, %v119_v7  ;;  %v256_v18 = vsub.s32 0, %v121_v9  ;;  %v72_v19 = vadd.s32 168, %v833_v2  ;;  %vm768_vm1 = vmpackc.low %vm364_vm0, %vm362_vm15 }
  0x1a   :  { %763 = vmatpush1.bf16.msk.msra.mxu0 %vm762_vm12, %v818_v36  ;;  %v73_v20 = vadd.s32 176, %v833_v2  ;;  %vm366_vm2 = vcmp.le.s32.totalorder %v662_v8, 2  ;;  %v664_v21 = vmin.u32 %v235_v11, %v114_v59  ;;  %v665_v22 = vmin.u32 %v241_v12, %v116_v62  ;;  %v634_v59 = vld [vmem:[%s1034_s0 + $0x10] sm:$0xff]  ;;  %v639_v62 = vld [vmem:[%s1034_s0 + $0x38] sm:$0xff]  ;;  %v641_v11 = vld [vmem:[%s1034_s0 + $0x48] sm:$0xff] }
  0x1b   :  { %764 = vmatprep.subr.bf16.mxu0 %v817_v1  ;;  %v74_v23 = vadd.s32 184, %v833_v2  ;;  %vm368_vm3 = vcmp.le.s32.totalorder %v663_v10, 2  ;;  %v262_v24 = vsub.s32 0, %v123_v13  ;;  %v268_v25 = vsub.s32 0, %v125_v14 }
  0x1c   :  { %v127_v26 = vsub.s32 %v71_v15, %v873_v56  ;;  %vm373_vm4 = vcmp.le.s32.totalorder %v244_v16, 2  ;;  %v666_v27 = vmin.u32 %v250_v17, %v119_v7  ;;  %v667_v28 = vmin.u32 %v256_v18, %v121_v9  ;;  %vm908_vm5 = vmpackc.low %vm368_vm3, %vm366_vm2  ;;  %v636_v7 = vld [vmem:[%s1034_s0 + $0x20] sm:$0xff]  ;;  %v643_v15 = vld [vmem:[%s1034_s0 + $0x58] sm:$0xff] }
  0x1d   :  { %v129_v29 = vsub.s32 %v72_v19, %v873_v56  ;;  %v819_v30 = vmov 1.0   ;;  %v820_v31 = vmov 0.0   ;;  %v131_v33 = vsub.s32 %v73_v20, %v873_v56  ;;  %v638_v17 = vld [vmem:[%s1034_s0 + $0x30] sm:$0xff] }
  0x1e   :  { %766 = vmatpush1.bf16.msk.msra.mxu0 %vm765_vm14, %v818_v36  ;;  %v773_v32 = vpack.c.bf16 %v819_v30, %v820_v31  ;;  %vm370_vm6 = vcmp.le.s32.totalorder %v664_v21, 2  ;;  %vm372_vm7 = vcmp.le.s32.totalorder %v665_v22, 2  ;;  %v118_v35 = vsub.s32 %v880_v63, %v835_v3 }
  0x1f   :  { %767 = vmatprep.subr.bf16.mxu0 %v817_v1  ;;  %v133_v37 = vsub.s32 %v74_v23, %v873_v56  ;;  %vm821_vm8 = vmmov 1   ;;  %v668_v38 = vmin.u32 %v262_v24, %v123_v13  ;;  %v669_v39 = vmin.u32 %v268_v25, %v125_v14  ;;  %vm930_vm12 = vmpackc.low %vm372_vm7, %vm370_vm6  ;;  %v645_v25 = vld [vmem:[%s1034_s0 + $0x68] sm:$0xff] }
  0x20   :  { %vm774_vm9 = vmpackc.low %vm373_vm4, %vm821_vm8  ;;  %v274_v40 = vsub.s32 0, %v127_v26  ;;  %v75_v41 = vadd.s32 192, %v833_v2  ;;  %vm375_vm10 = vcmp.le.s32.totalorder %v666_v27, 2  ;;  %vm377_vm11 = vcmp.le.s32.totalorder %v667_v28, 2 }
  0x21   :  { %v280_v3 = vsub.s32 0, %v129_v29  ;;  %v76_v44 = vadd.s32 200, %v833_v2  ;;  %v286_v45 = vsub.s32 0, %v131_v33  ;;  %v292_v47 = vsub.s32 0, %v133_v37  ;;  %vm778_vm13 = vmpackc.low %vm377_vm11, %vm375_vm10 }
  0x22   :  { %769 = vmatpush1.bf16.msk.msra.mxu0 %vm768_vm1, %v818_v36  ;;  %v77_v48 = vadd.s32 208, %v833_v2  ;;  %v78_v49 = vadd.s32 216, %v833_v2  ;;  %v14_v50 = vmax.f32 %v9_v42, %v635_v43  ;;  %vm936_vm14 = vcmp.le.s32.totalorder %v118_v35, 2  ;;  %v642_v42 = vld [vmem:[%s1034_s0 + $0x50] sm:$0xff] }
  0x23   :  { %770 = vmatprep.subr.bf16.mxu0 %v817_v1  ;;  %vm379_vm15 = vcmp.le.s32.totalorder %v668_v38, 2  ;;  %v135_v52 = vsub.s32 %v75_v41, %v873_v56  ;;  %vm381_vm0 = vcmp.le.s32.totalorder %v669_v39, 2  ;;  %v670_v54 = vmin.u32 %v274_v40, %v127_v26  ;;  %vm961_vm1 = vmpackc.low %vm821_vm8, %vm936_vm14  ;;  %v649_v38 = vld [vmem:[%s1034_s0 + $0x88] sm:$0xff] }
  0x24   :  { %v671_v55 = vmin.u32 %v280_v3, %v129_v29  ;;  %v137_v57 = vsub.s32 %v76_v44, %v873_v56  ;;  %v780_v60 = vpack.c.bf16 %v820_v31, %v819_v30  ;;  %v672_v61 = vmin.u32 %v286_v45, %v131_v33  ;;  %vm783_vm2 = vmpackc.low %vm381_vm0, %vm379_vm15  ;;  %v647_v30 = vld [vmem:[%s1034_s0 + $0x78] sm:$0xff]  ;;  %v640_v31 = vld [vmem:[%s1034_s0 + $0x40] sm:$0xff] }
  0x25   :  { %v673_v0 = vmin.u32 %v292_v47, %v133_v37  ;;  %v139_v4 = vsub.s32 %v77_v48, %v873_v56  ;;  %v141_v5 = vsub.s32 %v78_v49, %v873_v56  ;;  %v19_v6 = vmax.f32 %v14_v50, %v637_v53  ;;  %v644_v48 = vld [vmem:[%s1034_s0 + $0x60] sm:$0xff] }
  0x26   :  { %772 = vmatpush1.bf16.msk.msra.mxu0 %vm908_vm5, %v818_v36  ;;  %v298_v8 = vsub.s32 0, %v135_v52  ;;  %v79_v9 = vadd.s32 224, %v833_v2  ;;  %v80_v10 = vadd.s32 232, %v833_v2  ;;  %v13_v12 = vmax.f32 %v8_v58, %v634_v59 }
  0x27   :  { %775 = vmatprep.subr.msk.bf16.mxu0 %vm774_vm9, %v773_v32  ;;  %vm383_vm3 = vcmp.le.s32.totalorder %v670_v54, 2  ;;  %vm385_vm4 = vcmp.le.s32.totalorder %v671_v55, 2  ;;  %v304_v13 = vsub.s32 0, %v137_v57  ;;  %v24_v14 = vmax.f32 %v19_v6, %v639_v62  ;;  %v648_v54 = vld [vmem:[%s1034_s0 + $0x80] sm:$0xff] }
  0x28   :  { %vm387_vm5 = vcmp.le.s32.totalorder %v672_v61, 2  ;;  %v18_v16 = vmax.f32 %v13_v12, %v636_v7  ;;  %vm389_vm6 = vcmp.le.s32.totalorder %v673_v0, 2  ;;  %v310_v18 = vsub.s32 0, %v139_v4  ;;  %vm786_vm7 = vmpackc.low %vm385_vm4, %vm383_vm3 }
  0x29   :  { %v316_v19 = vsub.s32 0, %v141_v5  ;;  %v29_v20 = vmax.f32 %v24_v14, %v641_v11  ;;  %v674_v21 = vmin.u32 %v298_v8, %v135_v52  ;;  %v143_v22 = vsub.s32 %v79_v9, %v873_v56  ;;  %vm789_vm8 = vmpackc.low %vm389_vm6, %vm387_vm5  ;;  %v646_v52 = vld [vmem:[%s1034_s0 + $0x70] sm:$0xff] }
  0x2a   :  { %777 = vmatpush1.bf16.msk.msra.mxu0 %vm930_vm12, %v818_v36  ;;  %v145_v23 = vsub.s32 %v80_v10, %v873_v56  ;;  %v81_v24 = vadd.s32 240, %v833_v2  ;;  %v675_v26 = vmin.u32 %v304_v13, %v137_v57  ;;  %v82_v27 = vadd.s32 248, %v833_v2 }
  0x2b   :  { %779 = vmatprep.subr.msk.bf16.mxu0 %vm778_vm13, %v818_v36  ;;  %v34_v28 = vmax.f32 %v29_v20, %v643_v15  ;;  %v23_v29 = vmax.f32 %v18_v16, %v638_v17  ;;  %v676_v32 = vmin.u32 %v310_v18, %v139_v4  ;;  %v677_v33 = vmin.u32 %v316_v19, %v141_v5 }
  0x2c   :  { %vm391_vm9 = vcmp.le.s32.totalorder %v674_v21, 2  ;;  %v322_v2 = vsub.s32 0, %v143_v22  ;;  %v328_v35 = vsub.s32 0, %v145_v23  ;;  %v147_v37 = vsub.s32 %v81_v24, %v873_v56 }
  0x2d   :  { %v39_v34 = vmax.f32 %v34_v28, %v645_v25  ;;  %vm393_vm10 = vcmp.le.s32.totalorder %v675_v26, 2  ;;  %v149_v39 = vsub.s32 %v82_v27, %v873_v56  ;;  %v28_v41 = vmax.f32 %v23_v29, %v640_v31 }
  0x2e   :  { %782 = vmatpush1.bf16.msk.msra.mxu0 %vm961_vm1, %v780_v60  ;;  %vm792_vm11 = vmpackc.low %vm393_vm10, %vm391_vm9  ;;  %vm395_vm12 = vcmp.le.s32.totalorder %v676_v32, 2  ;;  %vm397_vm13 = vcmp.le.s32.totalorder %v677_v33, 2  ;;  %v678_v3 = vmin.u32 %v322_v2, %v143_v22  ;;  %v679_v44 = vmin.u32 %v328_v35, %v145_v23 }
  0x2f   :  { %784 = vmatprep.subr.msk.bf16.mxu0 %vm783_vm2, %v818_v36  ;;  %v44_v40 = vmax.f32 %v39_v34, %v647_v30  ;;  %v334_v45 = vsub.s32 0, %v147_v37  ;;  %v340_v46 = vsub.s32 0, %v149_v39  ;;  %v33_v56 = vmax.f32 %v28_v41, %v642_v42  ;;  %vm795_vm14 = vmpackc.low %vm397_vm13, %vm395_vm12 }
  0x30   :  { %vm399_vm15 = vcmp.le.s32.totalorder %v678_v3, 2  ;;  %vm401_vm0 = vcmp.le.s32.totalorder %v679_v44, 2 }
  0x31   :  { %v49_v43 = vmax.f32 %v44_v40, %v649_v38  ;;  %v680_v49 = vmin.u32 %v334_v45, %v147_v37  ;;  %v681_v50 = vmin.u32 %v340_v46, %v149_v39  ;;  %v38_v51 = vmax.f32 %v33_v56, %v644_v48  ;;  %vm798_vm1 = vmpackc.low %vm401_vm0, %vm399_vm15 }
  0x32   :  { %785 = vmatpush1.bf16.msra.mxu0 %v817_v1 }
  0x33   :  { %787 = vmatprep.subr.msk.bf16.mxu0 %vm786_vm7, %v818_v36  ;;  %v535_v47 = vmul.f32 %v49_v43, %v49_v43  ;;  %vm403_vm2 = vcmp.le.s32.totalorder %v680_v49, 2  ;;  %vm405_vm3 = vcmp.le.s32.totalorder %v681_v50, 2  ;;  %v43_v53 = vmax.f32 %v38_v51, %v646_v52 }
  0x34   :  { %vm801_vm4 = vmpackc.low %vm405_vm3, %vm403_vm2 }
  0x35   :  { %600 = vmatprep.mubr.f32.mxu0 %v535_v47  ;;  %v48_v55 = vmax.f32 %v43_v53, %v648_v54 }
  0x36   :  { %788 = vmatpush1.bf16.msra.mxu0 %v817_v1 }
  0x37   :  { %790 = vmatprep.subr.msk.bf16.mxu0 %vm789_vm8, %v818_v36  ;;  %v534_v57 = vmul.f32 %v48_v55, %v48_v55 }
  0x3a   :  { %791 = vmatpush1.bf16.msra.mxu0 %v817_v1 }
  0x3b   :  { %793 = vmatprep.subr.msk.bf16.mxu0 %vm792_vm11, %v818_v36 }
  0x3e   :  { %794 = vmatpush1.bf16.msra.mxu0 %v817_v1 }
  0x3f   :  { %796 = vmatprep.subr.msk.bf16.mxu0 %vm795_vm14, %v818_v36 }
  0x42   :  { %797 = vmatpush1.bf16.msra.mxu0 %v817_v1 }
  0x43   :  { %799 = vmatprep.subr.msk.bf16.mxu0 %vm798_vm1, %v818_v36 }
  0x46   :  { %800 = vmatpush1.bf16.msra.mxu0 %v817_v1 }
  0x47   :  { %802 = vmatprep.subr.msk.bf16.mxu0 %vm801_vm4, %v818_v36 }
  0x4a   :  { %803 = vmatpush1.bf16.msra.mxu0 %v817_v1 }
  0x4d   :  { %601 = vmatmul.mubr.f32.vlgmr.msra.gmra.mrb[0].mxu0 %v534_v57 }
 0x120   :  { %v602_v58 = vpop.f32.mrb[0].mxu0 }
 0x121   :  { %v607_v59 = vmul.f32 2e-05, %v602_v58  ;;  %v604_v60 = vpop.f32.mrb[1].mxu0 }
 0x122   :  { %v608_v61 = vmul.f32 2e-05, %v604_v60 }
 0x123   :  { %v609_v62 = vadd.f32 1.0, %v607_v59 }
 0x124   :  { %v610_v63 = vadd.f32 1.0, %v608_v61 }
 0x125   :  { %809 = vrsqrt.f32 %v609_v62 }
 0x126   :  { %811 = vrsqrt.f32 %v610_v63 }
 0x12f   :  { %v810_v0 = vpop.eup %809 }
 0x130   :  { %v812_v4 = vpop.eup %811  ;;  %v613_v5 = vmul.f32 %v810_v0, %v609_v62 }
 0x131   :  { %v614_v6 = vmul.f32 %v812_v4, %v610_v63 }
 0x132   :  { %813 = vrsqrt.f32 %v613_v5 }
 0x133   :  { %815 = vrsqrt.f32 %v614_v6 }
 0x13c   :  { %v814_v7 = vpop.eup %813 }
 0x13d   :  { %v816_v36 = vpop.eup %815  ;;  %v617_v8 = vmul.f32 %v814_v7, %v810_v0 }
 0x13e   :  { %v618_v9 = vmul.f32 %v816_v36, %v812_v4 }
 0x13f   :  { %v619_v1 = vmul.f32 %v617_v8, %v48_v55 }
 0x140   :  { %v620_v10 = vmul.f32 %v618_v9, %v49_v43 }
 0x142   :  { %v751_v11 = vpack.c.bf16 %v620_v10, %v619_v1 }
 0x144   :  { %629 = vst [vmem:[%s1035_s1] sm:$0xff] %v751_v11 }

// kernel: itracker_image_model.9
= control target key start
LH: loop header
LB: loop body
LE: loop exit
PB: predicated region body
PF: predicated region fallthrough
CT: control target
= control target key end

     0   :  { %vm5387_vm0 = vmmov 0   ;;  %s6943_s1 = inlined_call_operand.vmem [shape: bf16[2304,384], index: 1, kind: input, shape index: {}]   ;;  %s6944_s0 = inlined_call_operand.vmem [shape: bf16[8,2304], index: 0, kind: input, shape index: {}]   ;;  %s6945_s2 = inlined_call_operand.vmem [shape: f32[1,384], index: 2, kind: input, shape index: {}]   ;;  %s6946_s3 = inlined_call_operand.vmem [shape: bf16[384,128], index: 3, kind: input, shape index: {}]   ;;  %s6947_s4 = inlined_call_operand.vmem [shape: f32[1,128], index: 4, kind: input, shape index: {}]   ;;  %s6948_s5 = inlined_call_operand.vmem [shape: f32[8,128], index: 5, kind: output, shape index: {}]  }
   0x1   :  { %v4768_v0 = vld [vmem:[%s6943_s1 + $0x4] ss:$12 sps:$4 sm:$0xff]   ;;  %v4772_v2 = vld [vmem:[%s6943_s1] ss:$12 sps:$4 sm:$0xff]   ;;  %v4774_v4 = vld [vmem:[%s6943_s1 + $0x1c] ss:$12 sps:$4 sm:$0xff]  }
   0x2   :  { %v4770_v1 = vld [vmem:[%s6943_s1 + $0x304] ss:$12 sps:$4 sm:$0xff]   ;;  %2990 = vmatprep.subr.bf16.mxu1 %v4768_v0  ;;  %v4773_v3 = vld [vmem:[%s6943_s1 + $0x300] ss:$12 sps:$4 sm:$0xff]   ;;  %v4776_v5 = vld [vmem:[%s6943_s1 + $0x31c] ss:$12 sps:$4 sm:$0xff]  }
   0x3   :  { %3072 = vmatprep.subr.bf16.mxu0 %v4770_v1  ;;  %2991 = vmatpush1.bf16.msra.mxu1 %v4772_v2  ;;  %v4778_v6 = vld [vmem:[%s6943_s1 + $0x18] ss:$12 sps:$4 sm:$0xff]   ;;  %v4780_v8 = vld [vmem:[%s6943_s1 + $0x34] ss:$12 sps:$4 sm:$0xff]   ;;  %v4784_v10 = vld [vmem:[%s6943_s1 + $0x30] ss:$12 sps:$4 sm:$0xff]  }
   0x4   :  { %3073 = vmatpush1.bf16.msra.mxu0 %v4773_v3  ;;  %2992 = vmatprep.subr.bf16.mxu1 %v4774_v4  ;;  %v4779_v7 = vld [vmem:[%s6943_s1 + $0x318] ss:$12 sps:$4 sm:$0xff]   ;;  %v4782_v9 = vld [vmem:[%s6943_s1 + $0x334] ss:$12 sps:$4 sm:$0xff]   ;;  %v4785_v11 = vld [vmem:[%s6943_s1 + $0x330] ss:$12 sps:$4 sm:$0xff]  }
   0x5   :  { %3074 = vmatprep.subr.bf16.mxu0 %v4776_v5  ;;  %v4786_v12 = vld [vmem:[%s6943_s1 + $0x4c] ss:$12 sps:$4 sm:$0xff]   ;;  %v4790_v14 = vld [vmem:[%s6943_s1 + $0x48] ss:$12 sps:$4 sm:$0xff]   ;;  %v4792_v16 = vld [vmem:[%s6943_s1 + $0x64] ss:$12 sps:$4 sm:$0xff]  }
   0x6   :  { %v4788_v13 = vld [vmem:[%s6943_s1 + $0x34c] ss:$12 sps:$4 sm:$0xff]   ;;  %v4791_v15 = vld [vmem:[%s6943_s1 + $0x348] ss:$12 sps:$4 sm:$0xff]   ;;  %v4794_v17 = vld [vmem:[%s6943_s1 + $0x364] ss:$12 sps:$4 sm:$0xff]  }
   0x7   :  { %2993 = vmatpush1.bf16.msra.mxu1 %v4778_v6  ;;  %v4796_v18 = vld [vmem:[%s6943_s1 + $0x60] ss:$12 sps:$4 sm:$0xff]   ;;  %v4798_v20 = vld [vmem:[%s6943_s1 + $0x7c] ss:$12 sps:$4 sm:$0xff]   ;;  %v4802_v22 = vld [vmem:[%s6943_s1 + $0x78] ss:$12 sps:$4 sm:$0xff]  }
   0x8   :  { %3075 = vmatpush1.bf16.msra.mxu0 %v4779_v7  ;;  %2994 = vmatprep.subr.bf16.mxu1 %v4780_v8  ;;  %v4797_v19 = vld [vmem:[%s6943_s1 + $0x360] ss:$12 sps:$4 sm:$0xff]   ;;  %v4800_v21 = vld [vmem:[%s6943_s1 + $0x37c] ss:$12 sps:$4 sm:$0xff]   ;;  %v4803_v23 = vld [vmem:[%s6943_s1 + $0x378] ss:$12 sps:$4 sm:$0xff]  }
   0x9   :  { %3076 = vmatprep.subr.bf16.mxu0 %v4782_v9  ;;  %v4804_v24 = vld [vmem:[%s6943_s1 + $0x94] ss:$12 sps:$4 sm:$0xff]   ;;  %v4808_v26 = vld [vmem:[%s6943_s1 + $0x90] ss:$12 sps:$4 sm:$0xff]   ;;  %v4810_v28 = vld [vmem:[%s6943_s1 + $0xac] ss:$12 sps:$4 sm:$0xff]  }
   0xa   :  { %v4806_v25 = vld [vmem:[%s6943_s1 + $0x394] ss:$12 sps:$4 sm:$0xff]   ;;  %v4809_v27 = vld [vmem:[%s6943_s1 + $0x390] ss:$12 sps:$4 sm:$0xff]   ;;  %v4812_v29 = vld [vmem:[%s6943_s1 + $0x3ac] ss:$12 sps:$4 sm:$0xff]  }
   0xb   :  { %2995 = vmatpush1.bf16.msra.mxu1 %v4784_v10  ;;  %v4814_v30 = vld [vmem:[%s6943_s1 + $0xa8] ss:$12 sps:$4 sm:$0xff]   ;;  %v4816_v32 = vld [vmem:[%s6943_s1 + $0xc4] ss:$12 sps:$4 sm:$0xff]   ;;  %v4820_v34 = vld [vmem:[%s6943_s1 + $0xc0] ss:$12 sps:$4 sm:$0xff]  }
   0xc   :  { %3077 = vmatpush1.bf16.msra.mxu0 %v4785_v11  ;;  %2996 = vmatprep.subr.bf16.mxu1 %v4786_v12  ;;  %v4815_v31 = vld [vmem:[%s6943_s1 + $0x3a8] ss:$12 sps:$4 sm:$0xff]   ;;  %v4818_v33 = vld [vmem:[%s6943_s1 + $0x3c4] ss:$12 sps:$4 sm:$0xff]   ;;  %v4821_v35 = vld [vmem:[%s6943_s1 + $0x3c0] ss:$12 sps:$4 sm:$0xff]  }
   0xd   :  { %3078 = vmatprep.subr.bf16.mxu0 %v4788_v13  ;;  %v4822_v36 = vld [vmem:[%s6943_s1 + $0xdc] ss:$12 sps:$4 sm:$0xff]   ;;  %v4826_v38 = vld [vmem:[%s6943_s1 + $0xd8] ss:$12 sps:$4 sm:$0xff]   ;;  %v4828_v40 = vld [vmem:[%s6943_s1 + $0xf4] ss:$12 sps:$4 sm:$0xff]  }
   0xe   :  { %v4824_v37 = vld [vmem:[%s6943_s1 + $0x3dc] ss:$12 sps:$4 sm:$0xff]   ;;  %v4827_v39 = vld [vmem:[%s6943_s1 + $0x3d8] ss:$12 sps:$4 sm:$0xff]   ;;  %v4830_v41 = vld [vmem:[%s6943_s1 + $0x3f4] ss:$12 sps:$4 sm:$0xff]  }
   0xf   :  { %2997 = vmatpush1.bf16.msra.mxu1 %v4790_v14  ;;  %v4832_v42 = vld [vmem:[%s6943_s1 + $0xf0] ss:$12 sps:$4 sm:$0xff]   ;;  %v4834_v44 = vld [vmem:[%s6943_s1 + $0x10c] ss:$12 sps:$4 sm:$0xff]   ;;  %v21_v46 = vld [vmem:[%s6944_s0] sm:$0xff] }
  0x10   :  { %3079 = vmatpush1.bf16.msra.mxu0 %v4791_v15  ;;  %2998 = vmatprep.subr.bf16.mxu1 %v4792_v16  ;;  %v4833_v43 = vld [vmem:[%s6943_s1 + $0x3f0] ss:$12 sps:$4 sm:$0xff]   ;;  %v4836_v45 = vld [vmem:[%s6943_s1 + $0x40c] ss:$12 sps:$4 sm:$0xff]   ;;  %v4838_v47 = vld [vmem:[%s6943_s1 + $0x108] ss:$12 sps:$4 sm:$0xff]   ;;  %v5562_v48 = vcombine.high %v21_v46, %v21_v46  ;;  %v5628_v6 = vcombine.low %v21_v46, %v21_v46 }
  0x11   :  { %3080 = vmatprep.subr.bf16.mxu0 %v4794_v17  ;;  %v4839_v49 = vld [vmem:[%s6943_s1 + $0x408] ss:$12 sps:$4 sm:$0xff]   ;;  %v4840_v51 = vld [vmem:[%s6943_s1 + $0x124] ss:$12 sps:$4 sm:$0xff]   ;;  %v4844_v54 = vld [vmem:[%s6943_s1 + $0x120] ss:$12 sps:$4 sm:$0xff]  }
  0x12   :  { %v23_v50 = vld [vmem:[%s6944_s0 + $0x10] sm:$0xff]  ;;  %3022 = vmatprep.mubr.bf16.mxu1 %v5562_v48  ;;  %v4845_v55 = vld [vmem:[%s6943_s1 + $0x420] ss:$12 sps:$4 sm:$0xff]   ;;  %v4846_v56 = vld [vmem:[%s6943_s1 + $0x13c] ss:$12 sps:$4 sm:$0xff]  }
  0x13   :  { %2999 = vmatpush1.bf16.msra.mxu1 %v4796_v18  ;;  %v4842_v52 = vld [vmem:[%s6943_s1 + $0x424] ss:$12 sps:$4 sm:$0xff]   ;;  %v5576_v53 = vcombine.high %v23_v50, %v23_v50  ;;  %v4848_v57 = vld [vmem:[%s6943_s1 + $0x43c] ss:$12 sps:$4 sm:$0xff]   ;;  %v4852_v60 = vld [vmem:[%s6943_s1 + $0x154] ss:$12 sps:$4 sm:$0xff]   ;;  %v5630_v7 = vcombine.low %v23_v50, %v23_v50 }
  0x14   :  { %3081 = vmatpush1.bf16.msra.mxu0 %v4797_v19  ;;  %3000 = vmatprep.subr.bf16.mxu1 %v4798_v20  ;;  %v4850_v58 = vld [vmem:[%s6943_s1 + $0x138] ss:$12 sps:$4 sm:$0xff]   ;;  %v4854_v61 = vld [vmem:[%s6943_s1 + $0x454] ss:$12 sps:$4 sm:$0xff]   ;;  %v4856_v62 = vld [vmem:[%s6943_s1 + $0x150] ss:$12 sps:$4 sm:$0xff]  }
  0x15   :  { %3082 = vmatprep.subr.bf16.mxu0 %v4800_v21  ;;  %3104 = vmatprep.mubr.bf16.mxu0 %v5576_v53  ;;  %v4851_v59 = vld [vmem:[%s6943_s1 + $0x438] ss:$12 sps:$4 sm:$0xff]   ;;  %v4857_v63 = vld [vmem:[%s6943_s1 + $0x450] ss:$12 sps:$4 sm:$0xff]   ;;  %v4862_v2 = vld [vmem:[%s6943_s1 + $0x168] ss:$12 sps:$4 sm:$0xff]  }
  0x16   :  { %v4858_v0 = vld [vmem:[%s6943_s1 + $0x16c] ss:$12 sps:$4 sm:$0xff]   ;;  %v4863_v3 = vld [vmem:[%s6943_s1 + $0x468] ss:$12 sps:$4 sm:$0xff]   ;;  %v4868_v4 = vld [vmem:[%s6943_s1 + $0x184] ss:$12 sps:$4 sm:$0xff]  }
  0x17   :  { %3001 = vmatpush1.bf16.msra.mxu1 %v4802_v22  ;;  %v4860_v1 = vld [vmem:[%s6943_s1 + $0x46c] ss:$12 sps:$4 sm:$0xff]   ;;  %v4873_v5 = vld [vmem:[%s6943_s1 + $0x484] ss:$12 sps:$4 sm:$0xff]   ;;  %v4876_v10 = vld [vmem:[%s6943_s1 + $0x19c] ss:$12 sps:$4 sm:$0xff]  }
  0x18   :  { %3083 = vmatpush1.bf16.msra.mxu0 %v4803_v23  ;;  %3002 = vmatprep.subr.bf16.mxu1 %v4804_v24  ;;  %v4866_v8 = vld [vmem:[%s6943_s1 + $0x180] ss:$12 sps:$4 sm:$0xff]   ;;  %v4879_v11 = vld [vmem:[%s6943_s1 + $0x49c] ss:$12 sps:$4 sm:$0xff]   ;;  %v4874_v12 = vld [vmem:[%s6943_s1 + $0x198] ss:$12 sps:$4 sm:$0xff]  }
  0x19   :  { %3084 = vmatprep.subr.bf16.mxu0 %v4806_v25  ;;  %v4871_v9 = vld [vmem:[%s6943_s1 + $0x480] ss:$12 sps:$4 sm:$0xff]   ;;  %v4877_v13 = vld [vmem:[%s6943_s1 + $0x498] ss:$12 sps:$4 sm:$0xff]   ;;  %v4880_v16 = vld [vmem:[%s6943_s1 + $0x1b0] ss:$12 sps:$4 sm:$0xff]  }
  0x1a   :  { %v4882_v14 = vld [vmem:[%s6943_s1 + $0x1b4] ss:$12 sps:$4 sm:$0xff]   ;;  %v4883_v17 = vld [vmem:[%s6943_s1 + $0x4b0] ss:$12 sps:$4 sm:$0xff]   ;;  %v4888_v18 = vld [vmem:[%s6943_s1 + $0x1cc] ss:$12 sps:$4 sm:$0xff]  }
  0x1b   :  { %3003 = vmatpush1.bf16.msra.mxu1 %v4808_v26  ;;  %v4885_v15 = vld [vmem:[%s6943_s1 + $0x4b4] ss:$12 sps:$4 sm:$0xff]   ;;  %v4891_v19 = vld [vmem:[%s6943_s1 + $0x4cc] ss:$12 sps:$4 sm:$0xff]   ;;  %v4894_v22 = vld [vmem:[%s6943_s1 + $0x1e4] ss:$12 sps:$4 sm:$0xff]  }
  0x1c   :  { %3085 = vmatpush1.bf16.msra.mxu0 %v4809_v27  ;;  %3004 = vmatprep.subr.bf16.mxu1 %v4810_v28  ;;  %v4886_v20 = vld [vmem:[%s6943_s1 + $0x1c8] ss:$12 sps:$4 sm:$0xff]   ;;  %v4897_v23 = vld [vmem:[%s6943_s1 + $0x4e4] ss:$12 sps:$4 sm:$0xff]   ;;  %v4892_v24 = vld [vmem:[%s6943_s1 + $0x1e0] ss:$12 sps:$4 sm:$0xff]  }
  0x1d   :  { %3086 = vmatprep.subr.bf16.mxu0 %v4812_v29  ;;  %v4889_v21 = vld [vmem:[%s6943_s1 + $0x4c8] ss:$12 sps:$4 sm:$0xff]   ;;  %v4895_v25 = vld [vmem:[%s6943_s1 + $0x4e0] ss:$12 sps:$4 sm:$0xff]   ;;  %v4898_v28 = vld [vmem:[%s6943_s1 + $0x1f8] ss:$12 sps:$4 sm:$0xff]  }
  0x1e   :  { %v4900_v26 = vld [vmem:[%s6943_s1 + $0x1fc] ss:$12 sps:$4 sm:$0xff]   ;;  %v4901_v29 = vld [vmem:[%s6943_s1 + $0x4f8] ss:$12 sps:$4 sm:$0xff]  }
  0x1f   :  { %3005 = vmatpush1.bf16.msra.mxu1 %v4814_v30  ;;  %v4903_v27 = vld [vmem:[%s6943_s1 + $0x4fc] ss:$12 sps:$4 sm:$0xff]   ;;  %v4906_v30 = vld [vmem:[%s6943_s1 + $0x214] ss:$12 sps:$4 sm:$0xff]   ;;  %v4925_v50 = vld [vmem:[%s6943_s1 + $0x558] ss:$12 sps:$4 sm:$0xff]  }
  0x20   :  { %3087 = vmatpush1.bf16.msra.mxu0 %v4815_v31  ;;  %3006 = vmatprep.subr.bf16.mxu1 %v4816_v32  ;;  %v4909_v31 = vld [vmem:[%s6943_s1 + $0x514] ss:$12 sps:$4 sm:$0xff]   ;;  %v5709_v32 = vld [vmem:[%s6944_s0 + $0x8] sm:$0xff] }
  0x21   :  { %3088 = vmatprep.subr.bf16.mxu0 %v4818_v33  ;;  %v5714_v33 = vld [vmem:[%s6944_s0 + $0x18] sm:$0xff] }
  0x22   :  { %v4924_v46 = vld [vmem:[%s6943_s1 + $0x25c] ss:$12 sps:$4 sm:$0xff]  }
  0x23   :  { %3007 = vmatpush1.bf16.msra.mxu1 %v4820_v34  ;;  %v4904_v34 = vld [vmem:[%s6943_s1 + $0x210] ss:$12 sps:$4 sm:$0xff]  }
  0x24   :  { %3089 = vmatpush1.bf16.msra.mxu0 %v4821_v35  ;;  %3008 = vmatprep.subr.bf16.mxu1 %v4822_v36  ;;  %v4907_v35 = vld [vmem:[%s6943_s1 + $0x510] ss:$12 sps:$4 sm:$0xff]   ;;  %v5724_v36 = vcombine.high %v5709_v32, %v5709_v32 }
  0x25   :  { %3090 = vmatprep.subr.bf16.mxu0 %v4824_v37  ;;  %v5728_v37 = vcombine.high %v5714_v33, %v5714_v33 }
  0x27   :  { %3009 = vmatpush1.bf16.msra.mxu1 %v4826_v38  ;;  %v4912_v38 = vld [vmem:[%s6943_s1 + $0x22c] ss:$12 sps:$4 sm:$0xff]  }
  0x28   :  { %3091 = vmatpush1.bf16.msra.mxu0 %v4827_v39  ;;  %3010 = vmatprep.subr.bf16.mxu1 %v4828_v40  ;;  %v4915_v39 = vld [vmem:[%s6943_s1 + $0x52c] ss:$12 sps:$4 sm:$0xff]   ;;  %v4910_v40 = vld [vmem:[%s6943_s1 + $0x228] ss:$12 sps:$4 sm:$0xff]  }
  0x29   :  { %3092 = vmatprep.subr.bf16.mxu0 %v4830_v41  ;;  %v4913_v41 = vld [vmem:[%s6943_s1 + $0x528] ss:$12 sps:$4 sm:$0xff]  }
  0x2b   :  { %3011 = vmatpush1.bf16.msra.mxu1 %v4832_v42  ;;  %v4918_v42 = vld [vmem:[%s6943_s1 + $0x244] ss:$12 sps:$4 sm:$0xff]  }
  0x2c   :  { %3093 = vmatpush1.bf16.msra.mxu0 %v4833_v43  ;;  %3012 = vmatprep.subr.bf16.mxu1 %v4834_v44  ;;  %v4921_v43 = vld [vmem:[%s6943_s1 + $0x544] ss:$12 sps:$4 sm:$0xff]   ;;  %v4916_v44 = vld [vmem:[%s6943_s1 + $0x240] ss:$12 sps:$4 sm:$0xff]  }
  0x2d   :  { %3094 = vmatprep.subr.bf16.mxu0 %v4836_v45  ;;  %v4919_v45 = vld [vmem:[%s6943_s1 + $0x540] ss:$12 sps:$4 sm:$0xff]  }
  0x2f   :  { %3013 = vmatpush1.bf16.msra.mxu1 %v4838_v47  ;;  %v4927_v47 = vld [vmem:[%s6943_s1 + $0x55c] ss:$12 sps:$4 sm:$0xff]  }
  0x30   :  { %3095 = vmatpush1.bf16.msra.mxu0 %v4839_v49  ;;  %3014 = vmatprep.subr.bf16.mxu1 %v4840_v51  ;;  %v4922_v49 = vld [vmem:[%s6943_s1 + $0x258] ss:$12 sps:$4 sm:$0xff]   ;;  %v4930_v51 = vld [vmem:[%s6943_s1 + $0x274] ss:$12 sps:$4 sm:$0xff]  }
  0x31   :  { %3096 = vmatprep.subr.bf16.mxu0 %v4842_v52  ;;  %v4933_v52 = vld [vmem:[%s6943_s1 + $0x574] ss:$12 sps:$4 sm:$0xff]  }
  0x33   :  { %3015 = vmatpush1.bf16.msra.mxu1 %v4844_v54  ;;  %v4928_v54 = vld [vmem:[%s6943_s1 + $0x270] ss:$12 sps:$4 sm:$0xff]  }
  0x34   :  { %3097 = vmatpush1.bf16.msra.mxu0 %v4845_v55  ;;  %3016 = vmatprep.subr.bf16.mxu1 %v4846_v56  ;;  %v4931_v55 = vld [vmem:[%s6943_s1 + $0x570] ss:$12 sps:$4 sm:$0xff]   ;;  %v4936_v56 = vld [vmem:[%s6943_s1 + $0x28c] ss:$12 sps:$4 sm:$0xff]  }
  0x35   :  { %3098 = vmatprep.subr.bf16.mxu0 %v4848_v57  ;;  %v4939_v57 = vld [vmem:[%s6943_s1 + $0x58c] ss:$12 sps:$4 sm:$0xff]  }
  0x37   :  { %3017 = vmatpush1.bf16.msra.mxu1 %v4850_v58  ;;  %v4934_v58 = vld [vmem:[%s6943_s1 + $0x288] ss:$12 sps:$4 sm:$0xff]  }
  0x38   :  { %3099 = vmatpush1.bf16.msra.mxu0 %v4851_v59  ;;  %3018 = vmatprep.subr.bf16.mxu1 %v4852_v60  ;;  %v4937_v59 = vld [vmem:[%s6943_s1 + $0x588] ss:$12 sps:$4 sm:$0xff]   ;;  %v4942_v60 = vld [vmem:[%s6943_s1 + $0x2a4] ss:$12 sps:$4 sm:$0xff]  }
  0x39   :  { %3100 = vmatprep.subr.bf16.mxu0 %v4854_v61  ;;  %v4945_v61 = vld [vmem:[%s6943_s1 + $0x5a4] ss:$12 sps:$4 sm:$0xff]  }
  0x3b   :  { %3019 = vmatpush1.bf16.msra.mxu1 %v4856_v62  ;;  %v4940_v62 = vld [vmem:[%s6943_s1 + $0x2a0] ss:$12 sps:$4 sm:$0xff]  }
  0x3c   :  { %3101 = vmatpush1.bf16.msra.mxu0 %v4857_v63  ;;  %3020 = vmatprep.subr.bf16.mxu1 %v4858_v0  ;;  %v4943_v63 = vld [vmem:[%s6943_s1 + $0x5a0] ss:$12 sps:$4 sm:$0xff]   ;;  %v4948_v0 = vld [vmem:[%s6943_s1 + $0x2bc] ss:$12 sps:$4 sm:$0xff]  }
  0x3d   :  { %3102 = vmatprep.subr.bf16.mxu0 %v4860_v1  ;;  %v4951_v1 = vld [vmem:[%s6943_s1 + $0x5bc] ss:$12 sps:$4 sm:$0xff]  }
  0x3f   :  { %3021 = vmatpush1.bf16.msra.mxu1 %v4862_v2  ;;  %v4946_v2 = vld [vmem:[%s6943_s1 + $0x2b8] ss:$12 sps:$4 sm:$0xff]  }
  0x40   :  { %3103 = vmatpush1.bf16.msra.mxu0 %v4863_v3  ;;  %3031 = vmatprep.subr.bf16.mxu1 %v4868_v4  ;;  %v4949_v3 = vld [vmem:[%s6943_s1 + $0x5b8] ss:$12 sps:$4 sm:$0xff]   ;;  %v4954_v4 = vld [vmem:[%s6943_s1 + $0x2d4] ss:$12 sps:$4 sm:$0xff]  }
  0x41   :  { %3113 = vmatprep.subr.bf16.mxu0 %v4873_v5  ;;  %v4957_v5 = vld [vmem:[%s6943_s1 + $0x5d4] ss:$12 sps:$4 sm:$0xff]  }
  0x42   :  { %3023 = vmatmul.mubr.bf16.vlgmr.msra.gmra.mrb[0].mxu1 %v5628_v6 }
  0x43   :  { %3105 = vmatmul.mubr.bf16.vlgmr.msra.gmra.mrb[0].mxu0 %v5630_v7  ;;  %3032 = vmatpush1.bf16.msra.mxu1 %v4866_v8  ;;  %v4952_v8 = vld [vmem:[%s6943_s1 + $0x2d0] ss:$12 sps:$4 sm:$0xff]  }
  0x44   :  { %3114 = vmatpush1.bf16.msra.mxu0 %v4871_v9  ;;  %3033 = vmatprep.subr.bf16.mxu1 %v4876_v10  ;;  %v4955_v9 = vld [vmem:[%s6943_s1 + $0x5d0] ss:$12 sps:$4 sm:$0xff]   ;;  %v4960_v10 = vld [vmem:[%s6943_s1 + $0x2ec] ss:$12 sps:$4 sm:$0xff]  }
  0x45   :  { %3115 = vmatprep.subr.bf16.mxu0 %v4879_v11  ;;  %3063 = vmatprep.mubr.bf16.mxu1 %v5724_v36  ;;  %v4963_v11 = vld [vmem:[%s6943_s1 + $0x5ec] ss:$12 sps:$4 sm:$0xff]  }
  0x46   :  { %3145 = vmatprep.mubr.bf16.mxu0 %v5728_v37 }
  0x47   :  { %3034 = vmatpush1.bf16.msra.mxu1 %v4874_v12  ;;  %v4958_v12 = vld [vmem:[%s6943_s1 + $0x2e8] ss:$12 sps:$4 sm:$0xff]  }
  0x48   :  { %3116 = vmatpush1.bf16.msra.mxu0 %v4877_v13  ;;  %3035 = vmatprep.subr.bf16.mxu1 %v4882_v14  ;;  %v4961_v13 = vld [vmem:[%s6943_s1 + $0x5e8] ss:$12 sps:$4 sm:$0xff]   ;;  %v4970_v14 = vld [vmem:[%s6943_s1 + $0x604] ss:$12 sps:$4 sm:$0xff]  }
  0x49   :  { %3117 = vmatprep.subr.bf16.mxu0 %v4885_v15  ;;  %v4971_v15 = vld [vmem:[%s6943_s1 + $0xc8] ss:$12 sps:$4 sm:$0xff]  }
  0x4b   :  { %3036 = vmatpush1.bf16.msra.mxu1 %v4880_v16  ;;  %v5848_v16 = vcombine.low %v5709_v32, %v5709_v32  ;;  %v4990_v32 = vld [vmem:[%s6943_s1 + $0x664] ss:$12 sps:$4 sm:$0xff]  }
  0x4c   :  { %3118 = vmatpush1.bf16.msra.mxu0 %v4883_v17  ;;  %3037 = vmatprep.subr.bf16.mxu1 %v4888_v18  ;;  %v5852_v17 = vcombine.low %v5714_v33, %v5714_v33  ;;  %v4968_v18 = vld [vmem:[%s6943_s1 + $0x600] ss:$12 sps:$4 sm:$0xff]   ;;  %v4991_v33 = vld [vmem:[%s6943_s1 + $0x128] ss:$12 sps:$4 sm:$0xff]  }
  0x4d   :  { %3119 = vmatprep.subr.bf16.mxu0 %v4891_v19  ;;  %v4972_v19 = vld [vmem:[%s6943_s1 + $0x8] ss:$12 sps:$4 sm:$0xff]  }
  0x4f   :  { %3038 = vmatpush1.bf16.msra.mxu1 %v4886_v20  ;;  %v4975_v20 = vld [vmem:[%s6943_s1 + $0x61c] ss:$12 sps:$4 sm:$0xff]  }
  0x50   :  { %3120 = vmatpush1.bf16.msra.mxu0 %v4889_v21  ;;  %3039 = vmatprep.subr.bf16.mxu1 %v4894_v22  ;;  %v4976_v21 = vld [vmem:[%s6943_s1 + $0xe0] ss:$12 sps:$4 sm:$0xff]   ;;  %v4973_v22 = vld [vmem:[%s6943_s1 + $0x618] ss:$12 sps:$4 sm:$0xff]  }
  0x51   :  { %3121 = vmatprep.subr.bf16.mxu0 %v4897_v23  ;;  %v4977_v23 = vld [vmem:[%s6943_s1 + $0x20] ss:$12 sps:$4 sm:$0xff]  }
  0x53   :  { %3040 = vmatpush1.bf16.msra.mxu1 %v4892_v24  ;;  %v4980_v24 = vld [vmem:[%s6943_s1 + $0x634] ss:$12 sps:$4 sm:$0xff]  }
  0x54   :  { %3122 = vmatpush1.bf16.msra.mxu0 %v4895_v25  ;;  %3041 = vmatprep.subr.bf16.mxu1 %v4900_v26  ;;  %v4981_v25 = vld [vmem:[%s6943_s1 + $0xf8] ss:$12 sps:$4 sm:$0xff]   ;;  %v4978_v26 = vld [vmem:[%s6943_s1 + $0x630] ss:$12 sps:$4 sm:$0xff]  }
  0x55   :  { %3123 = vmatprep.subr.bf16.mxu0 %v4903_v27  ;;  %v4982_v27 = vld [vmem:[%s6943_s1 + $0x38] ss:$12 sps:$4 sm:$0xff]  }
  0x57   :  { %3042 = vmatpush1.bf16.msra.mxu1 %v4898_v28  ;;  %v4985_v28 = vld [vmem:[%s6943_s1 + $0x64c] ss:$12 sps:$4 sm:$0xff]  }
  0x58   :  { %3124 = vmatpush1.bf16.msra.mxu0 %v4901_v29  ;;  %3043 = vmatprep.subr.bf16.mxu1 %v4906_v30  ;;  %v4983_v29 = vld [vmem:[%s6943_s1 + $0x648] ss:$12 sps:$4 sm:$0xff]   ;;  %v4987_v30 = vld [vmem:[%s6943_s1 + $0x50] ss:$12 sps:$4 sm:$0xff]  }
  0x59   :  { %3125 = vmatprep.subr.bf16.mxu0 %v4909_v31  ;;  %v5902_v31 = vld [vmem:[%s6944_s0 + $0x20] sm:$0xff] }
  0x5b   :  { %3044 = vmatpush1.bf16.msra.mxu1 %v4904_v34  ;;  %v5912_v34 = vcombine.high %v5902_v31, %v5902_v31 }
  0x5c   :  { %3126 = vmatpush1.bf16.msra.mxu0 %v4907_v35  ;;  %3045 = vmatprep.subr.bf16.mxu1 %v4912_v38  ;;  %v4988_v35 = vld [vmem:[%s6943_s1 + $0x660] ss:$12 sps:$4 sm:$0xff]   ;;  %v4992_v38 = vld [vmem:[%s6943_s1 + $0x68] ss:$12 sps:$4 sm:$0xff]  }
  0x5d   :  { %3127 = vmatprep.subr.bf16.mxu0 %v4915_v39  ;;  %v4995_v39 = vld [vmem:[%s6943_s1 + $0x67c] ss:$12 sps:$4 sm:$0xff]  }
  0x5f   :  { %3046 = vmatpush1.bf16.msra.mxu1 %v4910_v40  ;;  %v4996_v40 = vld [vmem:[%s6943_s1 + $0x140] ss:$12 sps:$4 sm:$0xff]  }
  0x60   :  { %3128 = vmatpush1.bf16.msra.mxu0 %v4913_v41  ;;  %3047 = vmatprep.subr.bf16.mxu1 %v4918_v42  ;;  %v4993_v41 = vld [vmem:[%s6943_s1 + $0x678] ss:$12 sps:$4 sm:$0xff]   ;;  %v4997_v42 = vld [vmem:[%s6943_s1 + $0x80] ss:$12 sps:$4 sm:$0xff]  }
  0x61   :  { %3129 = vmatprep.subr.bf16.mxu0 %v4921_v43  ;;  %v5000_v43 = vld [vmem:[%s6943_s1 + $0x694] ss:$12 sps:$4 sm:$0xff]  }
  0x63   :  { %3048 = vmatpush1.bf16.msra.mxu1 %v4916_v44  ;;  %v5001_v44 = vld [vmem:[%s6943_s1 + $0x158] ss:$12 sps:$4 sm:$0xff]  }
  0x64   :  { %3130 = vmatpush1.bf16.msra.mxu0 %v4919_v45  ;;  %3049 = vmatprep.subr.bf16.mxu1 %v4924_v46  ;;  %v4998_v45 = vld [vmem:[%s6943_s1 + $0x690] ss:$12 sps:$4 sm:$0xff]   ;;  %v5002_v46 = vld [vmem:[%s6943_s1 + $0x98] ss:$12 sps:$4 sm:$0xff]  }
  0x65   :  { %3131 = vmatprep.subr.bf16.mxu0 %v4927_v47  ;;  %v5005_v47 = vld [vmem:[%s6943_s1 + $0x6ac] ss:$12 sps:$4 sm:$0xff]  }
  0x67   :  { %3050 = vmatpush1.bf16.msra.mxu1 %v4922_v49  ;;  %v5006_v49 = vld [vmem:[%s6943_s1 + $0x170] ss:$12 sps:$4 sm:$0xff]  }
  0x68   :  { %3132 = vmatpush1.bf16.msra.mxu0 %v4925_v50  ;;  %3051 = vmatprep.subr.bf16.mxu1 %v4930_v51  ;;  %v5003_v50 = vld [vmem:[%s6943_s1 + $0x6a8] ss:$12 sps:$4 sm:$0xff]   ;;  %v5007_v51 = vld [vmem:[%s6943_s1 + $0xb0] ss:$12 sps:$4 sm:$0xff]  }
  0x69   :  { %3133 = vmatprep.subr.bf16.mxu0 %v4933_v52  ;;  %v5010_v52 = vld [vmem:[%s6943_s1 + $0x6c4] ss:$12 sps:$4 sm:$0xff]  }
  0x6b   :  { %3052 = vmatpush1.bf16.msra.mxu1 %v4928_v54  ;;  %v5011_v54 = vld [vmem:[%s6943_s1 + $0x248] ss:$12 sps:$4 sm:$0xff]  }
  0x6c   :  { %3134 = vmatpush1.bf16.msra.mxu0 %v4931_v55  ;;  %3053 = vmatprep.subr.bf16.mxu1 %v4936_v56  ;;  %v5008_v55 = vld [vmem:[%s6943_s1 + $0x6c0] ss:$12 sps:$4 sm:$0xff]   ;;  %v5012_v56 = vld [vmem:[%s6943_s1 + $0x188] ss:$12 sps:$4 sm:$0xff]  }
  0x6d   :  { %3135 = vmatprep.subr.bf16.mxu0 %v4939_v57  ;;  %v5015_v57 = vld [vmem:[%s6943_s1 + $0x6dc] ss:$12 sps:$4 sm:$0xff]  }
  0x6f   :  { %3054 = vmatpush1.bf16.msra.mxu1 %v4934_v58  ;;  %v5016_v58 = vld [vmem:[%s6943_s1 + $0x260] ss:$12 sps:$4 sm:$0xff]  }
  0x70   :  { %3136 = vmatpush1.bf16.msra.mxu0 %v4937_v59  ;;  %3055 = vmatprep.subr.bf16.mxu1 %v4942_v60  ;;  %v5013_v59 = vld [vmem:[%s6943_s1 + $0x6d8] ss:$12 sps:$4 sm:$0xff]   ;;  %v5017_v60 = vld [vmem:[%s6943_s1 + $0x1a0] ss:$12 sps:$4 sm:$0xff]  }
  0x71   :  { %3137 = vmatprep.subr.bf16.mxu0 %v4945_v61  ;;  %v5020_v61 = vld [vmem:[%s6943_s1 + $0x6f4] ss:$12 sps:$4 sm:$0xff]  }
  0x73   :  { %3056 = vmatpush1.bf16.msra.mxu1 %v4940_v62  ;;  %v5018_v62 = vld [vmem:[%s6943_s1 + $0x6f0] ss:$12 sps:$4 sm:$0xff]  }
  0x74   :  { %3138 = vmatpush1.bf16.msra.mxu0 %v4943_v63  ;;  %3057 = vmatprep.subr.bf16.mxu1 %v4948_v0  ;;  %v5022_v63 = vld [vmem:[%s6943_s1 + $0x1b8] ss:$12 sps:$4 sm:$0xff]  }
  0x75   :  { %3139 = vmatprep.subr.bf16.mxu0 %v4951_v1  ;;  %v5025_v0 = vld [vmem:[%s6943_s1 + $0x70c] ss:$12 sps:$4 sm:$0xff]   ;;  %v5026_v1 = vld [vmem:[%s6943_s1 + $0x290] ss:$12 sps:$4 sm:$0xff]  }
  0x77   :  { %3058 = vmatpush1.bf16.msra.mxu1 %v4946_v2  ;;  %v5027_v2 = vld [vmem:[%s6943_s1 + $0x1d0] ss:$12 sps:$4 sm:$0xff]  }
  0x78   :  { %3140 = vmatpush1.bf16.msra.mxu0 %v4949_v3  ;;  %3059 = vmatprep.subr.bf16.mxu1 %v4954_v4  ;;  %v5030_v3 = vld [vmem:[%s6943_s1 + $0x724] ss:$12 sps:$4 sm:$0xff]   ;;  %v5031_v4 = vld [vmem:[%s6943_s1 + $0x2a8] ss:$12 sps:$4 sm:$0xff]  }
  0x79   :  { %3141 = vmatprep.subr.bf16.mxu0 %v4957_v5  ;;  %v5028_v5 = vld [vmem:[%s6943_s1 + $0x720] ss:$12 sps:$4 sm:$0xff]  }
  0x7b   :  { %3060 = vmatpush1.bf16.msra.mxu1 %v4952_v8  ;;  %v5032_v8 = vld [vmem:[%s6943_s1 + $0x1e8] ss:$12 sps:$4 sm:$0xff]  }
  0x7c   :  { %3142 = vmatpush1.bf16.msra.mxu0 %v4955_v9  ;;  %3061 = vmatprep.subr.bf16.mxu1 %v4960_v10  ;;  %v5035_v9 = vld [vmem:[%s6943_s1 + $0x73c] ss:$12 sps:$4 sm:$0xff]   ;;  %v5036_v10 = vld [vmem:[%s6943_s1 + $0x2c0] ss:$12 sps:$4 sm:$0xff]  }
  0x7d   :  { %3143 = vmatprep.subr.bf16.mxu0 %v4963_v11  ;;  %v5033_v11 = vld [vmem:[%s6943_s1 + $0x738] ss:$12 sps:$4 sm:$0xff]  }
  0x7f   :  { %3062 = vmatpush1.bf16.msra.mxu1 %v4958_v12  ;;  %v5037_v12 = vld [vmem:[%s6943_s1 + $0x200] ss:$12 sps:$4 sm:$0xff]  }
  0x80   :  { %3144 = vmatpush1.bf16.msra.mxu0 %v4961_v13  ;;  %4485 = vmatprep.subr.bf16.mxu1 %v4971_v15  ;;  %v5040_v13 = vld [vmem:[%s6943_s1 + $0x754] ss:$12 sps:$4 sm:$0xff]   ;;  %v5038_v15 = vld [vmem:[%s6943_s1 + $0x750] ss:$12 sps:$4 sm:$0xff]  }
  0x81   :  { %3154 = vmatprep.subr.bf16.mxu0 %v4970_v14  ;;  %v5041_v14 = vld [vmem:[%s6943_s1 + $0x2d8] ss:$12 sps:$4 sm:$0xff]  }
  0x82   :  { %3064 = vmatmul.mubr.bf16.vlgmr.msra.gmra.mrb[0].mxu1 %v5848_v16 }
  0x83   :  { %3146 = vmatmul.mubr.bf16.vlgmr.msra.gmra.mrb[0].mxu0 %v5852_v17  ;;  %4486 = vmatpush3.bf16.msra.mxu1 %v4972_v19  ;;  %v5045_v19 = vld [vmem:[%s6943_s1 + $0x76c] ss:$12 sps:$4 sm:$0xff]  }
  0x84   :  { %3155 = vmatpush1.bf16.msra.mxu0 %v4968_v18  ;;  %4487 = vmatprep.subr.bf16.mxu1 %v4976_v21  ;;  %v5042_v18 = vld [vmem:[%s6943_s1 + $0x218] ss:$12 sps:$4 sm:$0xff]   ;;  %v5043_v21 = vld [vmem:[%s6943_s1 + $0x768] ss:$12 sps:$4 sm:$0xff]  }
  0x85   :  { %3156 = vmatprep.subr.bf16.mxu0 %v4975_v20  ;;  %3391 = vmatprep.mubr.bf16.mxu1 %v5562_v48  ;;  %v4986_v48 = vld [vmem:[%s6943_s1 + $0x110] ss:$12 sps:$4 sm:$0xff]  }
  0x86   :  { %3186 = vmatprep.mubr.bf16.mxu0 %v5912_v34  ;;  %v5046_v20 = vld [vmem:[%s6943_s1 + $0x2f0] ss:$12 sps:$4 sm:$0xff]  }
  0x87   :  { %4488 = vmatpush3.bf16.msra.mxu1 %v4977_v23  ;;  %v5052_v23 = vld [vmem:[%s6943_s1 + $0x784] ss:$12 sps:$4 sm:$0xff]  }
  0x88   :  { %3157 = vmatpush1.bf16.msra.mxu0 %v4973_v22  ;;  %4489 = vmatprep.subr.bf16.mxu1 %v4981_v25  ;;  %v5047_v22 = vld [vmem:[%s6943_s1 + $0x230] ss:$12 sps:$4 sm:$0xff]   ;;  %v6063_v25 = vcombine.low %v5902_v31, %v5902_v31 }
  0x89   :  { %3158 = vmatprep.subr.bf16.mxu0 %v4980_v24  ;;  %v5053_v24 = vld [vmem:[%s6943_s1 + $0x3c8] ss:$12 sps:$4 sm:$0xff]  }
  0x8b   :  { %4490 = vmatpush3.bf16.msra.mxu1 %v4982_v27  ;;  %v5054_v27 = vld [vmem:[%s6943_s1 + $0x308] ss:$12 sps:$4 sm:$0xff]  }
  0x8c   :  { %3159 = vmatpush1.bf16.msra.mxu0 %v4978_v26  ;;  %4491 = vmatprep.subr.bf16.mxu1 %v4986_v48  ;;  %v5050_v26 = vld [vmem:[%s6943_s1 + $0x780] ss:$12 sps:$4 sm:$0xff]  }
  0x8d   :  { %3160 = vmatprep.subr.bf16.mxu0 %v4985_v28  ;;  %v5057_v28 = vld [vmem:[%s6943_s1 + $0x79c] ss:$12 sps:$4 sm:$0xff]   ;;  %v5058_v48 = vld [vmem:[%s6943_s1 + $0x3e0] ss:$12 sps:$4 sm:$0xff]  }
  0x8f   :  { %4492 = vmatpush3.bf16.msra.mxu1 %v4987_v30  ;;  %v5055_v30 = vld [vmem:[%s6943_s1 + $0x798] ss:$12 sps:$4 sm:$0xff]  }
  0x90   :  { %3161 = vmatpush1.bf16.msra.mxu0 %v4983_v29  ;;  %4493 = vmatprep.subr.bf16.mxu1 %v4991_v33  ;;  %v6080_v29 = vld [vmem:[%s6944_s0 + $0x28] sm:$0xff]  ;;  %v5062_v33 = vld [vmem:[%s6943_s1 + $0x7b4] ss:$12 sps:$4 sm:$0xff]  }
  0x91   :  { %3162 = vmatprep.subr.bf16.mxu0 %v4990_v32  ;;  %v6087_v31 = vcombine.high %v6080_v29, %v6080_v29  ;;  %v5059_v32 = vld [vmem:[%s6943_s1 + $0x320] ss:$12 sps:$4 sm:$0xff]  }
  0x93   :  { %4494 = vmatpush3.bf16.msra.mxu1 %v4992_v38  ;;  %v5064_v38 = vld [vmem:[%s6943_s1 + $0x338] ss:$12 sps:$4 sm:$0xff]  }
  0x94   :  { %3163 = vmatpush1.bf16.msra.mxu0 %v4988_v35  ;;  %4495 = vmatprep.subr.bf16.mxu1 %v4996_v40  ;;  %v5063_v35 = vld [vmem:[%s6943_s1 + $0x3f8] ss:$12 sps:$4 sm:$0xff]   ;;  %v5065_v40 = vld [vmem:[%s6943_s1 + $0x7c8] ss:$12 sps:$4 sm:$0xff]  }
  0x95   :  { %3164 = vmatprep.subr.bf16.mxu0 %v4995_v39  ;;  %v5067_v39 = vld [vmem:[%s6943_s1 + $0x7cc] ss:$12 sps:$4 sm:$0xff]  }
  0x97   :  { %4496 = vmatpush3.bf16.msra.mxu1 %v4997_v42  ;;  %v5072_v42 = vld [vmem:[%s6943_s1 + $0x7e4] ss:$12 sps:$4 sm:$0xff]  }
  0x98   :  { %3165 = vmatpush1.bf16.msra.mxu0 %v4993_v41  ;;  %4497 = vmatprep.subr.bf16.mxu1 %v5001_v44  ;;  %v5069_v41 = vld [vmem:[%s6943_s1 + $0x350] ss:$12 sps:$4 sm:$0xff]   ;;  %v5070_v44 = vld [vmem:[%s6943_s1 + $0x7e0] ss:$12 sps:$4 sm:$0xff]  }
  0x99   :  { %3166 = vmatprep.subr.bf16.mxu0 %v5000_v43  ;;  %v5073_v43 = vld [vmem:[%s6943_s1 + $0x428] ss:$12 sps:$4 sm:$0xff]  }
  0x9b   :  { %4498 = vmatpush3.bf16.msra.mxu1 %v5002_v46  ;;  %v5077_v46 = vld [vmem:[%s6943_s1 + $0x7fc] ss:$12 sps:$4 sm:$0xff]  }
  0x9c   :  { %3167 = vmatpush1.bf16.msra.mxu0 %v4998_v45  ;;  %4499 = vmatprep.subr.bf16.mxu1 %v5006_v49  ;;  %v5074_v45 = vld [vmem:[%s6943_s1 + $0x368] ss:$12 sps:$4 sm:$0xff]   ;;  %v5075_v49 = vld [vmem:[%s6943_s1 + $0x7f8] ss:$12 sps:$4 sm:$0xff]  }
  0x9d   :  { %3168 = vmatprep.subr.bf16.mxu0 %v5005_v47  ;;  %v5078_v47 = vld [vmem:[%s6943_s1 + $0x440] ss:$12 sps:$4 sm:$0xff]  }
  0x9f   :  { %4500 = vmatpush3.bf16.msra.mxu1 %v5007_v51  ;;  %v5082_v51 = vld [vmem:[%s6943_s1 + $0x814] ss:$12 sps:$4 sm:$0xff]  }
  0xa0   :  { %3169 = vmatpush1.bf16.msra.mxu0 %v5003_v50  ;;  %4507 = vmatprep.subr.bf16.mxu1 %v5011_v54  ;;  %v5079_v50 = vld [vmem:[%s6943_s1 + $0x380] ss:$12 sps:$4 sm:$0xff]   ;;  %v5080_v54 = vld [vmem:[%s6943_s1 + $0x810] ss:$12 sps:$4 sm:$0xff]  }
  0xa1   :  { %3170 = vmatprep.subr.bf16.mxu0 %v5010_v52  ;;  %v5083_v52 = vld [vmem:[%s6943_s1 + $0x458] ss:$12 sps:$4 sm:$0xff]  }
  0xa2   :  { %3392 = vmatmul.mubr.bf16.vlgmr.msra.gmra.mrb[4].mxu1 %v5628_v6  ;;  %v5021_v6 = vld [vmem:[%s6943_s1 + $0x278] ss:$12 sps:$4 sm:$0xff]  }
  0xa3   :  { %4508 = vmatpush3.bf16.msra.mxu1 %v5012_v56  ;;  %3431 = vmatprep.mubr.bf16.mxu1 %v5724_v36  ;;  %v5023_v36 = vld [vmem:[%s6943_s1 + $0x708] ss:$12 sps:$4 sm:$0xff]   ;;  %v5087_v56 = vld [vmem:[%s6943_s1 + $0x82c] ss:$12 sps:$4 sm:$0xff]  }
  0xa4   :  { %3171 = vmatpush1.bf16.msra.mxu0 %v5008_v55  ;;  %4509 = vmatprep.subr.bf16.mxu1 %v5016_v58  ;;  %v5084_v55 = vld [vmem:[%s6943_s1 + $0x398] ss:$12 sps:$4 sm:$0xff]   ;;  %v5085_v58 = vld [vmem:[%s6943_s1 + $0x828] ss:$12 sps:$4 sm:$0xff]  }
  0xa5   :  { %3172 = vmatprep.subr.bf16.mxu0 %v5015_v57  ;;  %v5088_v57 = vld [vmem:[%s6943_s1 + $0x470] ss:$12 sps:$4 sm:$0xff]  }
  0xa7   :  { %4510 = vmatpush3.bf16.msra.mxu1 %v5017_v60  ;;  %v5092_v60 = vld [vmem:[%s6943_s1 + $0x844] ss:$12 sps:$4 sm:$0xff]  }
  0xa8   :  { %3173 = vmatpush1.bf16.msra.mxu0 %v5013_v59  ;;  %4511 = vmatprep.subr.bf16.mxu1 %v5021_v6  ;;  %v5089_v59 = vld [vmem:[%s6943_s1 + $0x3b0] ss:$12 sps:$4 sm:$0xff]   ;;  %v5090_v6 = vld [vmem:[%s6943_s1 + $0x840] ss:$12 sps:$4 sm:$0xff]  }
  0xa9   :  { %3174 = vmatprep.subr.bf16.mxu0 %v5020_v61  ;;  %v5093_v61 = vld [vmem:[%s6943_s1 + $0x548] ss:$12 sps:$4 sm:$0xff]  }
  0xab   :  { %4512 = vmatpush3.bf16.msra.mxu1 %v5022_v63  ;;  %v5097_v63 = vld [vmem:[%s6943_s1 + $0x85c] ss:$12 sps:$4 sm:$0xff]  }
  0xac   :  { %3175 = vmatpush1.bf16.msra.mxu0 %v5018_v62  ;;  %4513 = vmatprep.subr.bf16.mxu1 %v5026_v1  ;;  %v5094_v62 = vld [vmem:[%s6943_s1 + $0x488] ss:$12 sps:$4 sm:$0xff]   ;;  %v5095_v1 = vld [vmem:[%s6943_s1 + $0x858] ss:$12 sps:$4 sm:$0xff]  }
  0xad   :  { %3176 = vmatprep.subr.bf16.mxu0 %v5025_v0  ;;  %v5098_v0 = vld [vmem:[%s6943_s1 + $0x560] ss:$12 sps:$4 sm:$0xff]  }
  0xaf   :  { %4514 = vmatpush3.bf16.msra.mxu1 %v5027_v2  ;;  %v5102_v2 = vld [vmem:[%s6943_s1 + $0x874] ss:$12 sps:$4 sm:$0xff]  }
  0xb0   :  { %3177 = vmatpush1.bf16.msra.mxu0 %v5023_v36  ;;  %4515 = vmatprep.subr.bf16.mxu1 %v5031_v4  ;;  %v5099_v36 = vld [vmem:[%s6943_s1 + $0x4a0] ss:$12 sps:$4 sm:$0xff]   ;;  %v5104_v4 = vld [vmem:[%s6943_s1 + $0x4b8] ss:$12 sps:$4 sm:$0xff]  }
  0xb1   :  { %3178 = vmatprep.subr.bf16.mxu0 %v5030_v3  ;;  %v5100_v3 = vld [vmem:[%s6943_s1 + $0x870] ss:$12 sps:$4 sm:$0xff]  }
  0xb3   :  { %4516 = vmatpush3.bf16.msra.mxu1 %v5032_v8  ;;  %v5105_v8 = vld [vmem:[%s6943_s1 + $0x888] ss:$12 sps:$4 sm:$0xff]  }
  0xb4   :  { %3179 = vmatpush1.bf16.msra.mxu0 %v5028_v5  ;;  %4517 = vmatprep.subr.bf16.mxu1 %v5036_v10  ;;  %v5107_v5 = vld [vmem:[%s6943_s1 + $0x88c] ss:$12 sps:$4 sm:$0xff]   ;;  %v5112_v10 = vld [vmem:[%s6943_s1 + $0x8a4] ss:$12 sps:$4 sm:$0xff]  }
  0xb5   :  { %3180 = vmatprep.subr.bf16.mxu0 %v5035_v9  ;;  %v5109_v9 = vld [vmem:[%s6943_s1 + $0x4d0] ss:$12 sps:$4 sm:$0xff]  }
  0xb7   :  { %4518 = vmatpush3.bf16.msra.mxu1 %v5037_v12  ;;  %v5110_v12 = vld [vmem:[%s6943_s1 + $0x8a0] ss:$12 sps:$4 sm:$0xff]  }
  0xb8   :  { %3181 = vmatpush1.bf16.msra.mxu0 %v5033_v11  ;;  %4519 = vmatprep.subr.bf16.mxu1 %v5041_v14  ;;  %v5113_v11 = vld [vmem:[%s6943_s1 + $0x5a8] ss:$12 sps:$4 sm:$0xff]  }
  0xb9   :  { %3182 = vmatprep.subr.bf16.mxu0 %v5040_v13  ;;  %v5114_v13 = vld [vmem:[%s6943_s1 + $0x4e8] ss:$12 sps:$4 sm:$0xff]  }
  0xba   :  { %v5117_v14 = vld [vmem:[%s6943_s1 + $0x8bc] ss:$12 sps:$4 sm:$0xff]  }
  0xbb   :  { %4520 = vmatpush3.bf16.msra.mxu1 %v5042_v18  ;;  %v5115_v18 = vld [vmem:[%s6943_s1 + $0x8b8] ss:$12 sps:$4 sm:$0xff]  }
  0xbc   :  { %3183 = vmatpush1.bf16.msra.mxu0 %v5038_v15  ;;  %4521 = vmatprep.subr.bf16.mxu1 %v5046_v20  ;;  %v5118_v15 = vld [vmem:[%s6943_s1 + $0x5c0] ss:$12 sps:$4 sm:$0xff]  }
  0xbd   :  { %3184 = vmatprep.subr.bf16.mxu0 %v5045_v19  ;;  %v5119_v19 = vld [vmem:[%s6943_s1 + $0x500] ss:$12 sps:$4 sm:$0xff]  }
  0xbe   :  { %v5122_v20 = vld [vmem:[%s6943_s1 + $0x8d4] ss:$12 sps:$4 sm:$0xff]  }
  0xbf   :  { %4522 = vmatpush3.bf16.msra.mxu1 %v5047_v22  ;;  %v5120_v22 = vld [vmem:[%s6943_s1 + $0x8d0] ss:$12 sps:$4 sm:$0xff]  }
  0xc0   :  { %3185 = vmatpush1.bf16.msra.mxu0 %v5043_v21  ;;  %4529 = vmatprep.subr.bf16.mxu1 %v5053_v24  ;;  %v5123_v21 = vld [vmem:[%s6943_s1 + $0x5d8] ss:$12 sps:$4 sm:$0xff]  }
  0xc1   :  { %3195 = vmatprep.subr.bf16.mxu0 %v5052_v23  ;;  %v5124_v23 = vld [vmem:[%s6943_s1 + $0x518] ss:$12 sps:$4 sm:$0xff]  }
  0xc2   :  { %3432 = vmatmul.mubr.bf16.vlgmr.msra.gmra.mrb[8].mxu1 %v5848_v16  ;;  %v5060_v16 = vld [vmem:[%s6943_s1 + $0x7b0] ss:$12 sps:$4 sm:$0xff]   ;;  %v5127_v24 = vld [vmem:[%s6943_s1 + $0x8ec] ss:$12 sps:$4 sm:$0xff]  }
  0xc3   :  { %3187 = vmatmul.mubr.bf16.vlgmr.msra.gmra.mrb[0].mxu0 %v6063_v25  ;;  %4530 = vmatpush3.bf16.msra.mxu1 %v5054_v27  ;;  %v5125_v27 = vld [vmem:[%s6943_s1 + $0x8e8] ss:$12 sps:$4 sm:$0xff]  }
  0xc4   :  { %3196 = vmatpush1.bf16.msra.mxu0 %v5050_v26  ;;  %4531 = vmatprep.subr.bf16.mxu1 %v5058_v48  ;;  %v5128_v26 = vld [vmem:[%s6943_s1 + $0x5f0] ss:$12 sps:$4 sm:$0xff]  }
  0xc5   :  { %3197 = vmatprep.subr.bf16.mxu0 %v5057_v28  ;;  %3471 = vmatprep.mubr.bf16.mxu1 %v5576_v53  ;;  %v5068_v53 = vld [vmem:[%s6943_s1 + $0x410] ss:$12 sps:$4 sm:$0xff]  }
  0xc6   :  { %3227 = vmatprep.mubr.bf16.mxu0 %v6087_v31  ;;  %v5129_v28 = vld [vmem:[%s6943_s1 + $0x530] ss:$12 sps:$4 sm:$0xff]  }
  0xc7   :  { %4532 = vmatpush3.bf16.msra.mxu1 %v5059_v32  ;;  %v5134_v48 = vld [vmem:[%s6943_s1 + $0x904] ss:$12 sps:$4 sm:$0xff]   ;;  %v5132_v32 = vld [vmem:[%s6943_s1 + $0x900] ss:$12 sps:$4 sm:$0xff]  }
  0xc8   :  { %3198 = vmatpush1.bf16.msra.mxu0 %v5055_v30  ;;  %4533 = vmatprep.subr.bf16.mxu1 %v5063_v35  ;;  %v5135_v30 = vld [vmem:[%s6943_s1 + $0x6c8] ss:$12 sps:$4 sm:$0xff]  }
  0xc9   :  { %3199 = vmatprep.subr.bf16.mxu0 %v5062_v33  ;;  %v6277_v33 = vcombine.low %v6080_v29, %v6080_v29  ;;  %v5136_v35 = vld [vmem:[%s6943_s1 + $0x608] ss:$12 sps:$4 sm:$0xff]   ;;  %v5140_v29 = vld [vmem:[%s6943_s1 + $0x6e0] ss:$12 sps:$4 sm:$0xff]  }
  0xcb   :  { %4534 = vmatpush3.bf16.msra.mxu1 %v5064_v38  ;;  %v5139_v38 = vld [vmem:[%s6943_s1 + $0x91c] ss:$12 sps:$4 sm:$0xff]  }
  0xcc   :  { %3200 = vmatpush1.bf16.msra.mxu0 %v5060_v16  ;;  %4535 = vmatprep.subr.bf16.mxu1 %v5068_v53  ;;  %v6285_v16 = vld [vmem:[%s6944_s0 + $0x30] sm:$0xff] }
  0xcd   :  { %3201 = vmatprep.subr.bf16.mxu0 %v5067_v39  ;;  %v5137_v39 = vld [vmem:[%s6943_s1 + $0x918] ss:$12 sps:$4 sm:$0xff]   ;;  %v6298_v53 = vcombine.high %v6285_v16, %v6285_v16 }
  0xcf   :  { %4536 = vmatpush3.bf16.msra.mxu1 %v5069_v41  ;;  %v5144_v41 = vld [vmem:[%s6943_s1 + $0x934] ss:$12 sps:$4 sm:$0xff]  }
  0xd0   :  { %3202 = vmatpush1.bf16.msra.mxu0 %v5065_v40  ;;  %4537 = vmatprep.subr.bf16.mxu1 %v5073_v43  ;;  %v5141_v40 = vld [vmem:[%s6943_s1 + $0x620] ss:$12 sps:$4 sm:$0xff]   ;;  %v5146_v43 = vld [vmem:[%s6943_s1 + $0x638] ss:$12 sps:$4 sm:$0xff]  }
  0xd1   :  { %3203 = vmatprep.subr.bf16.mxu0 %v5072_v42  ;;  %v5145_v42 = vld [vmem:[%s6943_s1 + $0x6f8] ss:$12 sps:$4 sm:$0xff]  }
  0xd3   :  { %4538 = vmatpush3.bf16.msra.mxu1 %v5074_v45  ;;  %v5147_v45 = vld [vmem:[%s6943_s1 + $0x948] ss:$12 sps:$4 sm:$0xff]  }
  0xd4   :  { %3204 = vmatpush1.bf16.msra.mxu0 %v5070_v44  ;;  %4539 = vmatprep.subr.bf16.mxu1 %v5078_v47  ;;  %v5149_v44 = vld [vmem:[%s6943_s1 + $0x94c] ss:$12 sps:$4 sm:$0xff]   ;;  %v5154_v47 = vld [vmem:[%s6943_s1 + $0x964] ss:$12 sps:$4 sm:$0xff]  }
  0xd5   :  { %3205 = vmatprep.subr.bf16.mxu0 %v5077_v46  ;;  %v5151_v46 = vld [vmem:[%s6943_s1 + $0x650] ss:$12 sps:$4 sm:$0xff]  }
  0xd7   :  { %4540 = vmatpush3.bf16.msra.mxu1 %v5079_v50  ;;  %v5152_v50 = vld [vmem:[%s6943_s1 + $0x960] ss:$12 sps:$4 sm:$0xff]  }
  0xd8   :  { %3206 = vmatpush1.bf16.msra.mxu0 %v5075_v49  ;;  %4541 = vmatprep.subr.bf16.mxu1 %v5083_v52  ;;  %v5155_v49 = vld [vmem:[%s6943_s1 + $0x728] ss:$12 sps:$4 sm:$0xff]  }
  0xd9   :  { %3207 = vmatprep.subr.bf16.mxu0 %v5082_v51  ;;  %v5156_v51 = vld [vmem:[%s6943_s1 + $0x668] ss:$12 sps:$4 sm:$0xff]  }
  0xda   :  { %v5159_v52 = vld [vmem:[%s6943_s1 + $0x97c] ss:$12 sps:$4 sm:$0xff]  }
  0xdb   :  { %4542 = vmatpush3.bf16.msra.mxu1 %v5084_v55  ;;  %v5157_v55 = vld [vmem:[%s6943_s1 + $0x978] ss:$12 sps:$4 sm:$0xff]  }
  0xdc   :  { %3208 = vmatpush1.bf16.msra.mxu0 %v5080_v54  ;;  %4543 = vmatprep.subr.bf16.mxu1 %v5088_v57  ;;  %v5160_v54 = vld [vmem:[%s6943_s1 + $0x740] ss:$12 sps:$4 sm:$0xff]  }
  0xdd   :  { %3209 = vmatprep.subr.bf16.mxu0 %v5087_v56  ;;  %v5161_v56 = vld [vmem:[%s6943_s1 + $0x680] ss:$12 sps:$4 sm:$0xff]  }
  0xde   :  { %v5164_v57 = vld [vmem:[%s6943_s1 + $0x994] ss:$12 sps:$4 sm:$0xff]  }
  0xdf   :  { %4544 = vmatpush3.bf16.msra.mxu1 %v5089_v59  ;;  %v5162_v59 = vld [vmem:[%s6943_s1 + $0x990] ss:$12 sps:$4 sm:$0xff]  }
  0xe0   :  { %3210 = vmatpush1.bf16.msra.mxu0 %v5085_v58  ;;  %4551 = vmatprep.subr.bf16.mxu1 %v5093_v61  ;;  %v5165_v58 = vld [vmem:[%s6943_s1 + $0x758] ss:$12 sps:$4 sm:$0xff]  }
  0xe1   :  { %3211 = vmatprep.subr.bf16.mxu0 %v5092_v60  ;;  %v5166_v60 = vld [vmem:[%s6943_s1 + $0x698] ss:$12 sps:$4 sm:$0xff]  }
  0xe2   :  { %3472 = vmatmul.mubr.bf16.vlgmr.msra.gmra.mrb[12].mxu1 %v5630_v7  ;;  %v5103_v7 = vld [vmem:[%s6943_s1 + $0x578] ss:$12 sps:$4 sm:$0xff]  }
  0xe3   :  { %4552 = vmatpush3.bf16.msra.mxu1 %v5094_v62  ;;  %3511 = vmatprep.mubr.bf16.mxu1 %v5728_v37  ;;  %v5108_v37 = vld [vmem:[%s6943_s1 + $0x590] ss:$12 sps:$4 sm:$0xff]   ;;  %v5169_v61 = vld [vmem:[%s6943_s1 + $0x9ac] ss:$12 sps:$4 sm:$0xff]   ;;  %v5167_v62 = vld [vmem:[%s6943_s1 + $0x9a8] ss:$12 sps:$4 sm:$0xff]  }
  0xe4   :  { %3212 = vmatpush1.bf16.msra.mxu0 %v5090_v6  ;;  %4553 = vmatprep.subr.bf16.mxu1 %v5098_v0  ;;  %v5170_v6 = vld [vmem:[%s6943_s1 + $0x770] ss:$12 sps:$4 sm:$0xff]  }
  0xe5   :  { %3213 = vmatprep.subr.bf16.mxu0 %v5097_v63  ;;  %v5171_v63 = vld [vmem:[%s6943_s1 + $0x6b0] ss:$12 sps:$4 sm:$0xff]  }
  0xe6   :  { %v5174_v0 = vld [vmem:[%s6943_s1 + $0x9c4] ss:$12 sps:$4 sm:$0xff]  }
  0xe7   :  { %4554 = vmatpush3.bf16.msra.mxu1 %v5099_v36  ;;  %v5172_v36 = vld [vmem:[%s6943_s1 + $0x9c0] ss:$12 sps:$4 sm:$0xff]  }
  0xe8   :  { %3214 = vmatpush1.bf16.msra.mxu0 %v5095_v1  ;;  %4555 = vmatprep.subr.bf16.mxu1 %v5103_v7  ;;  %v5175_v1 = vld [vmem:[%s6943_s1 + $0x848] ss:$12 sps:$4 sm:$0xff]  }
  0xe9   :  { %3215 = vmatprep.subr.bf16.mxu0 %v5102_v2  ;;  %v5176_v2 = vld [vmem:[%s6943_s1 + $0x788] ss:$12 sps:$4 sm:$0xff]  }
  0xea   :  { %v5179_v7 = vld [vmem:[%s6943_s1 + $0x9dc] ss:$12 sps:$4 sm:$0xff]  }
  0xeb   :  { %4556 = vmatpush3.bf16.msra.mxu1 %v5104_v4  ;;  %v5177_v4 = vld [vmem:[%s6943_s1 + $0x9d8] ss:$12 sps:$4 sm:$0xff]  }
  0xec   :  { %3216 = vmatpush1.bf16.msra.mxu0 %v5100_v3  ;;  %4557 = vmatprep.subr.bf16.mxu1 %v5108_v37  ;;  %v5180_v3 = vld [vmem:[%s6943_s1 + $0x860] ss:$12 sps:$4 sm:$0xff]  }
  0xed   :  { %3217 = vmatprep.subr.bf16.mxu0 %v5107_v5  ;;  %v5181_v5 = vld [vmem:[%s6943_s1 + $0x7a0] ss:$12 sps:$4 sm:$0xff]  }
  0xee   :  { %v5184_v37 = vld [vmem:[%s6943_s1 + $0x9f4] ss:$12 sps:$4 sm:$0xff]  }
  0xef   :  { %4558 = vmatpush3.bf16.msra.mxu1 %v5109_v9  ;;  %v5186_v9 = vld [vmem:[%s6943_s1 + $0x7b8] ss:$12 sps:$4 sm:$0xff]  }
  0xf0   :  { %3218 = vmatpush1.bf16.msra.mxu0 %v5105_v8  ;;  %4559 = vmatprep.subr.bf16.mxu1 %v5113_v11  ;;  %v5182_v8 = vld [vmem:[%s6943_s1 + $0x9f0] ss:$12 sps:$4 sm:$0xff]   ;;  %v5187_v11 = vld [vmem:[%s6943_s1 + $0xa08] ss:$12 sps:$4 sm:$0xff]  }
  0xf1   :  { %3219 = vmatprep.subr.bf16.mxu0 %v5112_v10  ;;  %v5189_v10 = vld [vmem:[%s6943_s1 + $0xa0c] ss:$12 sps:$4 sm:$0xff]  }
  0xf3   :  { %4560 = vmatpush3.bf16.msra.mxu1 %v5114_v13  ;;  %v5194_v13 = vld [vmem:[%s6943_s1 + $0xa24] ss:$12 sps:$4 sm:$0xff]  }
  0xf4   :  { %3220 = vmatpush1.bf16.msra.mxu0 %v5110_v12  ;;  %4561 = vmatprep.subr.bf16.mxu1 %v5118_v15  ;;  %v5191_v12 = vld [vmem:[%s6943_s1 + $0x7d0] ss:$12 sps:$4 sm:$0xff]   ;;  %v5192_v15 = vld [vmem:[%s6943_s1 + $0xa20] ss:$12 sps:$4 sm:$0xff]  }
  0xf5   :  { %3221 = vmatprep.subr.bf16.mxu0 %v5117_v14  ;;  %v5195_v14 = vld [vmem:[%s6943_s1 + $0x8a8] ss:$12 sps:$4 sm:$0xff]  }
  0xf7   :  { %4562 = vmatpush3.bf16.msra.mxu1 %v5119_v19  ;;  %v5199_v19 = vld [vmem:[%s6943_s1 + $0xa3c] ss:$12 sps:$4 sm:$0xff]  }
  0xf8   :  { %3222 = vmatpush1.bf16.msra.mxu0 %v5115_v18  ;;  %4563 = vmatprep.subr.bf16.mxu1 %v5123_v21  ;;  %v5196_v18 = vld [vmem:[%s6943_s1 + $0x7e8] ss:$12 sps:$4 sm:$0xff]   ;;  %v5197_v21 = vld [vmem:[%s6943_s1 + $0xa38] ss:$12 sps:$4 sm:$0xff]  }
  0xf9   :  { %3223 = vmatprep.subr.bf16.mxu0 %v5122_v20  ;;  %v5200_v20 = vld [vmem:[%s6943_s1 + $0x8c0] ss:$12 sps:$4 sm:$0xff]  }
  0xfb   :  { %4564 = vmatpush3.bf16.msra.mxu1 %v5124_v23  ;;  %v5204_v23 = vld [vmem:[%s6943_s1 + $0xa54] ss:$12 sps:$4 sm:$0xff]  }
  0xfc   :  { %3224 = vmatpush1.bf16.msra.mxu0 %v5120_v22  ;;  %4565 = vmatprep.subr.bf16.mxu1 %v5128_v26  ;;  %v5201_v22 = vld [vmem:[%s6943_s1 + $0x800] ss:$12 sps:$4 sm:$0xff]   ;;  %v5202_v26 = vld [vmem:[%s6943_s1 + $0xa50] ss:$12 sps:$4 sm:$0xff]  }
  0xfd   :  { %3225 = vmatprep.subr.bf16.mxu0 %v5127_v24  ;;  %v5205_v24 = vld [vmem:[%s6943_s1 + $0x8d8] ss:$12 sps:$4 sm:$0xff]  }
  0xff   :  { %4566 = vmatpush3.bf16.msra.mxu1 %v5129_v28  ;;  %v5209_v28 = vld [vmem:[%s6943_s1 + $0xa6c] ss:$12 sps:$4 sm:$0xff]  }
 0x100   :  { %3226 = vmatpush1.bf16.msra.mxu0 %v5125_v27  ;;  %4573 = vmatprep.subr.bf16.mxu1 %v5135_v30  ;;  %v5206_v27 = vld [vmem:[%s6943_s1 + $0x818] ss:$12 sps:$4 sm:$0xff]   ;;  %v5207_v30 = vld [vmem:[%s6943_s1 + $0xa68] ss:$12 sps:$4 sm:$0xff]  }
 0x101   :  { %3236 = vmatprep.subr.bf16.mxu0 %v5134_v48  ;;  %v5210_v48 = vld [vmem:[%s6943_s1 + $0x8f0] ss:$12 sps:$4 sm:$0xff]  }
 0x102   :  { %3512 = vmatmul.mubr.bf16.vlgmr.msra.gmra.mrb[16].mxu1 %v5852_v17  ;;  %v5142_v17 = vld [vmem:[%s6943_s1 + $0x930] ss:$12 sps:$4 sm:$0xff]  }
 0x103   :  { %3228 = vmatmul.mubr.bf16.vlgmr.msra.gmra.mrb[0].mxu0 %v6277_v33  ;;  %4574 = vmatpush3.bf16.msra.mxu1 %v5136_v35  ;;  %v5216_v35 = vld [vmem:[%s6943_s1 + $0xa84] ss:$12 sps:$4 sm:$0xff]  }
 0x104   :  { %3237 = vmatpush1.bf16.msra.mxu0 %v5132_v32  ;;  %4575 = vmatprep.subr.bf16.mxu1 %v5140_v29  ;;  %v5211_v32 = vld [vmem:[%s6943_s1 + $0x830] ss:$12 sps:$4 sm:$0xff]   ;;  %v5214_v29 = vld [vmem:[%s6943_s1 + $0xa80] ss:$12 sps:$4 sm:$0xff]  }
 0x105   :  { %3238 = vmatprep.subr.bf16.mxu0 %v5139_v38  ;;  %3551 = vmatprep.mubr.bf16.mxu1 %v5912_v34  ;;  %v5150_v34 = vld [vmem:[%s6943_s1 + $0x710] ss:$12 sps:$4 sm:$0xff]   ;;  %v5217_v38 = vld [vmem:[%s6943_s1 + $0x9c8] ss:$12 sps:$4 sm:$0xff]  }
 0x106   :  { %3268 = vmatprep.mubr.bf16.mxu0 %v6298_v53 }
 0x107   :  { %4576 = vmatpush3.bf16.msra.mxu1 %v5141_v40  ;;  %v5218_v40 = vld [vmem:[%s6943_s1 + $0x908] ss:$12 sps:$4 sm:$0xff]  }
 0x108   :  { %3239 = vmatpush1.bf16.msra.mxu0 %v5137_v39  ;;  %4577 = vmatprep.subr.bf16.mxu1 %v5145_v42  ;;  %v6488_v39 = vcombine.low %v6285_v16, %v6285_v16  ;;  %v5221_v42 = vld [vmem:[%s6943_s1 + $0xa9c] ss:$12 sps:$4 sm:$0xff]   ;;  %v5222_v16 = vld [vmem:[%s6943_s1 + $0x9e0] ss:$12 sps:$4 sm:$0xff]  }
 0x109   :  { %3240 = vmatprep.subr.bf16.mxu0 %v5144_v41  ;;  %v6496_v41 = vld [vmem:[%s6944_s0 + $0x38] sm:$0xff] }
 0x10b   :  { %4578 = vmatpush3.bf16.msra.mxu1 %v5146_v43  ;;  %v6509_v43 = vcombine.high %v6496_v41, %v6496_v41 }
 0x10c   :  { %3241 = vmatpush1.bf16.msra.mxu0 %v5142_v17  ;;  %4579 = vmatprep.subr.bf16.mxu1 %v5150_v34  ;;  %v5219_v17 = vld [vmem:[%s6943_s1 + $0xa98] ss:$12 sps:$4 sm:$0xff]   ;;  %v5226_v34 = vld [vmem:[%s6943_s1 + $0xab4] ss:$12 sps:$4 sm:$0xff]  }
 0x10d   :  { %3242 = vmatprep.subr.bf16.mxu0 %v5149_v44  ;;  %v5223_v44 = vld [vmem:[%s6943_s1 + $0x920] ss:$12 sps:$4 sm:$0xff]  }
 0x10f   :  { %4580 = vmatpush3.bf16.msra.mxu1 %v5151_v46  ;;  %v5228_v46 = vld [vmem:[%s6943_s1 + $0x938] ss:$12 sps:$4 sm:$0xff]  }
 0x110   :  { %3243 = vmatpush1.bf16.msra.mxu0 %v5147_v45  ;;  %4581 = vmatprep.subr.bf16.mxu1 %v5155_v49  ;;  %v5227_v45 = vld [vmem:[%s6943_s1 + $0x9f8] ss:$12 sps:$4 sm:$0xff]   ;;  %v5229_v49 = vld [vmem:[%s6943_s1 + $0xac8] ss:$12 sps:$4 sm:$0xff]  }
 0x111   :  { %3244 = vmatprep.subr.bf16.mxu0 %v5154_v47  ;;  %v5231_v47 = vld [vmem:[%s6943_s1 + $0xacc] ss:$12 sps:$4 sm:$0xff]  }
 0x113   :  { %4582 = vmatpush3.bf16.msra.mxu1 %v5156_v51  ;;  %v5236_v51 = vld [vmem:[%s6943_s1 + $0xae4] ss:$12 sps:$4 sm:$0xff]  }
 0x114   :  { %3245 = vmatpush1.bf16.msra.mxu0 %v5152_v50  ;;  %4583 = vmatprep.subr.bf16.mxu1 %v5160_v54  ;;  %v5233_v50 = vld [vmem:[%s6943_s1 + $0x950] ss:$12 sps:$4 sm:$0xff]   ;;  %v5234_v54 = vld [vmem:[%s6943_s1 + $0xae0] ss:$12 sps:$4 sm:$0xff]  }
 0x115   :  { %3246 = vmatprep.subr.bf16.mxu0 %v5159_v52  ;;  %v5237_v52 = vld [vmem:[%s6943_s1 + $0xa28] ss:$12 sps:$4 sm:$0xff]  }
 0x117   :  { %4584 = vmatpush3.bf16.msra.mxu1 %v5161_v56  ;;  %v5241_v56 = vld [vmem:[%s6943_s1 + $0xafc] ss:$12 sps:$4 sm:$0xff]  }
 0x118   :  { %3247 = vmatpush1.bf16.msra.mxu0 %v5157_v55  ;;  %4585 = vmatprep.subr.bf16.mxu1 %v5165_v58  ;;  %v5238_v55 = vld [vmem:[%s6943_s1 + $0x968] ss:$12 sps:$4 sm:$0xff]   ;;  %v5239_v58 = vld [vmem:[%s6943_s1 + $0xaf8] ss:$12 sps:$4 sm:$0xff]  }
 0x119   :  { %3248 = vmatprep.subr.bf16.mxu0 %v5164_v57  ;;  %v5242_v57 = vld [vmem:[%s6943_s1 + $0xa40] ss:$12 sps:$4 sm:$0xff]  }
 0x11b   :  { %4586 = vmatpush3.bf16.msra.mxu1 %v5166_v60  ;;  %v5246_v60 = vld [vmem:[%s6943_s1 + $0xb14] ss:$12 sps:$4 sm:$0xff]  }
 0x11c   :  { %3249 = vmatpush1.bf16.msra.mxu0 %v5162_v59  ;;  %4587 = vmatprep.subr.bf16.mxu1 %v5170_v6  ;;  %v5243_v59 = vld [vmem:[%s6943_s1 + $0x980] ss:$12 sps:$4 sm:$0xff]  }
 0x11d   :  { %3250 = vmatprep.subr.bf16.mxu0 %v5169_v61  ;;  %v5247_v61 = vld [vmem:[%s6943_s1 + $0xa58] ss:$12 sps:$4 sm:$0xff]  }
 0x11f   :  { %4588 = vmatpush3.bf16.msra.mxu1 %v5171_v63 }
 0x120   :  { %3251 = vmatpush1.bf16.msra.mxu0 %v5167_v62  ;;  %4595 = vmatprep.subr.bf16.mxu1 %v5175_v1  ;;  %v5248_v1 = vld [vmem:[%s6943_s1 + $0x998] ss:$12 sps:$4 sm:$0xff]  }
 0x121   :  { %3252 = vmatprep.subr.bf16.mxu0 %v5174_v0  ;;  %v5244_v0 = vld [vmem:[%s6943_s1 + $0xb10] ss:$12 sps:$4 sm:$0xff]  }
 0x122   :  { %3552 = vmatmul.mubr.bf16.vlgmr.msra.gmra.mrb[20].mxu1 %v6063_v25  ;;  %v5185_v25 = vld [vmem:[%s6943_s1 + $0x878] ss:$12 sps:$4 sm:$0xff]  }
 0x123   :  { %4596 = vmatpush3.bf16.msra.mxu1 %v5176_v2  ;;  %3591 = vmatprep.mubr.bf16.mxu1 %v6087_v31  ;;  %v5190_v31 = vld [vmem:[%s6943_s1 + $0x890] ss:$12 sps:$4 sm:$0xff]   ;;  %v5251_v2 = vld [vmem:[%s6943_s1 + $0xb2c] ss:$12 sps:$4 sm:$0xff]  }
 0x124   :  { %3253 = vmatpush1.bf16.msra.mxu0 %v5172_v36  ;;  %4597 = vmatprep.subr.bf16.mxu1 %v5180_v3  ;;  %v5249_v3 = vld [vmem:[%s6943_s1 + $0xb28] ss:$12 sps:$4 sm:$0xff]  }
 0x125   :  { %3254 = vmatprep.subr.bf16.mxu0 %v5179_v7  ;;  %v5252_v7 = vld [vmem:[%s6943_s1 + $0xa70] ss:$12 sps:$4 sm:$0xff]  }
 0x127   :  { %4598 = vmatpush3.bf16.msra.mxu1 %v5181_v5  ;;  %v5256_v5 = vld [vmem:[%s6943_s1 + $0xb44] ss:$12 sps:$4 sm:$0xff]  }
 0x128   :  { %3255 = vmatpush1.bf16.msra.mxu0 %v5177_v4  ;;  %4599 = vmatprep.subr.bf16.mxu1 %v5185_v25  ;;  %v5253_v4 = vld [vmem:[%s6943_s1 + $0x9b0] ss:$12 sps:$4 sm:$0xff]   ;;  %v5254_v25 = vld [vmem:[%s6943_s1 + $0xb40] ss:$12 sps:$4 sm:$0xff]  }
 0x129   :  { %3256 = vmatprep.subr.bf16.mxu0 %v5184_v37  ;;  %v5257_v37 = vld [vmem:[%s6943_s1 + $0xb48] ss:$12 sps:$4 sm:$0xff]  }
 0x12b   :  { %4600 = vmatpush3.bf16.msra.mxu1 %v5186_v9  ;;  %v5261_v9 = vld [vmem:[%s6943_s1 + $0xb5c] ss:$12 sps:$4 sm:$0xff]  }
 0x12c   :  { %3257 = vmatpush1.bf16.msra.mxu0 %v5182_v8  ;;  %4601 = vmatprep.subr.bf16.mxu1 %v5190_v31  ;;  %v5258_v8 = vld [vmem:[%s6943_s1 + $0xa88] ss:$12 sps:$4 sm:$0xff]   ;;  %v5259_v31 = vld [vmem:[%s6943_s1 + $0xb58] ss:$12 sps:$4 sm:$0xff]  }
 0x12d   :  { %3258 = vmatprep.subr.bf16.mxu0 %v5189_v10  ;;  %v5262_v10 = vld [vmem:[%s6943_s1 + $0xb60] ss:$12 sps:$4 sm:$0xff]  }
 0x12f   :  { %4602 = vmatpush3.bf16.msra.mxu1 %v5191_v12  ;;  %v5266_v12 = vld [vmem:[%s6943_s1 + $0xb74] ss:$12 sps:$4 sm:$0xff]  }
 0x130   :  { %3259 = vmatpush1.bf16.msra.mxu0 %v5187_v11  ;;  %4603 = vmatprep.subr.bf16.mxu1 %v5195_v14  ;;  %v5263_v11 = vld [vmem:[%s6943_s1 + $0xaa0] ss:$12 sps:$4 sm:$0xff]   ;;  %v5264_v14 = vld [vmem:[%s6943_s1 + $0xb70] ss:$12 sps:$4 sm:$0xff]  }
 0x131   :  { %3260 = vmatprep.subr.bf16.mxu0 %v5194_v13  ;;  %v5267_v13 = vld [vmem:[%s6943_s1 + $0xb78] ss:$12 sps:$4 sm:$0xff]  }
 0x133   :  { %4604 = vmatpush3.bf16.msra.mxu1 %v5196_v18  ;;  %v5271_v18 = vld [vmem:[%s6943_s1 + $0xb8c] ss:$12 sps:$4 sm:$0xff]  }
 0x134   :  { %3261 = vmatpush1.bf16.msra.mxu0 %v5192_v15  ;;  %4605 = vmatprep.subr.bf16.mxu1 %v5200_v20  ;;  %v5268_v15 = vld [vmem:[%s6943_s1 + $0xab8] ss:$12 sps:$4 sm:$0xff]   ;;  %v5269_v20 = vld [vmem:[%s6943_s1 + $0xb88] ss:$12 sps:$4 sm:$0xff]  }
 0x135   :  { %3262 = vmatprep.subr.bf16.mxu0 %v5199_v19  ;;  %v5272_v19 = vld [vmem:[%s6943_s1 + $0xb90] ss:$12 sps:$4 sm:$0xff]  }
 0x137   :  { %4606 = vmatpush3.bf16.msra.mxu1 %v5201_v22  ;;  %v5276_v22 = vld [vmem:[%s6943_s1 + $0xba4] ss:$12 sps:$4 sm:$0xff]  }
 0x138   :  { %3263 = vmatpush1.bf16.msra.mxu0 %v5197_v21  ;;  %4607 = vmatprep.subr.bf16.mxu1 %v5205_v24  ;;  %v5273_v21 = vld [vmem:[%s6943_s1 + $0xad0] ss:$12 sps:$4 sm:$0xff]   ;;  %v5274_v24 = vld [vmem:[%s6943_s1 + $0xba0] ss:$12 sps:$4 sm:$0xff]  }
 0x139   :  { %3264 = vmatprep.subr.bf16.mxu0 %v5204_v23  ;;  %v5277_v23 = vld [vmem:[%s6943_s1 + $0xba8] ss:$12 sps:$4 sm:$0xff]  }
 0x13b   :  { %4608 = vmatpush3.bf16.msra.mxu1 %v5206_v27  ;;  %v5281_v27 = vld [vmem:[%s6943_s1 + $0xbbc] ss:$12 sps:$4 sm:$0xff]  }
 0x13c   :  { %3265 = vmatpush1.bf16.msra.mxu0 %v5202_v26  ;;  %4609 = vmatprep.subr.bf16.mxu1 %v5210_v48  ;;  %v5278_v26 = vld [vmem:[%s6943_s1 + $0xae8] ss:$12 sps:$4 sm:$0xff]   ;;  %v5279_v48 = vld [vmem:[%s6943_s1 + $0xbb8] ss:$12 sps:$4 sm:$0xff]  }
 0x13d   :  { %3266 = vmatprep.subr.bf16.mxu0 %v5209_v28  ;;  %v5282_v28 = vld [vmem:[%s6943_s1 + $0xbc0] ss:$12 sps:$4 sm:$0xff]  }
 0x13f   :  { %4610 = vmatpush3.bf16.msra.mxu1 %v5211_v32  ;;  %v5286_v32 = vld [vmem:[%s6943_s1 + $0xbd4] ss:$12 sps:$4 sm:$0xff]  }
 0x140   :  { %3267 = vmatpush1.bf16.msra.mxu0 %v5207_v30  ;;  %4617 = vmatprep.subr.bf16.mxu1 %v5217_v38  ;;  %v5283_v30 = vld [vmem:[%s6943_s1 + $0xb00] ss:$12 sps:$4 sm:$0xff]  }
 0x141   :  { %3277 = vmatprep.subr.bf16.mxu0 %v5216_v35  ;;  %v5287_v35 = vld [vmem:[%s6943_s1 + $0xbd8] ss:$12 sps:$4 sm:$0xff]  }
 0x142   :  { %3592 = vmatmul.mubr.bf16.vlgmr.msra.gmra.mrb[24].mxu1 %v6277_v33  ;;  %v5224_v33 = vld [vmem:[%s6943_s1 + $0xab0] ss:$12 sps:$4 sm:$0xff]  }
 0x143   :  { %3269 = vmatmul.mubr.bf16.vlgmr.msra.gmra.mrb[0].mxu0 %v6488_v39  ;;  %4618 = vmatpush3.bf16.msra.mxu1 %v5218_v40  ;;  %v5288_v40 = vld [vmem:[%s6943_s1 + $0xb18] ss:$12 sps:$4 sm:$0xff]  }
 0x144   :  { %3278 = vmatpush1.bf16.msra.mxu0 %v5214_v29  ;;  %4619 = vmatprep.subr.bf16.mxu1 %v5222_v16 }
 0x145   :  { %3279 = vmatprep.subr.bf16.mxu0 %v5221_v42  ;;  %3631 = vmatprep.mubr.bf16.mxu1 %v6298_v53  ;;  %v5232_v53 = vld [vmem:[%s6943_s1 + $0xa10] ss:$12 sps:$4 sm:$0xff]  }
 0x146   :  { %3309 = vmatprep.mubr.bf16.mxu0 %v6509_v43 }
 0x147   :  { %4620 = vmatpush3.bf16.msra.mxu1 %v5223_v44 }
 0x148   :  { %3280 = vmatpush1.bf16.msra.mxu0 %v5219_v17  ;;  %4621 = vmatprep.subr.bf16.mxu1 %v5227_v45  ;;  %v5291_v17 = vld [vmem:[%s6943_s1 + $0xbec] ss:$12 sps:$4 sm:$0xff]   ;;  %v5293_v45 = vld [vmem:[%s6943_s1 + $0xb30] ss:$12 sps:$4 sm:$0xff]  }
 0x149   :  { %3281 = vmatprep.subr.bf16.mxu0 %v5226_v34  ;;  %v5289_v34 = vld [vmem:[%s6943_s1 + $0xbe8] ss:$12 sps:$4 sm:$0xff]  }
 0x14b   :  { %4622 = vmatpush3.bf16.msra.mxu1 %v5228_v46  ;;  %v5299_v46 = vld [vmem:[%s6943_s1 + $0xcc8] ss:$12 sps:$4 sm:$0xff]  }
 0x14c   :  { %3282 = vmatpush1.bf16.msra.mxu0 %v5224_v33  ;;  %4623 = vmatprep.subr.bf16.mxu1 %v5232_v53  ;;  %v5298_v33 = vld [vmem:[%s6943_s1 + $0xc04] ss:$12 sps:$4 sm:$0xff]  }
 0x14d   :  { %3283 = vmatprep.subr.bf16.mxu0 %v5231_v47  ;;  %v4024_v47 = vcombine.low %v6496_v41, %v6496_v41  ;;  %v6705_v53 = vld [vmem:[%s6944_s0 + $0x40] sm:$0xff]  ;;  %v5303_v41 = vld [vmem:[%s6943_s1 + $0xc1c] ss:$12 sps:$4 sm:$0xff]  }
 0x14f   :  { %4624 = vmatpush3.bf16.msra.mxu1 %v5233_v50  ;;  %v5300_v50 = vld [vmem:[%s6943_s1 + $0xc08] ss:$12 sps:$4 sm:$0xff]  }
 0x150   :  { %3284 = vmatpush1.bf16.msra.mxu0 %v5229_v49  ;;  %4625 = vmatprep.subr.bf16.mxu1 %v5237_v52  ;;  %v5296_v49 = vld [vmem:[%s6943_s1 + $0xc00] ss:$12 sps:$4 sm:$0xff]   ;;  %v4027_v52 = vcombine.high %v6705_v53, %v6705_v53 }
 0x151   :  { %3285 = vmatprep.subr.bf16.mxu0 %v5236_v51  ;;  %v5304_v51 = vld [vmem:[%s6943_s1 + $0xce0] ss:$12 sps:$4 sm:$0xff]  }
 0x153   :  { %4626 = vmatpush3.bf16.msra.mxu1 %v5238_v55  ;;  %v5305_v55 = vld [vmem:[%s6943_s1 + $0xc20] ss:$12 sps:$4 sm:$0xff]  }
 0x154   :  { %3286 = vmatpush1.bf16.msra.mxu0 %v5234_v54  ;;  %4627 = vmatprep.subr.bf16.mxu1 %v5242_v57  ;;  %v5301_v54 = vld [vmem:[%s6943_s1 + $0xc18] ss:$12 sps:$4 sm:$0xff]  }
 0x155   :  { %3287 = vmatprep.subr.bf16.mxu0 %v5241_v56  ;;  %v6572_v6 = vpop.f32.mrb[0].mxu1  ;;  %v5308_v56 = vld [vmem:[%s6943_s1 + $0xc34] ss:$12 sps:$4 sm:$0xff]   ;;  %v5309_v57 = vld [vmem:[%s6943_s1 + $0xcf8] ss:$12 sps:$4 sm:$0xff]  }
 0x156   :  { %v6574_v62 = vpop.f32.mrb[1].mxu1 }
 0x157   :  { %v3069_v63 = vpop.f32.mrb[2].mxu1  ;;  %4628 = vmatpush3.bf16.msra.mxu1 %v5243_v59  ;;  %v5306_v59 = vld [vmem:[%s6943_s1 + $0xc30] ss:$12 sps:$4 sm:$0xff]  }
 0x158   :  { %3288 = vmatpush1.bf16.msra.mxu0 %v5239_v58  ;;  %v3070_v36 = vpop.f32.mrb[3].mxu1  ;;  %4629 = vmatprep.subr.bf16.mxu1 %v5247_v61  ;;  %v608_v58 = vlaneseq  ;;  %v5313_v61 = vld [vmem:[%s6943_s1 + $0xc4c] ss:$12 sps:$4 sm:$0xff]   ;;  %v5314_v63 = vld [vmem:[%s6943_s1 + $0xd10] ss:$12 sps:$4 sm:$0xff]  }
 0x159   :  { %3289 = vmatprep.subr.bf16.mxu0 %v5246_v60  ;;  %v5310_v60 = vld [vmem:[%s6943_s1 + $0xc38] ss:$12 sps:$4 sm:$0xff]   ;;  %v5315_v36 = vld [vmem:[%s6943_s1 + $0xc50] ss:$12 sps:$4 sm:$0xff]  }
 0x15b   :  { %4630 = vmatpush3.bf16.msra.mxu1 %v5248_v1  ;;  %v5311_v1 = vld [vmem:[%s6943_s1 + $0xc48] ss:$12 sps:$4 sm:$0xff]  }
 0x15c   :  { %3290 = vmatpush1.bf16.msra.mxu0 %v5244_v0  ;;  %4631 = vmatprep.subr.bf16.mxu1 %v5252_v7  ;;  %v6745_v0 = vshrl.u32 %v608_v58, 7  ;;  %v5319_v7 = vld [vmem:[%s6943_s1 + $0xd28] ss:$12 sps:$4 sm:$0xff]  }
 0x15d   :  { %3291 = vmatprep.subr.bf16.mxu0 %v5251_v2  ;;  %v5318_v2 = vld [vmem:[%s6943_s1 + $0xc64] ss:$12 sps:$4 sm:$0xff]  }
 0x15f   :  { %4632 = vmatpush3.bf16.msra.mxu1 %v5253_v4  ;;  %v5316_v4 = vld [vmem:[%s6943_s1 + $0xc60] ss:$12 sps:$4 sm:$0xff]  }
 0x160   :  { %3292 = vmatpush1.bf16.msra.mxu0 %v5249_v3  ;;  %4639 = vmatprep.subr.bf16.mxu1 %v5257_v37  ;;  %v618_v3 = vsub.s32 2, %v6745_v0  ;;  %v6769_v37 = vld [vmem:[%s6945_s2] sm:$0x7] }
 0x161   :  { %3293 = vmatprep.subr.bf16.mxu0 %v5256_v5  ;;  %v5320_v5 = vld [vmem:[%s6943_s1 + $0xc68] ss:$12 sps:$4 sm:$0xff]  }
 0x162   :  { %3632 = vmatmul.mubr.bf16.vlgmr.msra.gmra.mrb[28].mxu1 %v6488_v39  ;;  %v5284_v39 = vld [vmem:[%s6943_s1 + $0xbd0] ss:$12 sps:$4 sm:$0xff]  }
 0x163   :  { %4640 = vmatpush3.bf16.msra.mxu1 %v5258_v8  ;;  %3671 = vmatprep.mubr.bf16.mxu1 %v6509_v43  ;;  %v5292_v43 = vld [vmem:[%s6943_s1 + $0xbf0] ss:$12 sps:$4 sm:$0xff]   ;;  %v5324_v8 = vld [vmem:[%s6943_s1 + $0xd40] ss:$12 sps:$4 sm:$0xff]  }
 0x164   :  { %3294 = vmatpush1.bf16.msra.mxu0 %v5254_v25  ;;  %4641 = vmatprep.subr.bf16.mxu1 %v5262_v10  ;;  %v5323_v25 = vld [vmem:[%s6943_s1 + $0xc7c] ss:$12 sps:$4 sm:$0xff]   ;;  %v5321_v10 = vld [vmem:[%s6943_s1 + $0xc78] ss:$12 sps:$4 sm:$0xff]  }
 0x165   :  { %3295 = vmatprep.subr.bf16.mxu0 %v5261_v9  ;;  %v619_v9 = vrot.slane %v6769_v37, %v618_v3  ;;  %v5364_v3 = vld [vmem:[%s6946_s3 + $0x48] sm:$0xff]  }
 0x167   :  { %4642 = vmatpush3.bf16.msra.mxu1 %v5263_v11  ;;  %v5328_v11 = vld [vmem:[%s6943_s1 + $0xc94] ss:$12 sps:$4 sm:$0xff]  }
 0x168   :  { %3296 = vmatpush1.bf16.msra.mxu0 %v5259_v31  ;;  %4643 = vmatprep.subr.bf16.mxu1 %v5267_v13  ;;  %v5325_v31 = vld [vmem:[%s6943_s1 + $0xc80] ss:$12 sps:$4 sm:$0xff]  }
 0x169   :  { %3297 = vmatprep.subr.bf16.mxu0 %v5266_v12  ;;  %v5329_v12 = vld [vmem:[%s6943_s1 + $0xd58] ss:$12 sps:$4 sm:$0xff]  }
 0x16b   :  { %4644 = vmatpush3.bf16.msra.mxu1 %v5268_v15 }
 0x16c   :  { %3298 = vmatpush1.bf16.msra.mxu0 %v5264_v14  ;;  %4645 = vmatprep.subr.bf16.mxu1 %v5272_v19  ;;  %v5330_v19 = vld [vmem:[%s6943_s1 + $0xc98] ss:$12 sps:$4 sm:$0xff]  }
 0x16d   :  { %3299 = vmatprep.subr.bf16.mxu0 %v5271_v18  ;;  %v5326_v18 = vld [vmem:[%s6943_s1 + $0xc90] ss:$12 sps:$4 sm:$0xff]  }
 0x16f   :  { %4646 = vmatpush3.bf16.msra.mxu1 %v5273_v21 }
 0x170   :  { %3300 = vmatpush1.bf16.msra.mxu0 %v5269_v20  ;;  %4647 = vmatprep.subr.bf16.mxu1 %v5277_v23  ;;  %v5334_v23 = vld [vmem:[%s6943_s1 + $0xd70] ss:$12 sps:$4 sm:$0xff]  }
 0x171   :  { %3301 = vmatprep.subr.bf16.mxu0 %v5276_v22  ;;  %v5333_v22 = vld [vmem:[%s6943_s1 + $0xcac] ss:$12 sps:$4 sm:$0xff]  }
 0x173   :  { %4648 = vmatpush3.bf16.msra.mxu1 %v5278_v26 }
 0x174   :  { %3302 = vmatpush1.bf16.msra.mxu0 %v5274_v24  ;;  %4649 = vmatprep.subr.bf16.mxu1 %v5282_v28  ;;  %v5335_v28 = vld [vmem:[%s6943_s1 + $0xcb0] ss:$12 sps:$4 sm:$0xff]  }
 0x175   :  { %3303 = vmatprep.subr.bf16.mxu0 %v5281_v27  ;;  %v4501_v38 = vpop.f32.mrb[4].mxu1  ;;  %v5331_v27 = vld [vmem:[%s6943_s1 + $0xca8] ss:$12 sps:$4 sm:$0xff]  }
 0x176   :  { %v4502_v29 = vpop.f32.mrb[5].mxu1 }
 0x177   :  { %4650 = vmatpush3.bf16.msra.mxu1 %v5283_v30  ;;  %v6680_v42 = vadd.f32 %v4502_v29, %v4501_v38  ;;  %v4504_v16 = vpop.f32.mrb[6].mxu1  ;;  %v4026_v30 = vcombine.low %v6705_v53, %v6705_v53  ;;  %v5341_v38 = vld [vmem:[%s6943_s1 + $0xcd8] ss:$12 sps:$4 sm:$0xff]   ;;  %v5346_v29 = vld [vmem:[%s6943_s1 + $0xcf4] ss:$12 sps:$4 sm:$0xff]  }
 0x178   :  { %3304 = vmatpush1.bf16.msra.mxu0 %v5279_v48  ;;  %4651 = vmatprep.subr.bf16.mxu1 %v5287_v35  ;;  %v4505_v44 = vpop.f32.mrb[7].mxu1  ;;  %v5340_v48 = vld [vmem:[%s6943_s1 + $0xcc4] ss:$12 sps:$4 sm:$0xff]   ;;  %v5343_v35 = vld [vmem:[%s6943_s1 + $0xcdc] ss:$12 sps:$4 sm:$0xff]  }
 0x179   :  { %3305 = vmatprep.subr.bf16.mxu0 %v5286_v32  ;;  %v3394_v13 = vadd.f32 %v6680_v42, %v619_v9  ;;  %v5338_v32 = vld [vmem:[%s6943_s1 + $0xcc0] ss:$12 sps:$4 sm:$0xff]   ;;  %v5347_v42 = vld [vmem:[%s6943_s1 + $0xd08] ss:$12 sps:$4 sm:$0xff]   ;;  %v5352_v16 = vld [vmem:[%s6943_s1 + $0xd24] ss:$12 sps:$4 sm:$0xff]  }
 0x17a   :  { %v5353_v44 = vld [vmem:[%s6943_s1 + $0xd38] ss:$12 sps:$4 sm:$0xff]  }
 0x17b   :  { %4652 = vmatpush3.bf16.msra.mxu1 %v5288_v40  ;;  %v5349_v40 = vld [vmem:[%s6943_s1 + $0xd0c] ss:$12 sps:$4 sm:$0xff]  }
 0x17c   :  { %3306 = vmatpush1.bf16.msra.mxu0 %v5284_v39  ;;  %4653 = vmatprep.subr.bf16.mxu1 %v5292_v43  ;;  %v5344_v39 = vld [vmem:[%s6943_s1 + $0xcf0] ss:$12 sps:$4 sm:$0xff]  }
 0x17d   :  { %3307 = vmatprep.subr.bf16.mxu0 %v5291_v17  ;;  %v5350_v17 = vld [vmem:[%s6943_s1 + $0xd20] ss:$12 sps:$4 sm:$0xff]   ;;  %v5355_v43 = vld [vmem:[%s6943_s1 + $0xd3c] ss:$12 sps:$4 sm:$0xff]  }
 0x17e   :  { %v5369_v9 = vld [vmem:[%s6946_s3 + $0x18] sm:$0xff]  }
 0x17f   :  { %4654 = vmatpush3.bf16.msra.mxu1 %v5293_v45 }
 0x180   :  { %3308 = vmatpush1.bf16.msra.mxu0 %v5289_v34  ;;  %4661 = vmatprep.subr.bf16.mxu1 %v5299_v46  ;;  %v5358_v34 = vld [vmem:[%s6943_s1 + $0xd54] ss:$12 sps:$4 sm:$0xff]  }
 0x181   :  { %3318 = vmatprep.subr.bf16.mxu0 %v5298_v33 }
 0x182   :  { %3672 = vmatmul.mubr.bf16.vlgmr.msra.gmra.mrb[32].mxu1 %v4024_v47 }
 0x183   :  { %3310 = vmatmul.mubr.bf16.vlgmr.msra.gmra.mrb[0].mxu0 %v4024_v47  ;;  %4662 = vmatpush3.bf16.msra.mxu1 %v5300_v50  ;;  %v5356_v47 = vld [vmem:[%s6943_s1 + $0xd50] ss:$12 sps:$4 sm:$0xff]  }
 0x184   :  { %3319 = vmatpush1.bf16.msra.mxu0 %v5296_v49  ;;  %4663 = vmatprep.subr.bf16.mxu1 %v5304_v51  ;;  %v5361_v49 = vld [vmem:[%s6943_s1 + $0xd6c] ss:$12 sps:$4 sm:$0xff]   ;;  %v5359_v51 = vld [vmem:[%s6943_s1 + $0xd68] ss:$12 sps:$4 sm:$0xff]  }
 0x185   :  { %3320 = vmatprep.subr.bf16.mxu0 %v5303_v41  ;;  %3711 = vmatprep.mubr.bf16.mxu1 %v4027_v52 }
 0x186   :  { %3350 = vmatprep.mubr.bf16.mxu0 %v4027_v52 }
 0x187   :  { %4664 = vmatpush3.bf16.msra.mxu1 %v5305_v55 }
 0x188   :  { %3321 = vmatpush1.bf16.msra.mxu0 %v5301_v54  ;;  %4665 = vmatprep.subr.bf16.mxu1 %v5309_v57 }
 0x189   :  { %3322 = vmatprep.subr.bf16.mxu0 %v5308_v56 }
 0x18b   :  { %4666 = vmatpush3.bf16.msra.mxu1 %v5310_v60 }
 0x18c   :  { %3323 = vmatpush1.bf16.msra.mxu0 %v5306_v59  ;;  %4667 = vmatprep.subr.bf16.mxu1 %v5314_v63 }
 0x18d   :  { %3324 = vmatprep.subr.bf16.mxu0 %v5313_v61 }
 0x18f   :  { %4668 = vmatpush3.bf16.msra.mxu1 %v5315_v36 }
 0x190   :  { %3325 = vmatpush1.bf16.msra.mxu0 %v5311_v1  ;;  %4669 = vmatprep.subr.bf16.mxu1 %v5319_v7  ;;  %v5363_v7 = vld [vmem:[%s6946_s3] sm:$0xff]  }
 0x191   :  { %3326 = vmatprep.subr.bf16.mxu0 %v5318_v2  ;;  %v5362_v2 = vld [vmem:[%s6946_s3 + $0x40] sm:$0xff]  }
 0x193   :  { %4670 = vmatpush3.bf16.msra.mxu1 %v5320_v5  ;;  %v5366_v5 = vld [vmem:[%s6946_s3 + $0x50] sm:$0xff]  }
 0x194   :  { %3327 = vmatpush1.bf16.msra.mxu0 %v5316_v4  ;;  %4671 = vmatprep.subr.bf16.mxu1 %v5324_v8  ;;  %v5365_v4 = vld [vmem:[%s6946_s3 + $0x8] sm:$0xff]   ;;  %v5368_v8 = vld [vmem:[%s6946_s3 + $0x58] sm:$0xff]  }
 0x195   :  { %3328 = vmatprep.subr.bf16.mxu0 %v5323_v25  ;;  %v4523_v14 = vpop.f32.mrb[8].mxu1  ;;  %v5367_v25 = vld [vmem:[%s6946_s3 + $0x10] sm:$0xff]  }
 0x196   :  { %v4524_v15 = vpop.f32.mrb[9].mxu1 }
 0x197   :  { %4672 = vmatpush3.bf16.msra.mxu1 %v5325_v31  ;;  %v4525_v20 = vadd.f32 %v4524_v15, %v4523_v14  ;;  %v4526_v21 = vpop.f32.mrb[10].mxu1  ;;  %v5371_v31 = vld [vmem:[%s6946_s3 + $0x20] sm:$0xff]   ;;  %v5375_v14 = vld [vmem:[%s6946_s3 + $0x30] sm:$0xff]  }
 0x198   :  { %3329 = vmatpush1.bf16.msra.mxu0 %v5321_v10  ;;  %4673 = vmatprep.subr.bf16.mxu1 %v5329_v12  ;;  %v4527_v24 = vpop.f32.mrb[11].mxu1  ;;  %v5370_v10 = vld [vmem:[%s6946_s3 + $0x60] sm:$0xff]   ;;  %v5373_v12 = vld [vmem:[%s6946_s3 + $0x28] sm:$0xff]   ;;  %v5376_v21 = vld [vmem:[%s6946_s3 + $0x78] sm:$0xff]  }
 0x199   :  { %3330 = vmatprep.subr.bf16.mxu0 %v5328_v11  ;;  %v3434_v26 = vadd.f32 %v4525_v20, %v3394_v13  ;;  %v5372_v11 = vld [vmem:[%s6946_s3 + $0x68] sm:$0xff]   ;;  %v5374_v13 = vld [vmem:[%s6946_s3 + $0x70] sm:$0xff]  }
 0x19b   :  { %4674 = vmatpush3.bf16.msra.mxu1 %v5330_v19 }
 0x19c   :  { %3331 = vmatpush1.bf16.msra.mxu0 %v5326_v18  ;;  %4675 = vmatprep.subr.bf16.mxu1 %v5334_v23  ;;  %v5377_v23 = vld [vmem:[%s6946_s3 + $0x38] sm:$0xff]  }
 0x19d   :  { %3332 = vmatprep.subr.bf16.mxu0 %v5333_v22 }
 0x19f   :  { %4676 = vmatpush3.bf16.msra.mxu1 %v5335_v28 }
 0x1a0   :  { %3333 = vmatpush1.bf16.msra.mxu0 %v5331_v27  ;;  %4683 = vmatprep.subr.bf16.mxu1 %v5362_v2  ;;  %v5385_v2 = vld [vmem:[%s6946_s3 + $0xb8] sm:$0xff]  }
 0x1a1   :  { %3334 = vmatprep.subr.bf16.mxu0 %v5340_v48 }
 0x1a2   :  { %3712 = vmatmul.mubr.bf16.vlgmr.msra.gmra.mrb[36].mxu1 %v4026_v30 }
 0x1a3   :  { %4684 = vmatpush3.bf16.msra.mxu1 %v5363_v7 }
 0x1a4   :  { %3335 = vmatpush1.bf16.msra.mxu0 %v5338_v32  ;;  %4685 = vmatprep.subr.bf16.mxu1 %v5364_v3 }
 0x1a5   :  { %3336 = vmatprep.subr.bf16.mxu0 %v5343_v35 }
 0x1a7   :  { %4686 = vmatpush3.bf16.msra.mxu1 %v5365_v4 }
 0x1a8   :  { %3337 = vmatpush1.bf16.msra.mxu0 %v5341_v38  ;;  %4687 = vmatprep.subr.bf16.mxu1 %v5366_v5 }
 0x1a9   :  { %3338 = vmatprep.subr.bf16.mxu0 %v5346_v29 }
 0x1ab   :  { %4688 = vmatpush3.bf16.msra.mxu1 %v5367_v25 }
 0x1ac   :  { %3339 = vmatpush1.bf16.msra.mxu0 %v5344_v39  ;;  %4689 = vmatprep.subr.bf16.mxu1 %v5368_v8 }
 0x1ad   :  { %3340 = vmatprep.subr.bf16.mxu0 %v5349_v40 }
 0x1af   :  { %4690 = vmatpush3.bf16.msra.mxu1 %v5369_v9 }
 0x1b0   :  { %3341 = vmatpush1.bf16.msra.mxu0 %v5347_v42  ;;  %4691 = vmatprep.subr.bf16.mxu1 %v5370_v10  ;;  %v4460_v10 = vld [vmem:[%s6947_s4] ss:$0 sm:$0xff] }
 0x1b1   :  { %3342 = vmatprep.subr.bf16.mxu0 %v5352_v16 }
 0x1b3   :  { %4692 = vmatpush3.bf16.msra.mxu1 %v5371_v31 }
 0x1b4   :  { %3343 = vmatpush1.bf16.msra.mxu0 %v5350_v17  ;;  %4693 = vmatprep.subr.bf16.mxu1 %v5372_v11 }
 0x1b5   :  { %3344 = vmatprep.subr.bf16.mxu0 %v5355_v43  ;;  %v4545_v45 = vpop.f32.mrb[12].mxu1 }
 0x1b6   :  { %v4546_v33 = vpop.f32.mrb[13].mxu1 }
 0x1b7   :  { %v4547_v46 = vadd.f32 %v4546_v33, %v4545_v45  ;;  %v4548_v53 = vpop.f32.mrb[14].mxu1  ;;  %4694 = vmatpush3.bf16.msra.mxu1 %v5373_v12 }
 0x1b8   :  { %3345 = vmatpush1.bf16.msra.mxu0 %v5353_v44  ;;  %v4549_v50 = vpop.f32.mrb[15].mxu1  ;;  %4695 = vmatprep.subr.bf16.mxu1 %v5374_v13 }
 0x1b9   :  { %3346 = vmatprep.subr.bf16.mxu0 %v5358_v34  ;;  %v3474_v41 = vadd.f32 %v4547_v46, %v3434_v26  ;;  %v5386_v26 = vmov 0.0   ;;  %v610_v46 = vsub.s32 0, %v6745_v0 }
 0x1bb   :  { %4696 = vmatpush3.bf16.msra.mxu1 %v5375_v14  ;;  %v611_v53 = vrot.slane %v6769_v37, %v610_v46 }
 0x1bc   :  { %3347 = vmatpush1.bf16.msra.mxu0 %v5356_v47  ;;  %4697 = vmatprep.subr.bf16.mxu1 %v5376_v21  ;;  %v614_v47 = vsub.s32 1, %v6745_v0  ;;  %v5378_v0 = vld [vmem:[%s6946_s3 + $0x80] sm:$0xff]  }
 0x1bd   :  { %3348 = vmatprep.subr.bf16.mxu0 %v5361_v49  ;;  %v4734_v50 = vadd.f32 %v6572_v6, %v611_v53  ;;  %v5379_v6 = vld [vmem:[%s6946_s3 + $0x88] sm:$0xff]  }
 0x1be   :  { %v615_v49 = vrot.slane %v6769_v37, %v614_v47  ;;  %v5381_v37 = vld [vmem:[%s6946_s3 + $0x98] sm:$0xff]  }
 0x1bf   :  { %4698 = vmatpush3.bf16.msra.mxu1 %v5377_v23 }
 0x1c0   :  { %3349 = vmatpush1.bf16.msra.mxu0 %v5359_v51  ;;  %4714 = vmatprep.subr.bf16.mxu1 %v5386_v26 }
 0x1c3   :  { %3351 = vmatmul.mubr.bf16.vlgmr.msra.gmra.mrb[0].mxu0 %v4026_v30 }
 0x1d5   :  { %v4567_v52 = vpop.f32.mrb[16].mxu1 }
 0x1d6   :  { %v4568_v54 = vpop.f32.mrb[17].mxu1 }
 0x1d7   :  { %v4569_v55 = vadd.f32 %v4568_v54, %v4567_v52  ;;  %v4570_v56 = vpop.f32.mrb[18].mxu1 }
 0x1d8   :  { %v4571_v57 = vpop.f32.mrb[19].mxu1 }
 0x1d9   :  { %v3514_v58 = vadd.f32 %v4569_v55, %v3474_v41  ;;  %v4736_v41 = vadd.f32 %v6574_v62, %v615_v49  ;;  %v5380_v62 = vld [vmem:[%s6946_s3 + $0x90] sm:$0xff]  }
 0x1f5   :  { %v4589_v59 = vpop.f32.mrb[20].mxu1 }
 0x1f6   :  { %v4590_v60 = vpop.f32.mrb[21].mxu1 }
 0x1f7   :  { %v4591_v61 = vadd.f32 %v4590_v60, %v4589_v59  ;;  %v4592_v63 = vpop.f32.mrb[22].mxu1 }
 0x1f8   :  { %v4593_v1 = vpop.f32.mrb[23].mxu1  ;;  %v5382_v63 = vld [vmem:[%s6946_s3 + $0xa0] sm:$0xff]  }
 0x1f9   :  { %v3554_v36 = vadd.f32 %v4591_v61, %v3514_v58  ;;  %v5383_v1 = vld [vmem:[%s6946_s3 + $0xa8] sm:$0xff]  }
 0x215   :  { %v4611_v15 = vpop.f32.mrb[24].mxu1 }
 0x216   :  { %v4612_v18 = vpop.f32.mrb[25].mxu1 }
 0x217   :  { %v4613_v19 = vadd.f32 %v4612_v18, %v4611_v15  ;;  %v4614_v20 = vpop.f32.mrb[26].mxu1 }
 0x218   :  { %v4615_v22 = vpop.f32.mrb[27].mxu1 }
 0x219   :  { %v3594_v24 = vadd.f32 %v4613_v19, %v3554_v36  ;;  %v5384_v36 = vld [vmem:[%s6946_s3 + $0xb0] sm:$0xff]  }
 0x235   :  { %v4633_v27 = vpop.f32.mrb[28].mxu1 }
 0x236   :  { %v4634_v28 = vpop.f32.mrb[29].mxu1 }
 0x237   :  { %v4635_v48 = vadd.f32 %v4634_v28, %v4633_v27  ;;  %v4636_v30 = vpop.f32.mrb[30].mxu1 }
 0x238   :  { %v4637_v32 = vpop.f32.mrb[31].mxu1 }
 0x239   :  { %v3634_v35 = vadd.f32 %v4635_v48, %v3594_v24 }
 0x255   :  { %v4655_v38 = vpop.f32.mrb[32].mxu1 }
 0x256   :  { %v4656_v29 = vpop.f32.mrb[33].mxu1 }
 0x257   :  { %v4657_v39 = vadd.f32 %v4656_v29, %v4655_v38  ;;  %v4658_v40 = vpop.f32.mrb[34].mxu1 }
 0x258   :  { %v4659_v42 = vpop.f32.mrb[35].mxu1 }
 0x259   :  { %v3674_v16 = vadd.f32 %v4657_v39, %v3634_v35 }
 0x275   :  { %v4677_v17 = vpop.f32.mrb[36].mxu1 }
 0x276   :  { %v4678_v43 = vpop.f32.mrb[37].mxu1 }
 0x277   :  { %v4679_v44 = vadd.f32 %v4678_v43, %v4677_v17  ;;  %v4680_v34 = vpop.f32.mrb[38].mxu1 }
 0x278   :  { %v4681_v45 = vpop.f32.mrb[39].mxu1 }
 0x279   :  { %v3714_v33 = vadd.f32 %v4679_v44, %v3674_v16 }
 0x27b   :  { %v3721_v7 = vmax.f32 %v3714_v33, 0.0 }
 0x27d   :  { %v3724_v3 = vpack.c.bf16 %v3721_v7, %v3721_v7 }
 0x296   :  { %v3352_v51 = vpop.f32.mrb[0].mxu0 }
 0x297   :  { %v4735_v52 = vadd.f32 %v4734_v50, %v3352_v51  ;;  %v3354_v54 = vpop.f32.mrb[1].mxu0 }
 0x298   :  { %v4737_v55 = vadd.f32 %v4736_v41, %v3354_v54  ;;  %v3356_v56 = vpop.f32.mrb[2].mxu0 }
 0x299   :  { %v3719_v57 = vmax.f32 %v4735_v52, 0.0  ;;  %v3357_v58 = vpop.f32.mrb[3].mxu0 }
 0x29a   :  { %v3720_v59 = vmax.f32 %v4737_v55, 0.0 }
 0x29b   :  { %v3722_v61 = vpack.c.bf16 %v3719_v57, %v3719_v57 }
 0x29c   :  { %v3723_v60 = vpack.c.bf16 %v3720_v59, %v3720_v59 }
 0x29e   :  { %3956 = vmatprep.mubr.bf16.mxu1 %v3723_v60 }
 0x29f   :  { %3957 = vmatmul.mubr.bf16.vlgmr.msra.gmra.mrb[40].mxu1 %v3722_v61 }
 0x2a0   :  { %4715 = vmatpush3.bf16.msra.mxu1 %v5378_v0  ;;  %4730 = vmatprep.mubr.msk.bf16.mxu1 %vm5387_vm0, %v5386_v26 }
 0x2a1   :  { %4716 = vmatprep.subr.bf16.mxu1 %v5386_v26 }
 0x2a4   :  { %4717 = vmatpush3.bf16.msra.mxu1 %v5379_v6 }
 0x2a5   :  { %4718 = vmatprep.subr.bf16.mxu1 %v5386_v26 }
 0x2a8   :  { %4719 = vmatpush3.bf16.msra.mxu1 %v5380_v62 }
 0x2a9   :  { %4720 = vmatprep.subr.bf16.mxu1 %v5386_v26 }
 0x2ac   :  { %4721 = vmatpush3.bf16.msra.mxu1 %v5381_v37 }
 0x2ad   :  { %4722 = vmatprep.subr.bf16.mxu1 %v5386_v26 }
 0x2b0   :  { %4723 = vmatpush3.bf16.msra.mxu1 %v5382_v63 }
 0x2b1   :  { %4724 = vmatprep.subr.bf16.mxu1 %v5386_v26 }
 0x2b4   :  { %4725 = vmatpush3.bf16.msra.mxu1 %v5383_v1 }
 0x2b5   :  { %4726 = vmatprep.subr.bf16.mxu1 %v5386_v26 }
 0x2b8   :  { %4727 = vmatpush3.bf16.msra.mxu1 %v5384_v36 }
 0x2b9   :  { %4728 = vmatprep.subr.bf16.mxu1 %v5386_v26 }
 0x2bc   :  { %4729 = vmatpush3.bf16.msra.mxu1 %v5385_v2 }
 0x2bf   :  { %4731 = vmatmul.mubr.bf16.vlgmr.msra.gmra.mrb[44].mxu1 %v3724_v3 }
 0x372   :  { %v4699_v4 = vpop.f32.mrb[40].mxu1 }
 0x373   :  { %v4700_v5 = vpop.f32.mrb[41].mxu1 }
 0x374   :  { %v4701_v25 = vadd.f32 %v4700_v5, %v4699_v4  ;;  %v4702_v8 = vpop.f32.mrb[42].mxu1 }
 0x375   :  { %v4703_v9 = vpop.f32.mrb[43].mxu1 }
 0x376   :  { %v3959_v31 = vadd.f32 %v4701_v25, %v4460_v10 }
 0x392   :  { %v3998_v11 = vpop.f32.mrb[44].mxu1 }
 0x393   :  { %v3999_v12 = vadd.f32 %v3998_v11, %v3959_v31  ;;  %v4732_v13 = vpop.f32.mrb[45].mxu1 }
 0x394   :  { %v4001_v14 = vpop.f32.mrb[46].mxu1 }
 0x395   :  { %v4004_v15 = vmax.f32 %v3999_v12, 0.0  ;;  %v4733_v18 = vpop.f32.mrb[47].mxu1 }
 0x397   :  { %4005 = vst [vmem:[%s6948_s5] sm:$0xff] %v4004_v15 }

</bundles_post_ra>
